<compile_context>
chip_gen: v7x
topology: tpu7x:2x2x1
jax: 0.10.0
libtpu: 0.0.40
codegen_flags: <defaults>
</compile_context>

<pallas_src>
import jax
import jax.numpy as jnp
from jax import lax
from jax.experimental import pallas as pl
from jax.experimental.pallas import tpu as pltpu


# ----------------------------------------------------------------------------
# Pallas kernel: one time-chunk of the bidirectional GRU per grid step
# ----------------------------------------------------------------------------
def gru_encoder_kernel(
    emb_f_ref,   # (T*Bp, E)   bf16  emb rows for fwd chunk t (time-major blocks of Bp)
    emb_b_ref,   # (T*Bp, E)   bf16  emb rows for chunk nt-1-t (consumed reversed)
    wih_f_ref,   # (E, 3*Hp)   bf16  input proj fwd, gate blocks [r|z|n], lane-aligned
    wih_b_ref,   # (E, 3*Hp)   bf16
    bih_f_ref,   # (1, 3*Hp)   f32   b_ih (+ folded b_hh for r,z)
    bih_b_ref,   # (1, 3*Hp)   f32
    bhhn_f_ref,  # (1, Hp)     f32   b_hh of n gate (must stay inside r*(...))
    bhhn_b_ref,  # (1, Hp)     f32
    whh_f_ref,   # (Hp, 3*Hp)  bf16  hidden proj fwd
    whh_b_ref,   # (Hp, 3*Hp)  bf16
    wfc_f_ref,   # (Hp, Dp)    bf16  fc head, fwd-hidden rows
    wfc_b_ref,   # (Hp, Dp)    bf16  fc head, bwd-hidden rows
    bfc_ref,     # (1, Dp)     f32
    out_f_ref,   # (T, Bp, Hp) f32   fwd outputs for chunk t
    out_b_ref,   # (T, Bp, Hp) f32   bwd outputs for chunk nt-1-t
    hid_ref,     # (Bp, Dp)    f32   tanh(fc(cat(h_f, h_b))), written on last step
    gi_f_ref,    # VMEM scratch (T*Bp, 3*Hp) f32
    gi_b_ref,    # VMEM scratch (T*Bp, 3*Hp) f32
    hf_ref,      # VMEM scratch (Bp, Hp) f32  fwd hidden, persists across grid
    hb_ref,      # VMEM scratch (Bp, Hp) f32  bwd hidden, persists across grid
):
    T, Bp, Hp = out_f_ref.shape
    t = pl.program_id(0)
    nt = pl.num_programs(0)

    @pl.when(t == 0)
    def _():
        hf_ref[...] = jnp.zeros_like(hf_ref)
        hb_ref[...] = jnp.zeros_like(hb_ref)

    # Hoisted input projections for the whole chunk, both directions.
    # bf16 MXU operands, f32 accumulation; r/z b_hh already folded into bih.
    gi_f_ref[...] = (
        jnp.dot(emb_f_ref[...], wih_f_ref[...],
                preferred_element_type=jnp.float32)
        + bih_f_ref[...]
    )
    gi_b_ref[...] = (
        jnp.dot(emb_b_ref[...], wih_b_ref[...],
                preferred_element_type=jnp.float32)
        + bih_b_ref[...]
    )

    whh_f = whh_f_ref[...]
    whh_b = whh_b_ref[...]
    # hoist broadcasts out of the loop (broadcast_in_dim is not CSE'd)
    bhhn_f = jnp.broadcast_to(bhhn_f_ref[...], (Bp, Hp))
    bhhn_b = jnp.broadcast_to(bhhn_b_ref[...], (Bp, Hp))

    def gru_cell(gi, gh, bhh_n, h):
        # lane-aligned gate blocks r | z | n at offsets 0 / Hp / 2*Hp
        r = jax.nn.sigmoid(gi[:, 0:Hp] + gh[:, 0:Hp])
        z = jax.nn.sigmoid(gi[:, Hp:2 * Hp] + gh[:, Hp:2 * Hp])
        n = jnp.tanh(gi[:, 2 * Hp:3 * Hp] + r * (gh[:, 2 * Hp:3 * Hp] + bhh_n))
        return n + z * (h - n)                      # == (1-z)*n + z*h

    def step(i, carry):
        h_f, h_b = carry
        # Two independent per-direction hidden matmuls (pipeline in the MXU).
        gh_f = jnp.dot(h_f.astype(jnp.bfloat16), whh_f,
                       preferred_element_type=jnp.float32)
        gh_b = jnp.dot(h_b.astype(jnp.bfloat16), whh_b,
                       preferred_element_type=jnp.float32)
        rf = pl.multiple_of(i * Bp, Bp)
        rb = pl.multiple_of((T - 1 - i) * Bp, Bp)    # bwd walks its chunk reversed
        gif = gi_f_ref[pl.ds(rf, Bp), :]
        gib = gi_b_ref[pl.ds(rb, Bp), :]
        h_f = gru_cell(gif, gh_f, bhhn_f, h_f)
        h_b = gru_cell(gib, gh_b, bhhn_b, h_b)
        out_f_ref[i, :, :] = h_f                     # lane-dense (Bp, Hp) stores
        out_b_ref[T - 1 - i, :, :] = h_b
        return h_f, h_b

    h_f, h_b = lax.fori_loop(0, T, step, (hf_ref[...], hb_ref[...]),
                             unroll=True)
    hf_ref[...] = h_f
    hb_ref[...] = h_b

    @pl.when(t == nt - 1)
    def _():
        # hidden = tanh(fc(cat(h_f_final, h_b_final)))
        hid_ref[...] = jnp.tanh(
            jnp.dot(h_f.astype(jnp.bfloat16), wfc_f_ref[...],
                    preferred_element_type=jnp.float32)
            + jnp.dot(h_b.astype(jnp.bfloat16), wfc_b_ref[...],
                      preferred_element_type=jnp.float32)
            + bfc_ref[...]
        )


# ----------------------------------------------------------------------------
# Wrapper: embedding gather + weight re-layout + pallas_call
# ----------------------------------------------------------------------------
def _round_up(x, m):
    return ((x + m - 1) // m) * m


def _pick_time_chunk(S, cap=8):
    t = min(S, cap)
    while S % t:
        t -= 1
    return t


def encoder_forward(tok_seq, params, from_lang="src"):
    f32, bf16 = jnp.float32, jnp.bfloat16
    emb_table = params["emb_src"] if from_lang == "src" else params["emb_tgt"]
    special = params["emb_special"]
    nspecial = special.shape[0]

    # Gather from the language table and patch special ids (no per-call rebuild
    # of the merged (vocab, E) table).
    emb_main = jnp.take(emb_table, tok_seq, axis=0)
    emb_spec = jnp.take(special, jnp.clip(tok_seq, 0, nspecial - 1), axis=0)
    embedded = jnp.where((tok_seq < nspecial)[..., None], emb_spec, emb_main)
    embedded = embedded.astype(f32)                         # (S, B, E)
    # dropout: identity (eval mode)

    S, B, E = embedded.shape
    H = params["whh_f"].shape[1]          # enc_hid
    D = params["b_fc"].shape[0]           # dec_hid

    Bp = _round_up(max(B, 8), 8)          # full sublanes -> unmasked per-step tiles
    Hp = _round_up(H, 128)                # vreg-aligned per-direction width
    Dp = _round_up(D, 128)                # lane-dense hidden output
    T = _pick_time_chunk(S)               # time chunk (divides S)
    nt = S // T

    if Bp != B:
        embedded = jnp.pad(embedded, ((0, 0), (0, Bp - B), (0, 0)))
    emb_flat = embedded.reshape(S * Bp, E).astype(bf16)     # step-major rows

    wih_f = params["wih_f"].astype(f32); whh_f = params["whh_f"].astype(f32)
    wih_b = params["wih_b"].astype(f32); whh_b = params["whh_b"].astype(f32)
    bih_f = params["bih_f"].astype(f32); bhh_f = params["bhh_f"].astype(f32)
    bih_b = params["bih_b"].astype(f32); bhh_b = params["bhh_b"].astype(f32)

    def relayout_dir(wih, whh, bih, bhh):
        wih_c = jnp.zeros((E, 3 * Hp), f32)
        whh_c = jnp.zeros((Hp, 3 * Hp), f32)
        bih_c = jnp.zeros((1, 3 * Hp), f32)
        for g in range(3):                # PyTorch gate order [r, z, n]
            sl = slice(g * H, (g + 1) * H)
            c0 = g * Hp
            wih_c = wih_c.at[:, c0:c0 + H].set(wih[sl].T)
            whh_c = whh_c.at[0:H, c0:c0 + H].set(whh[sl].T)
            b = bih[sl] + (bhh[sl] if g < 2 else 0.0)   # fold b_hh of r,z
            bih_c = bih_c.at[0, c0:c0 + H].set(b)
        bhhn = jnp.zeros((1, Hp), f32).at[0, 0:H].set(bhh[2 * H:3 * H])
        return wih_c.astype(bf16), whh_c.astype(bf16), bih_c, bhhn

    wih_fc, whh_fc, bih_fc, bhhn_fc = relayout_dir(wih_f, whh_f, bih_f, bhh_f)
    wih_bc, whh_bc, bih_bc, bhhn_bc = relayout_dir(wih_b, whh_b, bih_b, bhh_b)

    w_fc = params["w_fc"].astype(f32)                               # (D, 2H)
    wfc_f = jnp.zeros((Hp, Dp), f32).at[0:H, 0:D].set(w_fc[:, 0:H].T).astype(bf16)
    wfc_b = jnp.zeros((Hp, Dp), f32).at[0:H, 0:D].set(w_fc[:, H:2 * H].T).astype(bf16)
    bfc = jnp.zeros((1, Dp), f32).at[0, 0:D].set(params["b_fc"].astype(f32))

    # VMEM footprint (double-buffered gridded specs x2), sized -> vmem limit.
    footprint = (
        2 * 2 * (T * Bp * E * 2)                       # emb chunks (bf16)
        + 2 * 2 * (E * 3 * Hp * 2 + Hp * 3 * Hp * 2)   # wih/whh (bf16)
        + 2 * 2 * (3 * Hp * 4 + Hp * 4)                # bih/bhhn (f32)
        + 2 * 2 * (Hp * Dp * 2) + 2 * (Dp * 4)         # wfc / bfc
        + 2 * 2 * (T * Bp * Hp * 4) + 2 * (Bp * Dp * 4)   # out_f/out_b/hid
        + 2 * (T * Bp * 3 * Hp * 4) + 2 * (Bp * Hp * 4)   # gi / h scratch
    )
    vmem_limit = int(min(max(2 * footprint, 16 * 2**20), 48 * 2**20))

    grid_spec = pltpu.PrefetchScalarGridSpec(
        num_scalar_prefetch=0,
        grid=(nt,),
        in_specs=[
            pl.BlockSpec((T * Bp, E), lambda t: (t, 0)),            # emb fwd chunk
            pl.BlockSpec((T * Bp, E), lambda t: (nt - 1 - t, 0)),   # emb bwd chunk
            pl.BlockSpec((E, 3 * Hp), lambda t: (0, 0)),
            pl.BlockSpec((E, 3 * Hp), lambda t: (0, 0)),
            pl.BlockSpec((1, 3 * Hp), lambda t: (0, 0)),
            pl.BlockSpec((1, 3 * Hp), lambda t: (0, 0)),
            pl.BlockSpec((1, Hp), lambda t: (0, 0)),
            pl.BlockSpec((1, Hp), lambda t: (0, 0)),
            pl.BlockSpec((Hp, 3 * Hp), lambda t: (0, 0)),
            pl.BlockSpec((Hp, 3 * Hp), lambda t: (0, 0)),
            pl.BlockSpec((Hp, Dp), lambda t: (0, 0)),
            pl.BlockSpec((Hp, Dp), lambda t: (0, 0)),
            pl.BlockSpec((1, Dp), lambda t: (0, 0)),
        ],
        out_specs=[
            pl.BlockSpec((T, Bp, Hp), lambda t: (t, 0, 0)),            # out_f
            pl.BlockSpec((T, Bp, Hp), lambda t: (nt - 1 - t, 0, 0)),   # out_b
            pl.BlockSpec((Bp, Dp), lambda t: (0, 0)),                  # hidden
        ],
        scratch_shapes=[
            pltpu.VMEM((T * Bp, 3 * Hp), f32),
            pltpu.VMEM((T * Bp, 3 * Hp), f32),
            pltpu.VMEM((Bp, Hp), f32),
            pltpu.VMEM((Bp, Hp), f32),
        ],
    )

    out_f, out_b, hid = pl.pallas_call(
        gru_encoder_kernel,
        out_shape=(
            jax.ShapeDtypeStruct((S, Bp, Hp), f32),
            jax.ShapeDtypeStruct((S, Bp, Hp), f32),
            jax.ShapeDtypeStruct((Bp, Dp), f32),
        ),
        grid_spec=grid_spec,
        compiler_params=pltpu.CompilerParams(
            dimension_semantics=("arbitrary",),      # serial recurrence over time
            vmem_limit_bytes=vmem_limit,
        ),
    )(emb_flat, emb_flat, wih_fc, wih_bc, bih_fc, bih_bc,
      bhhn_fc, bhhn_bc, whh_fc, whh_bc, wfc_f, wfc_b, bfc)

    outputs = jnp.concatenate([out_f[:, :B, :H], out_b[:, :B, :H]], axis=-1)
    hidden = hid[:B, :D]
    return outputs, hidden


# ----------------------------------------------------------------------------
# Pure-JAX reference (mirrors torch.nn.GRU semantics) for a correctness check
# ----------------------------------------------------------------------------
def _gru_ref(emb, wih, whh, bih, bhh, reverse):
    H = whh.shape[1]
    xs = emb[::-1] if reverse else emb

    def cell(h, x):
        gi = x @ wih.T + bih
        gh = h @ whh.T + bhh
        r = jax.nn.sigmoid(gi[:, :H] + gh[:, :H])
        z = jax.nn.sigmoid(gi[:, H:2 * H] + gh[:, H:2 * H])
        n = jnp.tanh(gi[:, 2 * H:] + r * gh[:, 2 * H:])
        h = (1.0 - z) * n + z * h
        return h, h

    h0 = jnp.zeros((emb.shape[1], H), jnp.float32)
    hT, outs = lax.scan(cell, h0, xs)
    if reverse:
        outs = outs[::-1]
    return outs, hT


def encoder_ref(tok_seq, params, from_lang="src"):
    emb_table = params["emb_src"] if from_lang == "src" else params["emb_tgt"]
    special = params["emb_special"]
    ns = special.shape[0]
    emb_main = jnp.take(emb_table, tok_seq, axis=0)
    emb_spec = jnp.take(special, jnp.clip(tok_seq, 0, ns - 1), axis=0)
    embedded = jnp.where((tok_seq < ns)[..., None], emb_spec, emb_main).astype(jnp.float32)
    out_f, hf = _gru_ref(embedded, params["wih_f"], params["whh_f"],
                         params["bih_f"], params["bhh_f"], False)
    out_b, hb = _gru_ref(embedded, params["wih_b"], params["whh_b"],
                         params["bih_b"], params["bhh_b"], True)
    outputs = jnp.concatenate([out_f, out_b], axis=-1)
    hidden = jnp.tanh(jnp.concatenate([hf, hb], axis=-1) @ params["w_fc"].T
                      + params["b_fc"])
    return outputs, hidden


# ----------------------------------------------------------------------------
# Deterministic parameter construction (mirrors the module's __init__ shapes)
# ----------------------------------------------------------------------------
def make_params(key, vocab, nspecial, pad_idx, emb_dim, enc_hid, dec_hid):
    ks = jax.random.split(key, 16)
    u = lambda k, shape, s: jax.random.uniform(k, shape, jnp.float32, -s, s)
    sh = 1.0 / jnp.sqrt(enc_hid)
    sf = 1.0 / jnp.sqrt(2 * enc_hid)

    emb_special = u(ks[2], (nspecial, emb_dim), 1.0)
    emb_special = emb_special.at[pad_idx].set(0.0)       # padding_idx row zeroed

    return {
        "emb_src": u(ks[0], (vocab, emb_dim), 1.0),
        "emb_tgt": u(ks[1], (vocab, emb_dim), 1.0),
        "emb_special": emb_special,
        # bidirectional GRU (layer 0): forward & reverse, gate order [r,z,n]
        "wih_f": u(ks[3], (3 * enc_hid, emb_dim), sh),
        "whh_f": u(ks[4], (3 * enc_hid, enc_hid), sh),
        "bih_f": u(ks[5], (3 * enc_hid,), sh),
        "bhh_f": u(ks[6], (3 * enc_hid,), sh),
        "wih_b": u(ks[7], (3 * enc_hid, emb_dim), sh),
        "whh_b": u(ks[8], (3 * enc_hid, enc_hid), sh),
        "bih_b": u(ks[9], (3 * enc_hid,), sh),
        "bhh_b": u(ks[10], (3 * enc_hid,), sh),
        # fc: Linear(2*enc_hid -> dec_hid)
        "w_fc": u(ks[11], (dec_hid, 2 * enc_hid), sf),
        "b_fc": u(ks[12], (dec_hid,), sf),
    }


if __name__ == "__main__":
    SEQ, BATCH = 8, 2
    VOCAB, NSPECIAL, PAD_IDX = 50, 4, 1
    EMB_DIM, ENC_HID, DEC_HID = 32, 32, 32

    key = jax.random.PRNGKey(0)
    kp, kt = jax.random.split(key)
    params = make_params(kp, VOCAB, NSPECIAL, PAD_IDX, EMB_DIM, ENC_HID, DEC_HID)
    tok_seq = jax.random.randint(kt, (SEQ, BATCH), 0, VOCAB, dtype=jnp.int32)

    outputs, hidden = encoder_forward(tok_seq, params, from_lang="src")
    jax.block_until_ready((outputs, hidden))

    assert outputs.shape == (SEQ, BATCH, 2 * ENC_HID)
    assert hidden.shape == (BATCH, DEC_HID)

    ref_out, ref_hid = encoder_ref(tok_seq, params, from_lang="src")
    err_o = float(jnp.max(jnp.abs(outputs - ref_out)))
    err_h = float(jnp.max(jnp.abs(hidden - ref_hid)))
    # bf16 MXU operands vs f32 reference: allow ~3e-2 absolute (pure-f32 path
    # would be ~1e-5; the slack is solely the bf16 matmul-input rounding).
    assert err_o < 3e-2 and err_h < 3e-2, (err_o, err_h)

    print("KERNEL_OK")
</pallas_src>

<mosaic_0001>
module attributes {stable_mosaic.version = 11 : i64} {
  func.func @gru_encoder_kernel(%arg0: i32, %arg1: memref<64x32xbf16, #tpu.memory_space<vmem>>, %arg2: memref<64x32xbf16, #tpu.memory_space<vmem>>, %arg3: memref<32x384xbf16, #tpu.memory_space<vmem>>, %arg4: memref<32x384xbf16, #tpu.memory_space<vmem>>, %arg5: memref<1x384xf32, #tpu.memory_space<vmem>>, %arg6: memref<1x384xf32, #tpu.memory_space<vmem>>, %arg7: memref<1x128xf32, #tpu.memory_space<vmem>>, %arg8: memref<1x128xf32, #tpu.memory_space<vmem>>, %arg9: memref<128x384xbf16, #tpu.memory_space<vmem>>, %arg10: memref<128x384xbf16, #tpu.memory_space<vmem>>, %arg11: memref<128x128xbf16, #tpu.memory_space<vmem>>, %arg12: memref<128x128xbf16, #tpu.memory_space<vmem>>, %arg13: memref<1x128xf32, #tpu.memory_space<vmem>>, %arg14: memref<8x8x128xf32, #tpu.memory_space<vmem>>, %arg15: memref<8x8x128xf32, #tpu.memory_space<vmem>>, %arg16: memref<8x128xf32, #tpu.memory_space<vmem>>, %arg17: memref<64x384xf32, #tpu.memory_space<vmem>>, %arg18: memref<64x384xf32, #tpu.memory_space<vmem>>, %arg19: memref<8x128xf32, #tpu.memory_space<vmem>>, %arg20: memref<8x128xf32, #tpu.memory_space<vmem>>) attributes {dimension_semantics = [#tpu.dimension_semantics<arbitrary>], iteration_bounds = array<i64: 1>, scalar_prefetch = 0 : i64, scratch_operands = 4 : i64, tpu.core_type = #tpu.core_type<tc>, window_params = [{transform_indices = @transform_0, window_bounds = array<i64: 64, 32>}, {transform_indices = @transform_1, window_bounds = array<i64: 64, 32>}, {pipeline_mode = #tpu.pipeline_mode<synchronous>, transform_indices = @transform_2, window_bounds = array<i64: 32, 384>}, {pipeline_mode = #tpu.pipeline_mode<synchronous>, transform_indices = @transform_3, window_bounds = array<i64: 32, 384>}, {pipeline_mode = #tpu.pipeline_mode<synchronous>, transform_indices = @transform_4, window_bounds = array<i64: 1, 384>}, {pipeline_mode = #tpu.pipeline_mode<synchronous>, transform_indices = @transform_5, window_bounds = array<i64: 1, 384>}, {pipeline_mode = #tpu.pipeline_mode<synchronous>, transform_indices = @transform_6, window_bounds = array<i64: 1, 128>}, {pipeline_mode = #tpu.pipeline_mode<synchronous>, transform_indices = @transform_7, window_bounds = array<i64: 1, 128>}, {pipeline_mode = #tpu.pipeline_mode<synchronous>, transform_indices = @transform_8, window_bounds = array<i64: 128, 384>}, {pipeline_mode = #tpu.pipeline_mode<synchronous>, transform_indices = @transform_9, window_bounds = array<i64: 128, 384>}, {pipeline_mode = #tpu.pipeline_mode<synchronous>, transform_indices = @transform_10, window_bounds = array<i64: 128, 128>}, {pipeline_mode = #tpu.pipeline_mode<synchronous>, transform_indices = @transform_11, window_bounds = array<i64: 128, 128>}, {pipeline_mode = #tpu.pipeline_mode<synchronous>, transform_indices = @transform_12, window_bounds = array<i64: 1, 128>}, {transform_indices = @transform_13, window_bounds = array<i64: 8, 8, 128>}, {transform_indices = @transform_14, window_bounds = array<i64: 8, 8, 128>}, {pipeline_mode = #tpu.pipeline_mode<synchronous>, transform_indices = @transform_15, window_bounds = array<i64: 8, 128>}]} {
    %c0_i32 = arith.constant 0 : i32
    %0 = arith.cmpi eq, %arg0, %c0_i32 : i32
    %1 = arith.extui %0 : i1 to i32
    %c0_i32_0 = arith.constant 0 : i32
    %2 = arith.cmpi ne, %1, %c0_i32_0 : i32
    scf.if %2 {
      %cst_164 = arith.constant 0.000000e+00 : f32
      %608 = vector.broadcast %cst_164 : f32 to vector<8x128xf32>
      %c0_165 = arith.constant 0 : index
      %c0_166 = arith.constant 0 : index
      %609 = vector.load %arg19[%c0_165, %c0_166] : memref<8x128xf32, #tpu.memory_space<vmem>>, vector<8x128xf32>
      tpu.vector_store %arg19[%c0_165, %c0_166], %608 {strides = array<i32>} : memref<8x128xf32, #tpu.memory_space<vmem>>, vector<8x128xf32>,
      %cst_167 = arith.constant 0.000000e+00 : f32
      %610 = vector.broadcast %cst_167 : f32 to vector<8x128xf32>
      %c0_168 = arith.constant 0 : index
      %c0_169 = arith.constant 0 : index
      %611 = vector.load %arg20[%c0_168, %c0_169] : memref<8x128xf32, #tpu.memory_space<vmem>>, vector<8x128xf32>
      tpu.vector_store %arg20[%c0_168, %c0_169], %610 {strides = array<i32>} : memref<8x128xf32, #tpu.memory_space<vmem>>, vector<8x128xf32>,
    } else {
    }
    %c0 = arith.constant 0 : index
    %c0_1 = arith.constant 0 : index
    %3 = vector.load %arg1[%c0, %c0_1] : memref<64x32xbf16, #tpu.memory_space<vmem>>, vector<64x32xbf16>
    %c0_2 = arith.constant 0 : index
    %c0_3 = arith.constant 0 : index
    %4 = vector.load %arg3[%c0_2, %c0_3] : memref<32x384xbf16, #tpu.memory_space<vmem>>, vector<32x384xbf16>
    %cst = arith.constant dense<0.000000e+00> : vector<64x384xf32>
    %5 = tpu.matmul %3, %4, %cst {dimension_numbers = #tpu.dot_dimension_numbers<[1], [0], [0], [1], [0, 0, 1, 1], [], []>} : vector<64x32xbf16>, vector<32x384xbf16>, vector<64x384xf32> -> vector<64x384xf32>
    %c0_4 = arith.constant 0 : index
    %c0_5 = arith.constant 0 : index
    %6 = vector.load %arg5[%c0_4, %c0_5] : memref<1x384xf32, #tpu.memory_space<vmem>>, vector<1x384xf32>
    %7 = vector.broadcast %6 : vector<1x384xf32> to vector<64x384xf32>
    %8 = arith.addf %5, %7 : vector<64x384xf32>
    %c0_6 = arith.constant 0 : index
    %c0_7 = arith.constant 0 : index
    %9 = vector.load %arg17[%c0_6, %c0_7] : memref<64x384xf32, #tpu.memory_space<vmem>>, vector<64x384xf32>
    tpu.vector_store %arg17[%c0_6, %c0_7], %8 {strides = array<i32>} : memref<64x384xf32, #tpu.memory_space<vmem>>, vector<64x384xf32>,
    %c0_8 = arith.constant 0 : index
    %c0_9 = arith.constant 0 : index
    %10 = vector.load %arg2[%c0_8, %c0_9] : memref<64x32xbf16, #tpu.memory_space<vmem>>, vector<64x32xbf16>
    %c0_10 = arith.constant 0 : index
    %c0_11 = arith.constant 0 : index
    %11 = vector.load %arg4[%c0_10, %c0_11] : memref<32x384xbf16, #tpu.memory_space<vmem>>, vector<32x384xbf16>
    %cst_12 = arith.constant dense<0.000000e+00> : vector<64x384xf32>
    %12 = tpu.matmul %10, %11, %cst_12 {dimension_numbers = #tpu.dot_dimension_numbers<[1], [0], [0], [1], [0, 0, 1, 1], [], []>} : vector<64x32xbf16>, vector<32x384xbf16>, vector<64x384xf32> -> vector<64x384xf32>
    %c0_13 = arith.constant 0 : index
    %c0_14 = arith.constant 0 : index
    %13 = vector.load %arg6[%c0_13, %c0_14] : memref<1x384xf32, #tpu.memory_space<vmem>>, vector<1x384xf32>
    %14 = vector.broadcast %13 : vector<1x384xf32> to vector<64x384xf32>
    %15 = arith.addf %12, %14 : vector<64x384xf32>
    %c0_15 = arith.constant 0 : index
    %c0_16 = arith.constant 0 : index
    %16 = vector.load %arg18[%c0_15, %c0_16] : memref<64x384xf32, #tpu.memory_space<vmem>>, vector<64x384xf32>
    tpu.vector_store %arg18[%c0_15, %c0_16], %15 {strides = array<i32>} : memref<64x384xf32, #tpu.memory_space<vmem>>, vector<64x384xf32>,
    %c0_17 = arith.constant 0 : index
    %c0_18 = arith.constant 0 : index
    %17 = vector.load %arg9[%c0_17, %c0_18] : memref<128x384xbf16, #tpu.memory_space<vmem>>, vector<128x384xbf16>
    %c0_19 = arith.constant 0 : index
    %c0_20 = arith.constant 0 : index
    %18 = vector.load %arg10[%c0_19, %c0_20] : memref<128x384xbf16, #tpu.memory_space<vmem>>, vector<128x384xbf16>
    %c0_21 = arith.constant 0 : index
    %c0_22 = arith.constant 0 : index
    %19 = vector.load %arg7[%c0_21, %c0_22] : memref<1x128xf32, #tpu.memory_space<vmem>>, vector<1x128xf32>
    %20 = vector.shape_cast %19 : vector<1x128xf32> to vector<1x128xf32>
    %21 = vector.broadcast %20 : vector<1x128xf32> to vector<8x128xf32>
    %c0_23 = arith.constant 0 : index
    %c0_24 = arith.constant 0 : index
    %22 = vector.load %arg8[%c0_23, %c0_24] : memref<1x128xf32, #tpu.memory_space<vmem>>, vector<1x128xf32>
    %23 = vector.shape_cast %22 : vector<1x128xf32> to vector<1x128xf32>
    %24 = vector.broadcast %23 : vector<1x128xf32> to vector<8x128xf32>
    %c0_25 = arith.constant 0 : index
    %c0_26 = arith.constant 0 : index
    %25 = vector.load %arg19[%c0_25, %c0_26] : memref<8x128xf32, #tpu.memory_space<vmem>>, vector<8x128xf32>
    %c0_27 = arith.constant 0 : index
    %c0_28 = arith.constant 0 : index
    %26 = vector.load %arg20[%c0_27, %c0_28] : memref<8x128xf32, #tpu.memory_space<vmem>>, vector<8x128xf32>
    %c0_i32_29 = arith.constant 0 : i32
    %27 = arith.truncf %25 : vector<8x128xf32> to vector<8x128xbf16>
    %cst_30 = arith.constant dense<0.000000e+00> : vector<8x384xf32>
    %28 = tpu.matmul %27, %17, %cst_30 {dimension_numbers = #tpu.dot_dimension_numbers<[1], [0], [0], [1], [0, 0, 1, 1], [], []>} : vector<8x128xbf16>, vector<128x384xbf16>, vector<8x384xf32> -> vector<8x384xf32>
    %29 = arith.truncf %26 : vector<8x128xf32> to vector<8x128xbf16>
    %cst_31 = arith.constant dense<0.000000e+00> : vector<8x384xf32>
    %30 = tpu.matmul %29, %18, %cst_31 {dimension_numbers = #tpu.dot_dimension_numbers<[1], [0], [0], [1], [0, 0, 1, 1], [], []>} : vector<8x128xbf16>, vector<128x384xbf16>, vector<8x384xf32> -> vector<8x384xf32>
    %c8_i32 = arith.constant 8 : i32
    %31 = arith.muli %c0_i32_29, %c8_i32 : i32
    %32 = tpu.assume_multiple %31, 8 : i32
    %c7_i32 = arith.constant 7 : i32
    %33 = arith.subi %c7_i32, %c0_i32_29 : i32
    %c8_i32_32 = arith.constant 8 : i32
    %34 = arith.muli %33, %c8_i32_32 : i32
    %35 = tpu.assume_multiple %34, 8 : i32
    %36 = arith.index_cast %32 : i32 to index
    %c0_33 = arith.constant 0 : index
    %37 = vector.load %arg17[%36, %c0_33] : memref<64x384xf32, #tpu.memory_space<vmem>>, vector<8x384xf32>
    %38 = arith.index_cast %35 : i32 to index
    %c0_34 = arith.constant 0 : index
    %39 = vector.load %arg18[%38, %c0_34] : memref<64x384xf32, #tpu.memory_space<vmem>>, vector<8x384xf32>
    %40 = vector.extract_strided_slice %37 {offsets = [0, 0], sizes = [8, 128], strides = [1, 1]} : vector<8x384xf32> to vector<8x128xf32>
    %41 = vector.extract_strided_slice %28 {offsets = [0, 0], sizes = [8, 128], strides = [1, 1]} : vector<8x384xf32> to vector<8x128xf32>
    %42 = arith.addf %40, %41 : vector<8x128xf32>
    %43 = arith.negf %42 : vector<8x128xf32>
    %44 = math.exp %43 : vector<8x128xf32>
    %cst_35 = arith.constant 1.000000e+00 : f32
    %45 = vector.broadcast %cst_35 : f32 to vector<8x128xf32>
    %46 = arith.addf %45, %44 : vector<8x128xf32>
    %47 = arith.divf %45, %46 : vector<8x128xf32>
    %48 = vector.extract_strided_slice %37 {offsets = [0, 128], sizes = [8, 128], strides = [1, 1]} : vector<8x384xf32> to vector<8x128xf32>
    %49 = vector.extract_strided_slice %28 {offsets = [0, 128], sizes = [8, 128], strides = [1, 1]} : vector<8x384xf32> to vector<8x128xf32>
    %50 = arith.addf %48, %49 : vector<8x128xf32>
    %51 = arith.negf %50 : vector<8x128xf32>
    %52 = math.exp %51 : vector<8x128xf32>
    %cst_36 = arith.constant 1.000000e+00 : f32
    %53 = vector.broadcast %cst_36 : f32 to vector<8x128xf32>
    %54 = arith.addf %53, %52 : vector<8x128xf32>
    %55 = arith.divf %53, %54 : vector<8x128xf32>
    %56 = vector.extract_strided_slice %37 {offsets = [0, 256], sizes = [8, 128], strides = [1, 1]} : vector<8x384xf32> to vector<8x128xf32>
    %57 = vector.extract_strided_slice %28 {offsets = [0, 256], sizes = [8, 128], strides = [1, 1]} : vector<8x384xf32> to vector<8x128xf32>
    %58 = arith.addf %57, %21 : vector<8x128xf32>
    %59 = arith.mulf %47, %58 : vector<8x128xf32>
    %60 = arith.addf %56, %59 : vector<8x128xf32>
    %61 = math.tanh %60 : vector<8x128xf32>
    %62 = arith.subf %25, %61 : vector<8x128xf32>
    %63 = arith.mulf %55, %62 : vector<8x128xf32>
    %64 = arith.addf %61, %63 : vector<8x128xf32>
    %65 = vector.extract_strided_slice %39 {offsets = [0, 0], sizes = [8, 128], strides = [1, 1]} : vector<8x384xf32> to vector<8x128xf32>
    %66 = vector.extract_strided_slice %30 {offsets = [0, 0], sizes = [8, 128], strides = [1, 1]} : vector<8x384xf32> to vector<8x128xf32>
    %67 = arith.addf %65, %66 : vector<8x128xf32>
    %68 = arith.negf %67 : vector<8x128xf32>
    %69 = math.exp %68 : vector<8x128xf32>
    %cst_37 = arith.constant 1.000000e+00 : f32
    %70 = vector.broadcast %cst_37 : f32 to vector<8x128xf32>
    %71 = arith.addf %70, %69 : vector<8x128xf32>
    %72 = arith.divf %70, %71 : vector<8x128xf32>
    %73 = vector.extract_strided_slice %39 {offsets = [0, 128], sizes = [8, 128], strides = [1, 1]} : vector<8x384xf32> to vector<8x128xf32>
    %74 = vector.extract_strided_slice %30 {offsets = [0, 128], sizes = [8, 128], strides = [1, 1]} : vector<8x384xf32> to vector<8x128xf32>
    %75 = arith.addf %73, %74 : vector<8x128xf32>
    %76 = arith.negf %75 : vector<8x128xf32>
    %77 = math.exp %76 : vector<8x128xf32>
    %cst_38 = arith.constant 1.000000e+00 : f32
    %78 = vector.broadcast %cst_38 : f32 to vector<8x128xf32>
    %79 = arith.addf %78, %77 : vector<8x128xf32>
    %80 = arith.divf %78, %79 : vector<8x128xf32>
    %81 = vector.extract_strided_slice %39 {offsets = [0, 256], sizes = [8, 128], strides = [1, 1]} : vector<8x384xf32> to vector<8x128xf32>
    %82 = vector.extract_strided_slice %30 {offsets = [0, 256], sizes = [8, 128], strides = [1, 1]} : vector<8x384xf32> to vector<8x128xf32>
    %83 = arith.addf %82, %24 : vector<8x128xf32>
    %84 = arith.mulf %72, %83 : vector<8x128xf32>
    %85 = arith.addf %81, %84 : vector<8x128xf32>
    %86 = math.tanh %85 : vector<8x128xf32>
    %87 = arith.subf %26, %86 : vector<8x128xf32>
    %88 = arith.mulf %80, %87 : vector<8x128xf32>
    %89 = arith.addf %86, %88 : vector<8x128xf32>
    %90 = arith.index_cast %c0_i32_29 : i32 to index
    %c0_39 = arith.constant 0 : index
    %c0_40 = arith.constant 0 : index
    %91 = vector.load %arg14[%90, %c0_39, %c0_40] : memref<8x8x128xf32, #tpu.memory_space<vmem>>, vector<1x8x128xf32>
    %92 = vector.shape_cast %91 : vector<1x8x128xf32> to vector<8x128xf32>
    %93 = vector.shape_cast %64 : vector<8x128xf32> to vector<1x8x128xf32>
    tpu.vector_store %arg14[%90, %c0_39, %c0_40], %93 {strides = array<i32>} : memref<8x8x128xf32, #tpu.memory_space<vmem>>, vector<1x8x128xf32>,
    %c7_i32_41 = arith.constant 7 : i32
    %94 = arith.subi %c7_i32_41, %c0_i32_29 : i32
    %95 = arith.index_cast %94 : i32 to index
    %c0_42 = arith.constant 0 : index
    %c0_43 = arith.constant 0 : index
    %96 = vector.load %arg15[%95, %c0_42, %c0_43] : memref<8x8x128xf32, #tpu.memory_space<vmem>>, vector<1x8x128xf32>
    %97 = vector.shape_cast %96 : vector<1x8x128xf32> to vector<8x128xf32>
    %98 = vector.shape_cast %89 : vector<8x128xf32> to vector<1x8x128xf32>
    tpu.vector_store %arg15[%95, %c0_42, %c0_43], %98 {strides = array<i32>} : memref<8x8x128xf32, #tpu.memory_space<vmem>>, vector<1x8x128xf32>,
    %c1_i32 = arith.constant 1 : i32
    %99 = arith.truncf %64 : vector<8x128xf32> to vector<8x128xbf16>
    %cst_44 = arith.constant dense<0.000000e+00> : vector<8x384xf32>
    %100 = tpu.matmul %99, %17, %cst_44 {dimension_numbers = #tpu.dot_dimension_numbers<[1], [0], [0], [1], [0, 0, 1, 1], [], []>} : vector<8x128xbf16>, vector<128x384xbf16>, vector<8x384xf32> -> vector<8x384xf32>
    %101 = arith.truncf %89 : vector<8x128xf32> to vector<8x128xbf16>
    %cst_45 = arith.constant dense<0.000000e+00> : vector<8x384xf32>
    %102 = tpu.matmul %101, %18, %cst_45 {dimension_numbers = #tpu.dot_dimension_numbers<[1], [0], [0], [1], [0, 0, 1, 1], [], []>} : vector<8x128xbf16>, vector<128x384xbf16>, vector<8x384xf32> -> vector<8x384xf32>
    %c8_i32_46 = arith.constant 8 : i32
    %103 = arith.muli %c1_i32, %c8_i32_46 : i32
    %104 = tpu.assume_multiple %103, 8 : i32
    %c7_i32_47 = arith.constant 7 : i32
    %105 = arith.subi %c7_i32_47, %c1_i32 : i32
    %c8_i32_48 = arith.constant 8 : i32
    %106 = arith.muli %105, %c8_i32_48 : i32
    %107 = tpu.assume_multiple %106, 8 : i32
    %108 = arith.index_cast %104 : i32 to index
    %c0_49 = arith.constant 0 : index
    %109 = vector.load %arg17[%108, %c0_49] : memref<64x384xf32, #tpu.memory_space<vmem>>, vector<8x384xf32>
    %110 = arith.index_cast %107 : i32 to index
    %c0_50 = arith.constant 0 : index
    %111 = vector.load %arg18[%110, %c0_50] : memref<64x384xf32, #tpu.memory_space<vmem>>, vector<8x384xf32>
    %112 = vector.extract_strided_slice %109 {offsets = [0, 0], sizes = [8, 128], strides = [1, 1]} : vector<8x384xf32> to vector<8x128xf32>
    %113 = vector.extract_strided_slice %100 {offsets = [0, 0], sizes = [8, 128], strides = [1, 1]} : vector<8x384xf32> to vector<8x128xf32>
    %114 = arith.addf %112, %113 : vector<8x128xf32>
    %115 = arith.negf %114 : vector<8x128xf32>
    %116 = math.exp %115 : vector<8x128xf32>
    %cst_51 = arith.constant 1.000000e+00 : f32
    %117 = vector.broadcast %cst_51 : f32 to vector<8x128xf32>
    %118 = arith.addf %117, %116 : vector<8x128xf32>
    %119 = arith.divf %117, %118 : vector<8x128xf32>
    %120 = vector.extract_strided_slice %109 {offsets = [0, 128], sizes = [8, 128], strides = [1, 1]} : vector<8x384xf32> to vector<8x128xf32>
    %121 = vector.extract_strided_slice %100 {offsets = [0, 128], sizes = [8, 128], strides = [1, 1]} : vector<8x384xf32> to vector<8x128xf32>
    %122 = arith.addf %120, %121 : vector<8x128xf32>
    %123 = arith.negf %122 : vector<8x128xf32>
    %124 = math.exp %123 : vector<8x128xf32>
    %cst_52 = arith.constant 1.000000e+00 : f32
    %125 = vector.broadcast %cst_52 : f32 to vector<8x128xf32>
    %126 = arith.addf %125, %124 : vector<8x128xf32>
    %127 = arith.divf %125, %126 : vector<8x128xf32>
    %128 = vector.extract_strided_slice %109 {offsets = [0, 256], sizes = [8, 128], strides = [1, 1]} : vector<8x384xf32> to vector<8x128xf32>
    %129 = vector.extract_strided_slice %100 {offsets = [0, 256], sizes = [8, 128], strides = [1, 1]} : vector<8x384xf32> to vector<8x128xf32>
    %130 = arith.addf %129, %21 : vector<8x128xf32>
    %131 = arith.mulf %119, %130 : vector<8x128xf32>
    %132 = arith.addf %128, %131 : vector<8x128xf32>
    %133 = math.tanh %132 : vector<8x128xf32>
    %134 = arith.subf %64, %133 : vector<8x128xf32>
    %135 = arith.mulf %127, %134 : vector<8x128xf32>
    %136 = arith.addf %133, %135 : vector<8x128xf32>
    %137 = vector.extract_strided_slice %111 {offsets = [0, 0], sizes = [8, 128], strides = [1, 1]} : vector<8x384xf32> to vector<8x128xf32>
    %138 = vector.extract_strided_slice %102 {offsets = [0, 0], sizes = [8, 128], strides = [1, 1]} : vector<8x384xf32> to vector<8x128xf32>
    %139 = arith.addf %137, %138 : vector<8x128xf32>
    %140 = arith.negf %139 : vector<8x128xf32>
    %141 = math.exp %140 : vector<8x128xf32>
    %cst_53 = arith.constant 1.000000e+00 : f32
    %142 = vector.broadcast %cst_53 : f32 to vector<8x128xf32>
    %143 = arith.addf %142, %141 : vector<8x128xf32>
    %144 = arith.divf %142, %143 : vector<8x128xf32>
    %145 = vector.extract_strided_slice %111 {offsets = [0, 128], sizes = [8, 128], strides = [1, 1]} : vector<8x384xf32> to vector<8x128xf32>
    %146 = vector.extract_strided_slice %102 {offsets = [0, 128], sizes = [8, 128], strides = [1, 1]} : vector<8x384xf32> to vector<8x128xf32>
    %147 = arith.addf %145, %146 : vector<8x128xf32>
    %148 = arith.negf %147 : vector<8x128xf32>
    %149 = math.exp %148 : vector<8x128xf32>
    %cst_54 = arith.constant 1.000000e+00 : f32
    %150 = vector.broadcast %cst_54 : f32 to vector<8x128xf32>
    %151 = arith.addf %150, %149 : vector<8x128xf32>
    %152 = arith.divf %150, %151 : vector<8x128xf32>
    %153 = vector.extract_strided_slice %111 {offsets = [0, 256], sizes = [8, 128], strides = [1, 1]} : vector<8x384xf32> to vector<8x128xf32>
    %154 = vector.extract_strided_slice %102 {offsets = [0, 256], sizes = [8, 128], strides = [1, 1]} : vector<8x384xf32> to vector<8x128xf32>
    %155 = arith.addf %154, %24 : vector<8x128xf32>
    %156 = arith.mulf %144, %155 : vector<8x128xf32>
    %157 = arith.addf %153, %156 : vector<8x128xf32>
    %158 = math.tanh %157 : vector<8x128xf32>
    %159 = arith.subf %89, %158 : vector<8x128xf32>
    %160 = arith.mulf %152, %159 : vector<8x128xf32>
    %161 = arith.addf %158, %160 : vector<8x128xf32>
    %162 = arith.index_cast %c1_i32 : i32 to index
    %c0_55 = arith.constant 0 : index
    %c0_56 = arith.constant 0 : index
    %163 = vector.load %arg14[%162, %c0_55, %c0_56] : memref<8x8x128xf32, #tpu.memory_space<vmem>>, vector<1x8x128xf32>
    %164 = vector.shape_cast %163 : vector<1x8x128xf32> to vector<8x128xf32>
    %165 = vector.shape_cast %136 : vector<8x128xf32> to vector<1x8x128xf32>
    tpu.vector_store %arg14[%162, %c0_55, %c0_56], %165 {strides = array<i32>} : memref<8x8x128xf32, #tpu.memory_space<vmem>>, vector<1x8x128xf32>,
    %c7_i32_57 = arith.constant 7 : i32
    %166 = arith.subi %c7_i32_57, %c1_i32 : i32
    %167 = arith.index_cast %166 : i32 to index
    %c0_58 = arith.constant 0 : index
    %c0_59 = arith.constant 0 : index
    %168 = vector.load %arg15[%167, %c0_58, %c0_59] : memref<8x8x128xf32, #tpu.memory_space<vmem>>, vector<1x8x128xf32>
    %169 = vector.shape_cast %168 : vector<1x8x128xf32> to vector<8x128xf32>
    %170 = vector.shape_cast %161 : vector<8x128xf32> to vector<1x8x128xf32>
    tpu.vector_store %arg15[%167, %c0_58, %c0_59], %170 {strides = array<i32>} : memref<8x8x128xf32, #tpu.memory_space<vmem>>, vector<1x8x128xf32>,
    %c2_i32 = arith.constant 2 : i32
    %171 = arith.truncf %136 : vector<8x128xf32> to vector<8x128xbf16>
    %cst_60 = arith.constant dense<0.000000e+00> : vector<8x384xf32>
    %172 = tpu.matmul %171, %17, %cst_60 {dimension_numbers = #tpu.dot_dimension_numbers<[1], [0], [0], [1], [0, 0, 1, 1], [], []>} : vector<8x128xbf16>, vector<128x384xbf16>, vector<8x384xf32> -> vector<8x384xf32>
    %173 = arith.truncf %161 : vector<8x128xf32> to vector<8x128xbf16>
    %cst_61 = arith.constant dense<0.000000e+00> : vector<8x384xf32>
    %174 = tpu.matmul %173, %18, %cst_61 {dimension_numbers = #tpu.dot_dimension_numbers<[1], [0], [0], [1], [0, 0, 1, 1], [], []>} : vector<8x128xbf16>, vector<128x384xbf16>, vector<8x384xf32> -> vector<8x384xf32>
    %c8_i32_62 = arith.constant 8 : i32
    %175 = arith.muli %c2_i32, %c8_i32_62 : i32
    %176 = tpu.assume_multiple %175, 8 : i32
    %c7_i32_63 = arith.constant 7 : i32
    %177 = arith.subi %c7_i32_63, %c2_i32 : i32
    %c8_i32_64 = arith.constant 8 : i32
    %178 = arith.muli %177, %c8_i32_64 : i32
    %179 = tpu.assume_multiple %178, 8 : i32
    %180 = arith.index_cast %176 : i32 to index
    %c0_65 = arith.constant 0 : index
    %181 = vector.load %arg17[%180, %c0_65] : memref<64x384xf32, #tpu.memory_space<vmem>>, vector<8x384xf32>
    %182 = arith.index_cast %179 : i32 to index
    %c0_66 = arith.constant 0 : index
    %183 = vector.load %arg18[%182, %c0_66] : memref<64x384xf32, #tpu.memory_space<vmem>>, vector<8x384xf32>
    %184 = vector.extract_strided_slice %181 {offsets = [0, 0], sizes = [8, 128], strides = [1, 1]} : vector<8x384xf32> to vector<8x128xf32>
    %185 = vector.extract_strided_slice %172 {offsets = [0, 0], sizes = [8, 128], strides = [1, 1]} : vector<8x384xf32> to vector<8x128xf32>
    %186 = arith.addf %184, %185 : vector<8x128xf32>
    %187 = arith.negf %186 : vector<8x128xf32>
    %188 = math.exp %187 : vector<8x128xf32>
    %cst_67 = arith.constant 1.000000e+00 : f32
    %189 = vector.broadcast %cst_67 : f32 to vector<8x128xf32>
    %190 = arith.addf %189, %188 : vector<8x128xf32>
    %191 = arith.divf %189, %190 : vector<8x128xf32>
    %192 = vector.extract_strided_slice %181 {offsets = [0, 128], sizes = [8, 128], strides = [1, 1]} : vector<8x384xf32> to vector<8x128xf32>
    %193 = vector.extract_strided_slice %172 {offsets = [0, 128], sizes = [8, 128], strides = [1, 1]} : vector<8x384xf32> to vector<8x128xf32>
    %194 = arith.addf %192, %193 : vector<8x128xf32>
    %195 = arith.negf %194 : vector<8x128xf32>
    %196 = math.exp %195 : vector<8x128xf32>
    %cst_68 = arith.constant 1.000000e+00 : f32
    %197 = vector.broadcast %cst_68 : f32 to vector<8x128xf32>
    %198 = arith.addf %197, %196 : vector<8x128xf32>
    %199 = arith.divf %197, %198 : vector<8x128xf32>
    %200 = vector.extract_strided_slice %181 {offsets = [0, 256], sizes = [8, 128], strides = [1, 1]} : vector<8x384xf32> to vector<8x128xf32>
    %201 = vector.extract_strided_slice %172 {offsets = [0, 256], sizes = [8, 128], strides = [1, 1]} : vector<8x384xf32> to vector<8x128xf32>
    %202 = arith.addf %201, %21 : vector<8x128xf32>
    %203 = arith.mulf %191, %202 : vector<8x128xf32>
    %204 = arith.addf %200, %203 : vector<8x128xf32>
    %205 = math.tanh %204 : vector<8x128xf32>
    %206 = arith.subf %136, %205 : vector<8x128xf32>
    %207 = arith.mulf %199, %206 : vector<8x128xf32>
    %208 = arith.addf %205, %207 : vector<8x128xf32>
    %209 = vector.extract_strided_slice %183 {offsets = [0, 0], sizes = [8, 128], strides = [1, 1]} : vector<8x384xf32> to vector<8x128xf32>
    %210 = vector.extract_strided_slice %174 {offsets = [0, 0], sizes = [8, 128], strides = [1, 1]} : vector<8x384xf32> to vector<8x128xf32>
    %211 = arith.addf %209, %210 : vector<8x128xf32>
    %212 = arith.negf %211 : vector<8x128xf32>
    %213 = math.exp %212 : vector<8x128xf32>
    %cst_69 = arith.constant 1.000000e+00 : f32
    %214 = vector.broadcast %cst_69 : f32 to vector<8x128xf32>
    %215 = arith.addf %214, %213 : vector<8x128xf32>
    %216 = arith.divf %214, %215 : vector<8x128xf32>
    %217 = vector.extract_strided_slice %183 {offsets = [0, 128], sizes = [8, 128], strides = [1, 1]} : vector<8x384xf32> to vector<8x128xf32>
    %218 = vector.extract_strided_slice %174 {offsets = [0, 128], sizes = [8, 128], strides = [1, 1]} : vector<8x384xf32> to vector<8x128xf32>
    %219 = arith.addf %217, %218 : vector<8x128xf32>
    %220 = arith.negf %219 : vector<8x128xf32>
    %221 = math.exp %220 : vector<8x128xf32>
    %cst_70 = arith.constant 1.000000e+00 : f32
    %222 = vector.broadcast %cst_70 : f32 to vector<8x128xf32>
    %223 = arith.addf %222, %221 : vector<8x128xf32>
    %224 = arith.divf %222, %223 : vector<8x128xf32>
    %225 = vector.extract_strided_slice %183 {offsets = [0, 256], sizes = [8, 128], strides = [1, 1]} : vector<8x384xf32> to vector<8x128xf32>
    %226 = vector.extract_strided_slice %174 {offsets = [0, 256], sizes = [8, 128], strides = [1, 1]} : vector<8x384xf32> to vector<8x128xf32>
    %227 = arith.addf %226, %24 : vector<8x128xf32>
    %228 = arith.mulf %216, %227 : vector<8x128xf32>
    %229 = arith.addf %225, %228 : vector<8x128xf32>
    %230 = math.tanh %229 : vector<8x128xf32>
    %231 = arith.subf %161, %230 : vector<8x128xf32>
    %232 = arith.mulf %224, %231 : vector<8x128xf32>
    %233 = arith.addf %230, %232 : vector<8x128xf32>
    %234 = arith.index_cast %c2_i32 : i32 to index
    %c0_71 = arith.constant 0 : index
    %c0_72 = arith.constant 0 : index
    %235 = vector.load %arg14[%234, %c0_71, %c0_72] : memref<8x8x128xf32, #tpu.memory_space<vmem>>, vector<1x8x128xf32>
    %236 = vector.shape_cast %235 : vector<1x8x128xf32> to vector<8x128xf32>
    %237 = vector.shape_cast %208 : vector<8x128xf32> to vector<1x8x128xf32>
    tpu.vector_store %arg14[%234, %c0_71, %c0_72], %237 {strides = array<i32>} : memref<8x8x128xf32, #tpu.memory_space<vmem>>, vector<1x8x128xf32>,
    %c7_i32_73 = arith.constant 7 : i32
    %238 = arith.subi %c7_i32_73, %c2_i32 : i32
    %239 = arith.index_cast %238 : i32 to index
    %c0_74 = arith.constant 0 : index
    %c0_75 = arith.constant 0 : index
    %240 = vector.load %arg15[%239, %c0_74, %c0_75] : memref<8x8x128xf32, #tpu.memory_space<vmem>>, vector<1x8x128xf32>
    %241 = vector.shape_cast %240 : vector<1x8x128xf32> to vector<8x128xf32>
    %242 = vector.shape_cast %233 : vector<8x128xf32> to vector<1x8x128xf32>
    tpu.vector_store %arg15[%239, %c0_74, %c0_75], %242 {strides = array<i32>} : memref<8x8x128xf32, #tpu.memory_space<vmem>>, vector<1x8x128xf32>,
    %c3_i32 = arith.constant 3 : i32
    %243 = arith.truncf %208 : vector<8x128xf32> to vector<8x128xbf16>
    %cst_76 = arith.constant dense<0.000000e+00> : vector<8x384xf32>
    %244 = tpu.matmul %243, %17, %cst_76 {dimension_numbers = #tpu.dot_dimension_numbers<[1], [0], [0], [1], [0, 0, 1, 1], [], []>} : vector<8x128xbf16>, vector<128x384xbf16>, vector<8x384xf32> -> vector<8x384xf32>
    %245 = arith.truncf %233 : vector<8x128xf32> to vector<8x128xbf16>
    %cst_77 = arith.constant dense<0.000000e+00> : vector<8x384xf32>
    %246 = tpu.matmul %245, %18, %cst_77 {dimension_numbers = #tpu.dot_dimension_numbers<[1], [0], [0], [1], [0, 0, 1, 1], [], []>} : vector<8x128xbf16>, vector<128x384xbf16>, vector<8x384xf32> -> vector<8x384xf32>
    %c8_i32_78 = arith.constant 8 : i32
    %247 = arith.muli %c3_i32, %c8_i32_78 : i32
    %248 = tpu.assume_multiple %247, 8 : i32
    %c7_i32_79 = arith.constant 7 : i32
    %249 = arith.subi %c7_i32_79, %c3_i32 : i32
    %c8_i32_80 = arith.constant 8 : i32
    %250 = arith.muli %249, %c8_i32_80 : i32
    %251 = tpu.assume_multiple %250, 8 : i32
    %252 = arith.index_cast %248 : i32 to index
    %c0_81 = arith.constant 0 : index
    %253 = vector.load %arg17[%252, %c0_81] : memref<64x384xf32, #tpu.memory_space<vmem>>, vector<8x384xf32>
    %254 = arith.index_cast %251 : i32 to index
    %c0_82 = arith.constant 0 : index
    %255 = vector.load %arg18[%254, %c0_82] : memref<64x384xf32, #tpu.memory_space<vmem>>, vector<8x384xf32>
    %256 = vector.extract_strided_slice %253 {offsets = [0, 0], sizes = [8, 128], strides = [1, 1]} : vector<8x384xf32> to vector<8x128xf32>
    %257 = vector.extract_strided_slice %244 {offsets = [0, 0], sizes = [8, 128], strides = [1, 1]} : vector<8x384xf32> to vector<8x128xf32>
    %258 = arith.addf %256, %257 : vector<8x128xf32>
    %259 = arith.negf %258 : vector<8x128xf32>
    %260 = math.exp %259 : vector<8x128xf32>
    %cst_83 = arith.constant 1.000000e+00 : f32
    %261 = vector.broadcast %cst_83 : f32 to vector<8x128xf32>
    %262 = arith.addf %261, %260 : vector<8x128xf32>
    %263 = arith.divf %261, %262 : vector<8x128xf32>
    %264 = vector.extract_strided_slice %253 {offsets = [0, 128], sizes = [8, 128], strides = [1, 1]} : vector<8x384xf32> to vector<8x128xf32>
    %265 = vector.extract_strided_slice %244 {offsets = [0, 128], sizes = [8, 128], strides = [1, 1]} : vector<8x384xf32> to vector<8x128xf32>
    %266 = arith.addf %264, %265 : vector<8x128xf32>
    %267 = arith.negf %266 : vector<8x128xf32>
    %268 = math.exp %267 : vector<8x128xf32>
    %cst_84 = arith.constant 1.000000e+00 : f32
    %269 = vector.broadcast %cst_84 : f32 to vector<8x128xf32>
    %270 = arith.addf %269, %268 : vector<8x128xf32>
    %271 = arith.divf %269, %270 : vector<8x128xf32>
    %272 = vector.extract_strided_slice %253 {offsets = [0, 256], sizes = [8, 128], strides = [1, 1]} : vector<8x384xf32> to vector<8x128xf32>
    %273 = vector.extract_strided_slice %244 {offsets = [0, 256], sizes = [8, 128], strides = [1, 1]} : vector<8x384xf32> to vector<8x128xf32>
    %274 = arith.addf %273, %21 : vector<8x128xf32>
    %275 = arith.mulf %263, %274 : vector<8x128xf32>
    %276 = arith.addf %272, %275 : vector<8x128xf32>
    %277 = math.tanh %276 : vector<8x128xf32>
    %278 = arith.subf %208, %277 : vector<8x128xf32>
    %279 = arith.mulf %271, %278 : vector<8x128xf32>
    %280 = arith.addf %277, %279 : vector<8x128xf32>
    %281 = vector.extract_strided_slice %255 {offsets = [0, 0], sizes = [8, 128], strides = [1, 1]} : vector<8x384xf32> to vector<8x128xf32>
    %282 = vector.extract_strided_slice %246 {offsets = [0, 0], sizes = [8, 128], strides = [1, 1]} : vector<8x384xf32> to vector<8x128xf32>
    %283 = arith.addf %281, %282 : vector<8x128xf32>
    %284 = arith.negf %283 : vector<8x128xf32>
    %285 = math.exp %284 : vector<8x128xf32>
    %cst_85 = arith.constant 1.000000e+00 : f32
    %286 = vector.broadcast %cst_85 : f32 to vector<8x128xf32>
    %287 = arith.addf %286, %285 : vector<8x128xf32>
    %288 = arith.divf %286, %287 : vector<8x128xf32>
    %289 = vector.extract_strided_slice %255 {offsets = [0, 128], sizes = [8, 128], strides = [1, 1]} : vector<8x384xf32> to vector<8x128xf32>
    %290 = vector.extract_strided_slice %246 {offsets = [0, 128], sizes = [8, 128], strides = [1, 1]} : vector<8x384xf32> to vector<8x128xf32>
    %291 = arith.addf %289, %290 : vector<8x128xf32>
    %292 = arith.negf %291 : vector<8x128xf32>
    %293 = math.exp %292 : vector<8x128xf32>
    %cst_86 = arith.constant 1.000000e+00 : f32
    %294 = vector.broadcast %cst_86 : f32 to vector<8x128xf32>
    %295 = arith.addf %294, %293 : vector<8x128xf32>
    %296 = arith.divf %294, %295 : vector<8x128xf32>
    %297 = vector.extract_strided_slice %255 {offsets = [0, 256], sizes = [8, 128], strides = [1, 1]} : vector<8x384xf32> to vector<8x128xf32>
    %298 = vector.extract_strided_slice %246 {offsets = [0, 256], sizes = [8, 128], strides = [1, 1]} : vector<8x384xf32> to vector<8x128xf32>
    %299 = arith.addf %298, %24 : vector<8x128xf32>
    %300 = arith.mulf %288, %299 : vector<8x128xf32>
    %301 = arith.addf %297, %300 : vector<8x128xf32>
    %302 = math.tanh %301 : vector<8x128xf32>
    %303 = arith.subf %233, %302 : vector<8x128xf32>
    %304 = arith.mulf %296, %303 : vector<8x128xf32>
    %305 = arith.addf %302, %304 : vector<8x128xf32>
    %306 = arith.index_cast %c3_i32 : i32 to index
    %c0_87 = arith.constant 0 : index
    %c0_88 = arith.constant 0 : index
    %307 = vector.load %arg14[%306, %c0_87, %c0_88] : memref<8x8x128xf32, #tpu.memory_space<vmem>>, vector<1x8x128xf32>
    %308 = vector.shape_cast %307 : vector<1x8x128xf32> to vector<8x128xf32>
    %309 = vector.shape_cast %280 : vector<8x128xf32> to vector<1x8x128xf32>
    tpu.vector_store %arg14[%306, %c0_87, %c0_88], %309 {strides = array<i32>} : memref<8x8x128xf32, #tpu.memory_space<vmem>>, vector<1x8x128xf32>,
    %c7_i32_89 = arith.constant 7 : i32
    %310 = arith.subi %c7_i32_89, %c3_i32 : i32
    %311 = arith.index_cast %310 : i32 to index
    %c0_90 = arith.constant 0 : index
    %c0_91 = arith.constant 0 : index
    %312 = vector.load %arg15[%311, %c0_90, %c0_91] : memref<8x8x128xf32, #tpu.memory_space<vmem>>, vector<1x8x128xf32>
    %313 = vector.shape_cast %312 : vector<1x8x128xf32> to vector<8x128xf32>
    %314 = vector.shape_cast %305 : vector<8x128xf32> to vector<1x8x128xf32>
    tpu.vector_store %arg15[%311, %c0_90, %c0_91], %314 {strides = array<i32>} : memref<8x8x128xf32, #tpu.memory_space<vmem>>, vector<1x8x128xf32>,
    %c4_i32 = arith.constant 4 : i32
    %315 = arith.truncf %280 : vector<8x128xf32> to vector<8x128xbf16>
    %cst_92 = arith.constant dense<0.000000e+00> : vector<8x384xf32>
    %316 = tpu.matmul %315, %17, %cst_92 {dimension_numbers = #tpu.dot_dimension_numbers<[1], [0], [0], [1], [0, 0, 1, 1], [], []>} : vector<8x128xbf16>, vector<128x384xbf16>, vector<8x384xf32> -> vector<8x384xf32>
    %317 = arith.truncf %305 : vector<8x128xf32> to vector<8x128xbf16>
    %cst_93 = arith.constant dense<0.000000e+00> : vector<8x384xf32>
    %318 = tpu.matmul %317, %18, %cst_93 {dimension_numbers = #tpu.dot_dimension_numbers<[1], [0], [0], [1], [0, 0, 1, 1], [], []>} : vector<8x128xbf16>, vector<128x384xbf16>, vector<8x384xf32> -> vector<8x384xf32>
    %c8_i32_94 = arith.constant 8 : i32
    %319 = arith.muli %c4_i32, %c8_i32_94 : i32
    %320 = tpu.assume_multiple %319, 8 : i32
    %c7_i32_95 = arith.constant 7 : i32
    %321 = arith.subi %c7_i32_95, %c4_i32 : i32
    %c8_i32_96 = arith.constant 8 : i32
    %322 = arith.muli %321, %c8_i32_96 : i32
    %323 = tpu.assume_multiple %322, 8 : i32
    %324 = arith.index_cast %320 : i32 to index
    %c0_97 = arith.constant 0 : index
    %325 = vector.load %arg17[%324, %c0_97] : memref<64x384xf32, #tpu.memory_space<vmem>>, vector<8x384xf32>
    %326 = arith.index_cast %323 : i32 to index
    %c0_98 = arith.constant 0 : index
    %327 = vector.load %arg18[%326, %c0_98] : memref<64x384xf32, #tpu.memory_space<vmem>>, vector<8x384xf32>
    %328 = vector.extract_strided_slice %325 {offsets = [0, 0], sizes = [8, 128], strides = [1, 1]} : vector<8x384xf32> to vector<8x128xf32>
    %329 = vector.extract_strided_slice %316 {offsets = [0, 0], sizes = [8, 128], strides = [1, 1]} : vector<8x384xf32> to vector<8x128xf32>
    %330 = arith.addf %328, %329 : vector<8x128xf32>
    %331 = arith.negf %330 : vector<8x128xf32>
    %332 = math.exp %331 : vector<8x128xf32>
    %cst_99 = arith.constant 1.000000e+00 : f32
    %333 = vector.broadcast %cst_99 : f32 to vector<8x128xf32>
    %334 = arith.addf %333, %332 : vector<8x128xf32>
    %335 = arith.divf %333, %334 : vector<8x128xf32>
    %336 = vector.extract_strided_slice %325 {offsets = [0, 128], sizes = [8, 128], strides = [1, 1]} : vector<8x384xf32> to vector<8x128xf32>
    %337 = vector.extract_strided_slice %316 {offsets = [0, 128], sizes = [8, 128], strides = [1, 1]} : vector<8x384xf32> to vector<8x128xf32>
    %338 = arith.addf %336, %337 : vector<8x128xf32>
    %339 = arith.negf %338 : vector<8x128xf32>
    %340 = math.exp %339 : vector<8x128xf32>
    %cst_100 = arith.constant 1.000000e+00 : f32
    %341 = vector.broadcast %cst_100 : f32 to vector<8x128xf32>
    %342 = arith.addf %341, %340 : vector<8x128xf32>
    %343 = arith.divf %341, %342 : vector<8x128xf32>
    %344 = vector.extract_strided_slice %325 {offsets = [0, 256], sizes = [8, 128], strides = [1, 1]} : vector<8x384xf32> to vector<8x128xf32>
    %345 = vector.extract_strided_slice %316 {offsets = [0, 256], sizes = [8, 128], strides = [1, 1]} : vector<8x384xf32> to vector<8x128xf32>
    %346 = arith.addf %345, %21 : vector<8x128xf32>
    %347 = arith.mulf %335, %346 : vector<8x128xf32>
    %348 = arith.addf %344, %347 : vector<8x128xf32>
    %349 = math.tanh %348 : vector<8x128xf32>
    %350 = arith.subf %280, %349 : vector<8x128xf32>
    %351 = arith.mulf %343, %350 : vector<8x128xf32>
    %352 = arith.addf %349, %351 : vector<8x128xf32>
    %353 = vector.extract_strided_slice %327 {offsets = [0, 0], sizes = [8, 128], strides = [1, 1]} : vector<8x384xf32> to vector<8x128xf32>
    %354 = vector.extract_strided_slice %318 {offsets = [0, 0], sizes = [8, 128], strides = [1, 1]} : vector<8x384xf32> to vector<8x128xf32>
    %355 = arith.addf %353, %354 : vector<8x128xf32>
    %356 = arith.negf %355 : vector<8x128xf32>
    %357 = math.exp %356 : vector<8x128xf32>
    %cst_101 = arith.constant 1.000000e+00 : f32
    %358 = vector.broadcast %cst_101 : f32 to vector<8x128xf32>
    %359 = arith.addf %358, %357 : vector<8x128xf32>
    %360 = arith.divf %358, %359 : vector<8x128xf32>
    %361 = vector.extract_strided_slice %327 {offsets = [0, 128], sizes = [8, 128], strides = [1, 1]} : vector<8x384xf32> to vector<8x128xf32>
    %362 = vector.extract_strided_slice %318 {offsets = [0, 128], sizes = [8, 128], strides = [1, 1]} : vector<8x384xf32> to vector<8x128xf32>
    %363 = arith.addf %361, %362 : vector<8x128xf32>
    %364 = arith.negf %363 : vector<8x128xf32>
    %365 = math.exp %364 : vector<8x128xf32>
    %cst_102 = arith.constant 1.000000e+00 : f32
    %366 = vector.broadcast %cst_102 : f32 to vector<8x128xf32>
    %367 = arith.addf %366, %365 : vector<8x128xf32>
    %368 = arith.divf %366, %367 : vector<8x128xf32>
    %369 = vector.extract_strided_slice %327 {offsets = [0, 256], sizes = [8, 128], strides = [1, 1]} : vector<8x384xf32> to vector<8x128xf32>
    %370 = vector.extract_strided_slice %318 {offsets = [0, 256], sizes = [8, 128], strides = [1, 1]} : vector<8x384xf32> to vector<8x128xf32>
    %371 = arith.addf %370, %24 : vector<8x128xf32>
    %372 = arith.mulf %360, %371 : vector<8x128xf32>
    %373 = arith.addf %369, %372 : vector<8x128xf32>
    %374 = math.tanh %373 : vector<8x128xf32>
    %375 = arith.subf %305, %374 : vector<8x128xf32>
    %376 = arith.mulf %368, %375 : vector<8x128xf32>
    %377 = arith.addf %374, %376 : vector<8x128xf32>
    %378 = arith.index_cast %c4_i32 : i32 to index
    %c0_103 = arith.constant 0 : index
    %c0_104 = arith.constant 0 : index
    %379 = vector.load %arg14[%378, %c0_103, %c0_104] : memref<8x8x128xf32, #tpu.memory_space<vmem>>, vector<1x8x128xf32>
    %380 = vector.shape_cast %379 : vector<1x8x128xf32> to vector<8x128xf32>
    %381 = vector.shape_cast %352 : vector<8x128xf32> to vector<1x8x128xf32>
    tpu.vector_store %arg14[%378, %c0_103, %c0_104], %381 {strides = array<i32>} : memref<8x8x128xf32, #tpu.memory_space<vmem>>, vector<1x8x128xf32>,
    %c7_i32_105 = arith.constant 7 : i32
    %382 = arith.subi %c7_i32_105, %c4_i32 : i32
    %383 = arith.index_cast %382 : i32 to index
    %c0_106 = arith.constant 0 : index
    %c0_107 = arith.constant 0 : index
    %384 = vector.load %arg15[%383, %c0_106, %c0_107] : memref<8x8x128xf32, #tpu.memory_space<vmem>>, vector<1x8x128xf32>
    %385 = vector.shape_cast %384 : vector<1x8x128xf32> to vector<8x128xf32>
    %386 = vector.shape_cast %377 : vector<8x128xf32> to vector<1x8x128xf32>
    tpu.vector_store %arg15[%383, %c0_106, %c0_107], %386 {strides = array<i32>} : memref<8x8x128xf32, #tpu.memory_space<vmem>>, vector<1x8x128xf32>,
    %c5_i32 = arith.constant 5 : i32
    %387 = arith.truncf %352 : vector<8x128xf32> to vector<8x128xbf16>
    %cst_108 = arith.constant dense<0.000000e+00> : vector<8x384xf32>
    %388 = tpu.matmul %387, %17, %cst_108 {dimension_numbers = #tpu.dot_dimension_numbers<[1], [0], [0], [1], [0, 0, 1, 1], [], []>} : vector<8x128xbf16>, vector<128x384xbf16>, vector<8x384xf32> -> vector<8x384xf32>
    %389 = arith.truncf %377 : vector<8x128xf32> to vector<8x128xbf16>
    %cst_109 = arith.constant dense<0.000000e+00> : vector<8x384xf32>
    %390 = tpu.matmul %389, %18, %cst_109 {dimension_numbers = #tpu.dot_dimension_numbers<[1], [0], [0], [1], [0, 0, 1, 1], [], []>} : vector<8x128xbf16>, vector<128x384xbf16>, vector<8x384xf32> -> vector<8x384xf32>
    %c8_i32_110 = arith.constant 8 : i32
    %391 = arith.muli %c5_i32, %c8_i32_110 : i32
    %392 = tpu.assume_multiple %391, 8 : i32
    %c7_i32_111 = arith.constant 7 : i32
    %393 = arith.subi %c7_i32_111, %c5_i32 : i32
    %c8_i32_112 = arith.constant 8 : i32
    %394 = arith.muli %393, %c8_i32_112 : i32
    %395 = tpu.assume_multiple %394, 8 : i32
    %396 = arith.index_cast %392 : i32 to index
    %c0_113 = arith.constant 0 : index
    %397 = vector.load %arg17[%396, %c0_113] : memref<64x384xf32, #tpu.memory_space<vmem>>, vector<8x384xf32>
    %398 = arith.index_cast %395 : i32 to index
    %c0_114 = arith.constant 0 : index
    %399 = vector.load %arg18[%398, %c0_114] : memref<64x384xf32, #tpu.memory_space<vmem>>, vector<8x384xf32>
    %400 = vector.extract_strided_slice %397 {offsets = [0, 0], sizes = [8, 128], strides = [1, 1]} : vector<8x384xf32> to vector<8x128xf32>
    %401 = vector.extract_strided_slice %388 {offsets = [0, 0], sizes = [8, 128], strides = [1, 1]} : vector<8x384xf32> to vector<8x128xf32>
    %402 = arith.addf %400, %401 : vector<8x128xf32>
    %403 = arith.negf %402 : vector<8x128xf32>
    %404 = math.exp %403 : vector<8x128xf32>
    %cst_115 = arith.constant 1.000000e+00 : f32
    %405 = vector.broadcast %cst_115 : f32 to vector<8x128xf32>
    %406 = arith.addf %405, %404 : vector<8x128xf32>
    %407 = arith.divf %405, %406 : vector<8x128xf32>
    %408 = vector.extract_strided_slice %397 {offsets = [0, 128], sizes = [8, 128], strides = [1, 1]} : vector<8x384xf32> to vector<8x128xf32>
    %409 = vector.extract_strided_slice %388 {offsets = [0, 128], sizes = [8, 128], strides = [1, 1]} : vector<8x384xf32> to vector<8x128xf32>
    %410 = arith.addf %408, %409 : vector<8x128xf32>
    %411 = arith.negf %410 : vector<8x128xf32>
    %412 = math.exp %411 : vector<8x128xf32>
    %cst_116 = arith.constant 1.000000e+00 : f32
    %413 = vector.broadcast %cst_116 : f32 to vector<8x128xf32>
    %414 = arith.addf %413, %412 : vector<8x128xf32>
    %415 = arith.divf %413, %414 : vector<8x128xf32>
    %416 = vector.extract_strided_slice %397 {offsets = [0, 256], sizes = [8, 128], strides = [1, 1]} : vector<8x384xf32> to vector<8x128xf32>
    %417 = vector.extract_strided_slice %388 {offsets = [0, 256], sizes = [8, 128], strides = [1, 1]} : vector<8x384xf32> to vector<8x128xf32>
    %418 = arith.addf %417, %21 : vector<8x128xf32>
    %419 = arith.mulf %407, %418 : vector<8x128xf32>
    %420 = arith.addf %416, %419 : vector<8x128xf32>
    %421 = math.tanh %420 : vector<8x128xf32>
    %422 = arith.subf %352, %421 : vector<8x128xf32>
    %423 = arith.mulf %415, %422 : vector<8x128xf32>
    %424 = arith.addf %421, %423 : vector<8x128xf32>
    %425 = vector.extract_strided_slice %399 {offsets = [0, 0], sizes = [8, 128], strides = [1, 1]} : vector<8x384xf32> to vector<8x128xf32>
    %426 = vector.extract_strided_slice %390 {offsets = [0, 0], sizes = [8, 128], strides = [1, 1]} : vector<8x384xf32> to vector<8x128xf32>
    %427 = arith.addf %425, %426 : vector<8x128xf32>
    %428 = arith.negf %427 : vector<8x128xf32>
    %429 = math.exp %428 : vector<8x128xf32>
    %cst_117 = arith.constant 1.000000e+00 : f32
    %430 = vector.broadcast %cst_117 : f32 to vector<8x128xf32>
    %431 = arith.addf %430, %429 : vector<8x128xf32>
    %432 = arith.divf %430, %431 : vector<8x128xf32>
    %433 = vector.extract_strided_slice %399 {offsets = [0, 128], sizes = [8, 128], strides = [1, 1]} : vector<8x384xf32> to vector<8x128xf32>
    %434 = vector.extract_strided_slice %390 {offsets = [0, 128], sizes = [8, 128], strides = [1, 1]} : vector<8x384xf32> to vector<8x128xf32>
    %435 = arith.addf %433, %434 : vector<8x128xf32>
    %436 = arith.negf %435 : vector<8x128xf32>
    %437 = math.exp %436 : vector<8x128xf32>
    %cst_118 = arith.constant 1.000000e+00 : f32
    %438 = vector.broadcast %cst_118 : f32 to vector<8x128xf32>
    %439 = arith.addf %438, %437 : vector<8x128xf32>
    %440 = arith.divf %438, %439 : vector<8x128xf32>
    %441 = vector.extract_strided_slice %399 {offsets = [0, 256], sizes = [8, 128], strides = [1, 1]} : vector<8x384xf32> to vector<8x128xf32>
    %442 = vector.extract_strided_slice %390 {offsets = [0, 256], sizes = [8, 128], strides = [1, 1]} : vector<8x384xf32> to vector<8x128xf32>
    %443 = arith.addf %442, %24 : vector<8x128xf32>
    %444 = arith.mulf %432, %443 : vector<8x128xf32>
    %445 = arith.addf %441, %444 : vector<8x128xf32>
    %446 = math.tanh %445 : vector<8x128xf32>
    %447 = arith.subf %377, %446 : vector<8x128xf32>
    %448 = arith.mulf %440, %447 : vector<8x128xf32>
    %449 = arith.addf %446, %448 : vector<8x128xf32>
    %450 = arith.index_cast %c5_i32 : i32 to index
    %c0_119 = arith.constant 0 : index
    %c0_120 = arith.constant 0 : index
    %451 = vector.load %arg14[%450, %c0_119, %c0_120] : memref<8x8x128xf32, #tpu.memory_space<vmem>>, vector<1x8x128xf32>
    %452 = vector.shape_cast %451 : vector<1x8x128xf32> to vector<8x128xf32>
    %453 = vector.shape_cast %424 : vector<8x128xf32> to vector<1x8x128xf32>
    tpu.vector_store %arg14[%450, %c0_119, %c0_120], %453 {strides = array<i32>} : memref<8x8x128xf32, #tpu.memory_space<vmem>>, vector<1x8x128xf32>,
    %c7_i32_121 = arith.constant 7 : i32
    %454 = arith.subi %c7_i32_121, %c5_i32 : i32
    %455 = arith.index_cast %454 : i32 to index
    %c0_122 = arith.constant 0 : index
    %c0_123 = arith.constant 0 : index
    %456 = vector.load %arg15[%455, %c0_122, %c0_123] : memref<8x8x128xf32, #tpu.memory_space<vmem>>, vector<1x8x128xf32>
    %457 = vector.shape_cast %456 : vector<1x8x128xf32> to vector<8x128xf32>
    %458 = vector.shape_cast %449 : vector<8x128xf32> to vector<1x8x128xf32>
    tpu.vector_store %arg15[%455, %c0_122, %c0_123], %458 {strides = array<i32>} : memref<8x8x128xf32, #tpu.memory_space<vmem>>, vector<1x8x128xf32>,
    %c6_i32 = arith.constant 6 : i32
    %459 = arith.truncf %424 : vector<8x128xf32> to vector<8x128xbf16>
    %cst_124 = arith.constant dense<0.000000e+00> : vector<8x384xf32>
    %460 = tpu.matmul %459, %17, %cst_124 {dimension_numbers = #tpu.dot_dimension_numbers<[1], [0], [0], [1], [0, 0, 1, 1], [], []>} : vector<8x128xbf16>, vector<128x384xbf16>, vector<8x384xf32> -> vector<8x384xf32>
    %461 = arith.truncf %449 : vector<8x128xf32> to vector<8x128xbf16>
    %cst_125 = arith.constant dense<0.000000e+00> : vector<8x384xf32>
    %462 = tpu.matmul %461, %18, %cst_125 {dimension_numbers = #tpu.dot_dimension_numbers<[1], [0], [0], [1], [0, 0, 1, 1], [], []>} : vector<8x128xbf16>, vector<128x384xbf16>, vector<8x384xf32> -> vector<8x384xf32>
    %c8_i32_126 = arith.constant 8 : i32
    %463 = arith.muli %c6_i32, %c8_i32_126 : i32
    %464 = tpu.assume_multiple %463, 8 : i32
    %c7_i32_127 = arith.constant 7 : i32
    %465 = arith.subi %c7_i32_127, %c6_i32 : i32
    %c8_i32_128 = arith.constant 8 : i32
    %466 = arith.muli %465, %c8_i32_128 : i32
    %467 = tpu.assume_multiple %466, 8 : i32
    %468 = arith.index_cast %464 : i32 to index
    %c0_129 = arith.constant 0 : index
    %469 = vector.load %arg17[%468, %c0_129] : memref<64x384xf32, #tpu.memory_space<vmem>>, vector<8x384xf32>
    %470 = arith.index_cast %467 : i32 to index
    %c0_130 = arith.constant 0 : index
    %471 = vector.load %arg18[%470, %c0_130] : memref<64x384xf32, #tpu.memory_space<vmem>>, vector<8x384xf32>
    %472 = vector.extract_strided_slice %469 {offsets = [0, 0], sizes = [8, 128], strides = [1, 1]} : vector<8x384xf32> to vector<8x128xf32>
    %473 = vector.extract_strided_slice %460 {offsets = [0, 0], sizes = [8, 128], strides = [1, 1]} : vector<8x384xf32> to vector<8x128xf32>
    %474 = arith.addf %472, %473 : vector<8x128xf32>
    %475 = arith.negf %474 : vector<8x128xf32>
    %476 = math.exp %475 : vector<8x128xf32>
    %cst_131 = arith.constant 1.000000e+00 : f32
    %477 = vector.broadcast %cst_131 : f32 to vector<8x128xf32>
    %478 = arith.addf %477, %476 : vector<8x128xf32>
    %479 = arith.divf %477, %478 : vector<8x128xf32>
    %480 = vector.extract_strided_slice %469 {offsets = [0, 128], sizes = [8, 128], strides = [1, 1]} : vector<8x384xf32> to vector<8x128xf32>
    %481 = vector.extract_strided_slice %460 {offsets = [0, 128], sizes = [8, 128], strides = [1, 1]} : vector<8x384xf32> to vector<8x128xf32>
    %482 = arith.addf %480, %481 : vector<8x128xf32>
    %483 = arith.negf %482 : vector<8x128xf32>
    %484 = math.exp %483 : vector<8x128xf32>
    %cst_132 = arith.constant 1.000000e+00 : f32
    %485 = vector.broadcast %cst_132 : f32 to vector<8x128xf32>
    %486 = arith.addf %485, %484 : vector<8x128xf32>
    %487 = arith.divf %485, %486 : vector<8x128xf32>
    %488 = vector.extract_strided_slice %469 {offsets = [0, 256], sizes = [8, 128], strides = [1, 1]} : vector<8x384xf32> to vector<8x128xf32>
    %489 = vector.extract_strided_slice %460 {offsets = [0, 256], sizes = [8, 128], strides = [1, 1]} : vector<8x384xf32> to vector<8x128xf32>
    %490 = arith.addf %489, %21 : vector<8x128xf32>
    %491 = arith.mulf %479, %490 : vector<8x128xf32>
    %492 = arith.addf %488, %491 : vector<8x128xf32>
    %493 = math.tanh %492 : vector<8x128xf32>
    %494 = arith.subf %424, %493 : vector<8x128xf32>
    %495 = arith.mulf %487, %494 : vector<8x128xf32>
    %496 = arith.addf %493, %495 : vector<8x128xf32>
    %497 = vector.extract_strided_slice %471 {offsets = [0, 0], sizes = [8, 128], strides = [1, 1]} : vector<8x384xf32> to vector<8x128xf32>
    %498 = vector.extract_strided_slice %462 {offsets = [0, 0], sizes = [8, 128], strides = [1, 1]} : vector<8x384xf32> to vector<8x128xf32>
    %499 = arith.addf %497, %498 : vector<8x128xf32>
    %500 = arith.negf %499 : vector<8x128xf32>
    %501 = math.exp %500 : vector<8x128xf32>
    %cst_133 = arith.constant 1.000000e+00 : f32
    %502 = vector.broadcast %cst_133 : f32 to vector<8x128xf32>
    %503 = arith.addf %502, %501 : vector<8x128xf32>
    %504 = arith.divf %502, %503 : vector<8x128xf32>
    %505 = vector.extract_strided_slice %471 {offsets = [0, 128], sizes = [8, 128], strides = [1, 1]} : vector<8x384xf32> to vector<8x128xf32>
    %506 = vector.extract_strided_slice %462 {offsets = [0, 128], sizes = [8, 128], strides = [1, 1]} : vector<8x384xf32> to vector<8x128xf32>
    %507 = arith.addf %505, %506 : vector<8x128xf32>
    %508 = arith.negf %507 : vector<8x128xf32>
    %509 = math.exp %508 : vector<8x128xf32>
    %cst_134 = arith.constant 1.000000e+00 : f32
    %510 = vector.broadcast %cst_134 : f32 to vector<8x128xf32>
    %511 = arith.addf %510, %509 : vector<8x128xf32>
    %512 = arith.divf %510, %511 : vector<8x128xf32>
    %513 = vector.extract_strided_slice %471 {offsets = [0, 256], sizes = [8, 128], strides = [1, 1]} : vector<8x384xf32> to vector<8x128xf32>
    %514 = vector.extract_strided_slice %462 {offsets = [0, 256], sizes = [8, 128], strides = [1, 1]} : vector<8x384xf32> to vector<8x128xf32>
    %515 = arith.addf %514, %24 : vector<8x128xf32>
    %516 = arith.mulf %504, %515 : vector<8x128xf32>
    %517 = arith.addf %513, %516 : vector<8x128xf32>
    %518 = math.tanh %517 : vector<8x128xf32>
    %519 = arith.subf %449, %518 : vector<8x128xf32>
    %520 = arith.mulf %512, %519 : vector<8x128xf32>
    %521 = arith.addf %518, %520 : vector<8x128xf32>
    %522 = arith.index_cast %c6_i32 : i32 to index
    %c0_135 = arith.constant 0 : index
    %c0_136 = arith.constant 0 : index
    %523 = vector.load %arg14[%522, %c0_135, %c0_136] : memref<8x8x128xf32, #tpu.memory_space<vmem>>, vector<1x8x128xf32>
    %524 = vector.shape_cast %523 : vector<1x8x128xf32> to vector<8x128xf32>
    %525 = vector.shape_cast %496 : vector<8x128xf32> to vector<1x8x128xf32>
    tpu.vector_store %arg14[%522, %c0_135, %c0_136], %525 {strides = array<i32>} : memref<8x8x128xf32, #tpu.memory_space<vmem>>, vector<1x8x128xf32>,
    %c7_i32_137 = arith.constant 7 : i32
    %526 = arith.subi %c7_i32_137, %c6_i32 : i32
    %527 = arith.index_cast %526 : i32 to index
    %c0_138 = arith.constant 0 : index
    %c0_139 = arith.constant 0 : index
    %528 = vector.load %arg15[%527, %c0_138, %c0_139] : memref<8x8x128xf32, #tpu.memory_space<vmem>>, vector<1x8x128xf32>
    %529 = vector.shape_cast %528 : vector<1x8x128xf32> to vector<8x128xf32>
    %530 = vector.shape_cast %521 : vector<8x128xf32> to vector<1x8x128xf32>
    tpu.vector_store %arg15[%527, %c0_138, %c0_139], %530 {strides = array<i32>} : memref<8x8x128xf32, #tpu.memory_space<vmem>>, vector<1x8x128xf32>,
    %c7_i32_140 = arith.constant 7 : i32
    %531 = arith.truncf %496 : vector<8x128xf32> to vector<8x128xbf16>
    %cst_141 = arith.constant dense<0.000000e+00> : vector<8x384xf32>
    %532 = tpu.matmul %531, %17, %cst_141 {dimension_numbers = #tpu.dot_dimension_numbers<[1], [0], [0], [1], [0, 0, 1, 1], [], []>} : vector<8x128xbf16>, vector<128x384xbf16>, vector<8x384xf32> -> vector<8x384xf32>
    %533 = arith.truncf %521 : vector<8x128xf32> to vector<8x128xbf16>
    %cst_142 = arith.constant dense<0.000000e+00> : vector<8x384xf32>
    %534 = tpu.matmul %533, %18, %cst_142 {dimension_numbers = #tpu.dot_dimension_numbers<[1], [0], [0], [1], [0, 0, 1, 1], [], []>} : vector<8x128xbf16>, vector<128x384xbf16>, vector<8x384xf32> -> vector<8x384xf32>
    %c8_i32_143 = arith.constant 8 : i32
    %535 = arith.muli %c7_i32_140, %c8_i32_143 : i32
    %536 = tpu.assume_multiple %535, 8 : i32
    %c7_i32_144 = arith.constant 7 : i32
    %537 = arith.subi %c7_i32_144, %c7_i32_140 : i32
    %c8_i32_145 = arith.constant 8 : i32
    %538 = arith.muli %537, %c8_i32_145 : i32
    %539 = tpu.assume_multiple %538, 8 : i32
    %540 = arith.index_cast %536 : i32 to index
    %c0_146 = arith.constant 0 : index
    %541 = vector.load %arg17[%540, %c0_146] : memref<64x384xf32, #tpu.memory_space<vmem>>, vector<8x384xf32>
    %542 = arith.index_cast %539 : i32 to index
    %c0_147 = arith.constant 0 : index
    %543 = vector.load %arg18[%542, %c0_147] : memref<64x384xf32, #tpu.memory_space<vmem>>, vector<8x384xf32>
    %544 = vector.extract_strided_slice %541 {offsets = [0, 0], sizes = [8, 128], strides = [1, 1]} : vector<8x384xf32> to vector<8x128xf32>
    %545 = vector.extract_strided_slice %532 {offsets = [0, 0], sizes = [8, 128], strides = [1, 1]} : vector<8x384xf32> to vector<8x128xf32>
    %546 = arith.addf %544, %545 : vector<8x128xf32>
    %547 = arith.negf %546 : vector<8x128xf32>
    %548 = math.exp %547 : vector<8x128xf32>
    %cst_148 = arith.constant 1.000000e+00 : f32
    %549 = vector.broadcast %cst_148 : f32 to vector<8x128xf32>
    %550 = arith.addf %549, %548 : vector<8x128xf32>
    %551 = arith.divf %549, %550 : vector<8x128xf32>
    %552 = vector.extract_strided_slice %541 {offsets = [0, 128], sizes = [8, 128], strides = [1, 1]} : vector<8x384xf32> to vector<8x128xf32>
    %553 = vector.extract_strided_slice %532 {offsets = [0, 128], sizes = [8, 128], strides = [1, 1]} : vector<8x384xf32> to vector<8x128xf32>
    %554 = arith.addf %552, %553 : vector<8x128xf32>
    %555 = arith.negf %554 : vector<8x128xf32>
    %556 = math.exp %555 : vector<8x128xf32>
    %cst_149 = arith.constant 1.000000e+00 : f32
    %557 = vector.broadcast %cst_149 : f32 to vector<8x128xf32>
    %558 = arith.addf %557, %556 : vector<8x128xf32>
    %559 = arith.divf %557, %558 : vector<8x128xf32>
    %560 = vector.extract_strided_slice %541 {offsets = [0, 256], sizes = [8, 128], strides = [1, 1]} : vector<8x384xf32> to vector<8x128xf32>
    %561 = vector.extract_strided_slice %532 {offsets = [0, 256], sizes = [8, 128], strides = [1, 1]} : vector<8x384xf32> to vector<8x128xf32>
    %562 = arith.addf %561, %21 : vector<8x128xf32>
    %563 = arith.mulf %551, %562 : vector<8x128xf32>
    %564 = arith.addf %560, %563 : vector<8x128xf32>
    %565 = math.tanh %564 : vector<8x128xf32>
    %566 = arith.subf %496, %565 : vector<8x128xf32>
    %567 = arith.mulf %559, %566 : vector<8x128xf32>
    %568 = arith.addf %565, %567 : vector<8x128xf32>
    %569 = vector.extract_strided_slice %543 {offsets = [0, 0], sizes = [8, 128], strides = [1, 1]} : vector<8x384xf32> to vector<8x128xf32>
    %570 = vector.extract_strided_slice %534 {offsets = [0, 0], sizes = [8, 128], strides = [1, 1]} : vector<8x384xf32> to vector<8x128xf32>
    %571 = arith.addf %569, %570 : vector<8x128xf32>
    %572 = arith.negf %571 : vector<8x128xf32>
    %573 = math.exp %572 : vector<8x128xf32>
    %cst_150 = arith.constant 1.000000e+00 : f32
    %574 = vector.broadcast %cst_150 : f32 to vector<8x128xf32>
    %575 = arith.addf %574, %573 : vector<8x128xf32>
    %576 = arith.divf %574, %575 : vector<8x128xf32>
    %577 = vector.extract_strided_slice %543 {offsets = [0, 128], sizes = [8, 128], strides = [1, 1]} : vector<8x384xf32> to vector<8x128xf32>
    %578 = vector.extract_strided_slice %534 {offsets = [0, 128], sizes = [8, 128], strides = [1, 1]} : vector<8x384xf32> to vector<8x128xf32>
    %579 = arith.addf %577, %578 : vector<8x128xf32>
    %580 = arith.negf %579 : vector<8x128xf32>
    %581 = math.exp %580 : vector<8x128xf32>
    %cst_151 = arith.constant 1.000000e+00 : f32
    %582 = vector.broadcast %cst_151 : f32 to vector<8x128xf32>
    %583 = arith.addf %582, %581 : vector<8x128xf32>
    %584 = arith.divf %582, %583 : vector<8x128xf32>
    %585 = vector.extract_strided_slice %543 {offsets = [0, 256], sizes = [8, 128], strides = [1, 1]} : vector<8x384xf32> to vector<8x128xf32>
    %586 = vector.extract_strided_slice %534 {offsets = [0, 256], sizes = [8, 128], strides = [1, 1]} : vector<8x384xf32> to vector<8x128xf32>
    %587 = arith.addf %586, %24 : vector<8x128xf32>
    %588 = arith.mulf %576, %587 : vector<8x128xf32>
    %589 = arith.addf %585, %588 : vector<8x128xf32>
    %590 = math.tanh %589 : vector<8x128xf32>
    %591 = arith.subf %521, %590 : vector<8x128xf32>
    %592 = arith.mulf %584, %591 : vector<8x128xf32>
    %593 = arith.addf %590, %592 : vector<8x128xf32>
    %594 = arith.index_cast %c7_i32_140 : i32 to index
    %c0_152 = arith.constant 0 : index
    %c0_153 = arith.constant 0 : index
    %595 = vector.load %arg14[%594, %c0_152, %c0_153] : memref<8x8x128xf32, #tpu.memory_space<vmem>>, vector<1x8x128xf32>
    %596 = vector.shape_cast %595 : vector<1x8x128xf32> to vector<8x128xf32>
    %597 = vector.shape_cast %568 : vector<8x128xf32> to vector<1x8x128xf32>
    tpu.vector_store %arg14[%594, %c0_152, %c0_153], %597 {strides = array<i32>} : memref<8x8x128xf32, #tpu.memory_space<vmem>>, vector<1x8x128xf32>,
    %c7_i32_154 = arith.constant 7 : i32
    %598 = arith.subi %c7_i32_154, %c7_i32_140 : i32
    %599 = arith.index_cast %598 : i32 to index
    %c0_155 = arith.constant 0 : index
    %c0_156 = arith.constant 0 : index
    %600 = vector.load %arg15[%599, %c0_155, %c0_156] : memref<8x8x128xf32, #tpu.memory_space<vmem>>, vector<1x8x128xf32>
    %601 = vector.shape_cast %600 : vector<1x8x128xf32> to vector<8x128xf32>
    %602 = vector.shape_cast %593 : vector<8x128xf32> to vector<1x8x128xf32>
    tpu.vector_store %arg15[%599, %c0_155, %c0_156], %602 {strides = array<i32>} : memref<8x8x128xf32, #tpu.memory_space<vmem>>, vector<1x8x128xf32>,
    %c8_i32_157 = arith.constant 8 : i32
    %c0_158 = arith.constant 0 : index
    %c0_159 = arith.constant 0 : index
    %603 = vector.load %arg19[%c0_158, %c0_159] : memref<8x128xf32, #tpu.memory_space<vmem>>, vector<8x128xf32>
    tpu.vector_store %arg19[%c0_158, %c0_159], %568 {strides = array<i32>} : memref<8x128xf32, #tpu.memory_space<vmem>>, vector<8x128xf32>,
    %c0_160 = arith.constant 0 : index
    %c0_161 = arith.constant 0 : index
    %604 = vector.load %arg20[%c0_160, %c0_161] : memref<8x128xf32, #tpu.memory_space<vmem>>, vector<8x128xf32>
    tpu.vector_store %arg20[%c0_160, %c0_161], %593 {strides = array<i32>} : memref<8x128xf32, #tpu.memory_space<vmem>>, vector<8x128xf32>,
    %c0_i32_162 = arith.constant 0 : i32
    %605 = arith.cmpi eq, %arg0, %c0_i32_162 : i32
    %606 = arith.extui %605 : i1 to i32
    %c0_i32_163 = arith.constant 0 : i32
    %607 = arith.cmpi ne, %606, %c0_i32_163 : i32
    scf.if %607 {
      %608 = arith.truncf %568 : vector<8x128xf32> to vector<8x128xbf16>
      %c0_164 = arith.constant 0 : index
      %c0_165 = arith.constant 0 : index
      %609 = vector.load %arg11[%c0_164, %c0_165] : memref<128x128xbf16, #tpu.memory_space<vmem>>, vector<128x128xbf16>
      %cst_166 = arith.constant dense<0.000000e+00> : vector<8x128xf32>
      %610 = tpu.matmul %608, %609, %cst_166 {dimension_numbers = #tpu.dot_dimension_numbers<[1], [0], [0], [1], [0, 0, 1, 1], [], []>} : vector<8x128xbf16>, vector<128x128xbf16>, vector<8x128xf32> -> vector<8x128xf32>
      %611 = arith.truncf %593 : vector<8x128xf32> to vector<8x128xbf16>
      %c0_167 = arith.constant 0 : index
      %c0_168 = arith.constant 0 : index
      %612 = vector.load %arg12[%c0_167, %c0_168] : memref<128x128xbf16, #tpu.memory_space<vmem>>, vector<128x128xbf16>
      %cst_169 = arith.constant dense<0.000000e+00> : vector<8x128xf32>
      %613 = tpu.matmul %611, %612, %cst_169 {dimension_numbers = #tpu.dot_dimension_numbers<[1], [0], [0], [1], [0, 0, 1, 1], [], []>} : vector<8x128xbf16>, vector<128x128xbf16>, vector<8x128xf32> -> vector<8x128xf32>
      %614 = arith.addf %610, %613 : vector<8x128xf32>
      %c0_170 = arith.constant 0 : index
      %c0_171 = arith.constant 0 : index
      %615 = vector.load %arg13[%c0_170, %c0_171] : memref<1x128xf32, #tpu.memory_space<vmem>>, vector<1x128xf32>
      %616 = vector.broadcast %615 : vector<1x128xf32> to vector<8x128xf32>
      %617 = arith.addf %614, %616 : vector<8x128xf32>
      %618 = math.tanh %617 : vector<8x128xf32>
      %c0_172 = arith.constant 0 : index
      %c0_173 = arith.constant 0 : index
      %619 = vector.load %arg16[%c0_172, %c0_173] : memref<8x128xf32, #tpu.memory_space<vmem>>, vector<8x128xf32>
      tpu.vector_store %arg16[%c0_172, %c0_173], %618 {strides = array<i32>} : memref<8x128xf32, #tpu.memory_space<vmem>>, vector<8x128xf32>,
    } else {
    }
    return
  }
  func.func @transform_0(%arg0: i32) -> (i32, i32) {
    %c0_i32 = arith.constant 0 : i32
    %c0_i32_0 = arith.constant 0 : i32
    return %arg0, %c0_i32 : i32, i32
  }
  func.func @transform_1(%arg0: i32) -> (i32, i32) {
    %c0_i32 = arith.constant 0 : i32
    %0 = arith.subi %c0_i32, %arg0 : i32
    %c0_i32_0 = arith.constant 0 : i32
    %c0_i32_1 = arith.constant 0 : i32
    return %0, %c0_i32_0 : i32, i32
  }
  func.func @transform_2(%arg0: i32) -> (i32, i32) {
    %c0_i32 = arith.constant 0 : i32
    %c0_i32_0 = arith.constant 0 : i32
    %c0_i32_1 = arith.constant 0 : i32
    return %c0_i32, %c0_i32_0 : i32, i32
  }
  func.func @transform_3(%arg0: i32) -> (i32, i32) {
    %c0_i32 = arith.constant 0 : i32
    %c0_i32_0 = arith.constant 0 : i32
    %c0_i32_1 = arith.constant 0 : i32
    return %c0_i32, %c0_i32_0 : i32, i32
  }
  func.func @transform_4(%arg0: i32) -> (i32, i32) {
    %c0_i32 = arith.constant 0 : i32
    %c0_i32_0 = arith.constant 0 : i32
    %c0_i32_1 = arith.constant 0 : i32
    return %c0_i32, %c0_i32_0 : i32, i32
  }
  func.func @transform_5(%arg0: i32) -> (i32, i32) {
    %c0_i32 = arith.constant 0 : i32
    %c0_i32_0 = arith.constant 0 : i32
    %c0_i32_1 = arith.constant 0 : i32
    return %c0_i32, %c0_i32_0 : i32, i32
  }
  func.func @transform_6(%arg0: i32) -> (i32, i32) {
    %c0_i32 = arith.constant 0 : i32
    %c0_i32_0 = arith.constant 0 : i32
    %c0_i32_1 = arith.constant 0 : i32
    return %c0_i32, %c0_i32_0 : i32, i32
  }
  func.func @transform_7(%arg0: i32) -> (i32, i32) {
    %c0_i32 = arith.constant 0 : i32
    %c0_i32_0 = arith.constant 0 : i32
    %c0_i32_1 = arith.constant 0 : i32
    return %c0_i32, %c0_i32_0 : i32, i32
  }
  func.func @transform_8(%arg0: i32) -> (i32, i32) {
    %c0_i32 = arith.constant 0 : i32
    %c0_i32_0 = arith.constant 0 : i32
    %c0_i32_1 = arith.constant 0 : i32
    return %c0_i32, %c0_i32_0 : i32, i32
  }
  func.func @transform_9(%arg0: i32) -> (i32, i32) {
    %c0_i32 = arith.constant 0 : i32
    %c0_i32_0 = arith.constant 0 : i32
    %c0_i32_1 = arith.constant 0 : i32
    return %c0_i32, %c0_i32_0 : i32, i32
  }
  func.func @transform_10(%arg0: i32) -> (i32, i32) {
    %c0_i32 = arith.constant 0 : i32
    %c0_i32_0 = arith.constant 0 : i32
    %c0_i32_1 = arith.constant 0 : i32
    return %c0_i32, %c0_i32_0 : i32, i32
  }
  func.func @transform_11(%arg0: i32) -> (i32, i32) {
    %c0_i32 = arith.constant 0 : i32
    %c0_i32_0 = arith.constant 0 : i32
    %c0_i32_1 = arith.constant 0 : i32
    return %c0_i32, %c0_i32_0 : i32, i32
  }
  func.func @transform_12(%arg0: i32) -> (i32, i32) {
    %c0_i32 = arith.constant 0 : i32
    %c0_i32_0 = arith.constant 0 : i32
    %c0_i32_1 = arith.constant 0 : i32
    return %c0_i32, %c0_i32_0 : i32, i32
  }
  func.func @transform_13(%arg0: i32) -> (i32, i32, i32) {
    %c0_i32 = arith.constant 0 : i32
    %c0_i32_0 = arith.constant 0 : i32
    %c0_i32_1 = arith.constant 0 : i32
    return %arg0, %c0_i32, %c0_i32_0 : i32, i32, i32
  }
  func.func @transform_14(%arg0: i32) -> (i32, i32, i32) {
    %c0_i32 = arith.constant 0 : i32
    %0 = arith.subi %c0_i32, %arg0 : i32
    %c0_i32_0 = arith.constant 0 : i32
    %c0_i32_1 = arith.constant 0 : i32
    %c0_i32_2 = arith.constant 0 : i32
    return %0, %c0_i32_0, %c0_i32_1 : i32, i32, i32
  }
  func.func @transform_15(%arg0: i32) -> (i32, i32) {
    %c0_i32 = arith.constant 0 : i32
    %c0_i32_0 = arith.constant 0 : i32
    %c0_i32_1 = arith.constant 0 : i32
    return %c0_i32, %c0_i32_0 : i32, i32
  }
}

</mosaic_0001>

<bundles_post_ra>
// kernel: tpu_custom_call.1
= control target key start
LH: loop header
LB: loop body
LE: loop exit
PB: predicated region body
PF: predicated region fallthrough
CT: control target
= control target key end

     0   :  { %21 = vsyncpa [#allocation7], 0  ;;  %s5740_s0 = inlined_call_operand.vmem [shape: bf16[64,32], index: 0, kind: input, shape index: {}]   ;;  %s5741_s1 = inlined_call_operand.vmem [shape: bf16[64,32], index: 1, kind: input, shape index: {}]   ;;  %s5742_s2 = inlined_call_operand.hbm [shape: bf16[32,384], index: 2, kind: input, shape index: {}]   ;;  %s5743_s3 = inlined_call_operand.hbm [shape: bf16[32,384], index: 3, kind: input, shape index: {}]   ;;  %s5744_s4 = inlined_call_operand.hbm [shape: f32[1,384], index: 4, kind: input, shape index: {}]   ;;  %s5745_s5 = inlined_call_operand.hbm [shape: f32[1,384], index: 5, kind: input, shape index: {}]   ;;  %s5746_s6 = inlined_call_operand.vmem [shape: f32[1,128], index: 6, kind: input, shape index: {}]   ;;  %s5747_s7 = inlined_call_operand.vmem [shape: f32[1,128], index: 7, kind: input, shape index: {}]   ;;  %s5748_s8 = inlined_call_operand.hbm [shape: bf16[128,384], index: 8, kind: input, shape index: {}]   ;;  %s5749_s9 = inlined_call_operand.hbm [shape: bf16[128,384], index: 9, kind: input, shape index: {}]   ;;  %s5750_s10 = inlined_call_operand.vmem [shape: bf16[128,128], index: 10, kind: input, shape index: {}]   ;;  %s5751_s11 = inlined_call_operand.vmem [shape: bf16[128,128], index: 11, kind: input, shape index: {}]   ;;  %s5752_s12 = inlined_call_operand.vmem [shape: f32[1,128], index: 12, kind: input, shape index: {}]   ;;  %s5753_s13 = inlined_call_operand.hbm [shape: f32[8,8,128], index: 13, kind: output, shape index: {0}]   ;;  %s5754_s14 = inlined_call_operand.hbm [shape: f32[8,8,128], index: 14, kind: output, shape index: {1}]   ;;  %s5755_s15 = inlined_call_operand.hbm [shape: f32[8,128], index: 15, kind: output, shape index: {2}]  }
   0x1   :  { %22 = vsyncpa [#allocation10], 0 }
   0x2   :  { %23 = vsyncpa [#allocation13], 0 }
   0x3   :  { %24 = vsyncpa [#allocation16], 0 }
   0x4   :  { %25 = vsyncpa [#allocation8], 0 }
   0x5   :  { %26 = vsyncpa [#allocation19], 0  ;;  %s4365_s18 = smov [#allocation9]   ;;  %s4366_s20 = smov [#allocation12]  }
   0x6   :  { %s56_s19 = sshll.u32 %s4365_s18, 4  ;;  %s79_s21 = sshll.u32 %s4366_s20, 4  ;;  %s57_s19 = int_to_ptr.vmem [resolvable:$true] %s56_s19  ;;  %s4462_s21 = int_to_ptr.vmem [resolvable:$true] %s79_s21 }
   0x7   :  { %s4155_s24 = scalar_lea.hbm %s5743_s3, 768 }
   0x8   :  { %p4156_p0 = scmp.ne.s32.totalorder %s5743_s3, %s4155_s24  ;;  %p4159_p1 = scmp.lt.u32.totalorder %s4155_s24, %s5743_s3 }
   0xa   :  { %p4161_p2 = pnand %p4159_p1, %p4156_p0 }
   0xc   :  { %4164 = shalt.err (!%p4161_p2)
}
   0xd   :  { %s4165_s29 = scalar_lea.vmem %s57_s19, 768  ;;  %p4170_p4 = scmp.lt.s32.totalorder %s57_s19, %s57_s19 }
   0xe   :  { %p4166_p3 = scmp.ne.s32.totalorder %s57_s19, %s4165_s29  ;;  %p4171_p5 = scmp.lt.s32.totalorder %s4165_s29, %s4165_s29 }
  0x10   :  { %p4172_p6 = por %p4171_p5, %p4170_p4 }
  0x12   :  { %p4173_p7 = pnand %p4172_p6, %p4166_p3 }
  0x14   :  { %4176 = shalt.err (!%p4173_p7)
}
  0x15   :  { %s4367_s30 = smov 192   ;;  %s4368_s16 = smov 12  }
  0x16   :  { %62 = dma.hbm_to_vmem [thread:$0]  %s5743_s3, 768, %s57_s19, [#allocation10], %s4367_s30, %s4367_s30, %s4368_s16  }
  0x17   :  { %s4177_s23 = scalar_lea.hbm %s5745_s5, 48 }
  0x18   :  { %p4178_p8 = scmp.ne.s32.totalorder %s5745_s5, %s4177_s23  ;;  %p4181_p9 = scmp.lt.u32.totalorder %s4177_s23, %s5745_s5 }
  0x1a   :  { %p4183_p10 = pnand %p4181_p9, %p4178_p8 }
  0x1c   :  { %4186 = shalt.err (!%p4183_p10)
}
  0x1d   :  { %s4187_s28 = scalar_lea.vmem %s4462_s21, 48  ;;  %s4191_s3 = scalar_lea.vmem %s4462_s21, 64 }
  0x1e   :  { %p4188_p11 = scmp.ne.s32.totalorder %s4462_s21, %s4187_s28  ;;  %p4192_p12 = scmp.lt.s32.totalorder %s4462_s21, %s4462_s21 }
  0x1f   :  { %p4193_p13 = scmp.lt.s32.totalorder %s4191_s3, %s4187_s28 }
  0x21   :  { %p4194_p0 = por %p4193_p13, %p4192_p12 }
  0x23   :  { %p4195_p1 = pnand %p4194_p0, %p4188_p11 }
  0x25   :  { %4198 = shalt.err (!%p4195_p1)
}
  0x26   :  { %82 = dma.hbm_to_vmem [thread:$0]  %s5745_s5, 48, %s4462_s21, [#allocation13]  }
  0x27   :  { %s4369_s17 = smov [#allocation6]   ;;  %s4370_s20 = smov [#allocation11]  }
  0x28   :  { %s44_s18 = sshll.u32 %s4369_s17, 4  ;;  %s69_s22 = sshll.u32 %s4370_s20, 4  ;;  %s45_s18 = int_to_ptr.vmem [resolvable:$true] %s44_s18  ;;  %s70_s22 = int_to_ptr.vmem [resolvable:$true] %s69_s22 }
  0x29   :  { %s4199_s25 = scalar_lea.hbm %s5742_s2, 768 }
  0x2a   :  { %p4200_p2 = scmp.ne.s32.totalorder %s5742_s2, %s4199_s25  ;;  %p4203_p3 = scmp.lt.u32.totalorder %s4199_s25, %s5742_s2 }
  0x2c   :  { %p4205_p4 = pnand %p4203_p3, %p4200_p2 }
  0x2e   :  { %4208 = shalt.err (!%p4205_p4)
}
  0x2f   :  { %s4209_s5 = scalar_lea.vmem %s45_s18, 768  ;;  %p4214_p6 = scmp.lt.s32.totalorder %s45_s18, %s45_s18 }
  0x30   :  { %p4210_p5 = scmp.ne.s32.totalorder %s45_s18, %s4209_s5  ;;  %p4215_p7 = scmp.lt.s32.totalorder %s4209_s5, %s4209_s5 }
  0x32   :  { %p4216_p8 = por %p4215_p7, %p4214_p6 }
  0x34   :  { %p4217_p9 = pnand %p4216_p8, %p4210_p5 }
  0x36   :  { %4220 = shalt.err (!%p4217_p9)
}
  0x37   :  { %50 = dma.hbm_to_vmem [thread:$0]  %s5742_s2, 768, %s45_s18, [#allocation7], %s4367_s30, %s4367_s30, %s4368_s16  }
  0x38   :  { %s4221_s20 = scalar_lea.hbm %s5744_s4, 48 }
  0x39   :  { %p4222_p10 = scmp.ne.s32.totalorder %s5744_s4, %s4221_s20  ;;  %p4225_p11 = scmp.lt.u32.totalorder %s4221_s20, %s5744_s4 }
  0x3b   :  { %p4227_p12 = pnand %p4225_p11, %p4222_p10 }
  0x3d   :  { %4230 = shalt.err (!%p4227_p12)
}
  0x3e   :  { %s4231_s27 = scalar_lea.vmem %s70_s22, 48  ;;  %s4235_s28 = scalar_lea.vmem %s70_s22, 64 }
  0x3f   :  { %p4232_p13 = scmp.ne.s32.totalorder %s70_s22, %s4231_s27  ;;  %p4236_p0 = scmp.lt.s32.totalorder %s70_s22, %s70_s22 }
  0x40   :  { %p4237_p1 = scmp.lt.s32.totalorder %s4235_s28, %s4231_s27 }
  0x42   :  { %p4238_p2 = por %p4237_p1, %p4236_p0 }
  0x44   :  { %p4239_p3 = pnand %p4238_p2, %p4232_p13 }
  0x46   :  { %4242 = shalt.err (!%p4239_p3)
}
  0x47   :  { %72 = dma.hbm_to_vmem [thread:$0]  %s5744_s4, 48, %s70_s22, [#allocation10]  }
  0x48   :  { %s4371_s3 = smov [#allocation14]   ;;  %s4372_s21 = smov [#allocation15]  }
  0x49   :  { %s92_s5 = sshll.u32 %s4371_s3, 4  ;;  %s104_s19 = sshll.u32 %s4372_s21, 4  ;;  %s93_s5 = int_to_ptr.vmem [resolvable:$true] %s92_s5  ;;  %s4524_s19 = int_to_ptr.vmem [resolvable:$true] %s104_s19 }
  0x4a   :  { %s4243_s20 = scalar_lea.hbm %s5748_s8, 3072 }
  0x4b   :  { %p4244_p4 = scmp.ne.s32.totalorder %s5748_s8, %s4243_s20  ;;  %p4247_p5 = scmp.lt.u32.totalorder %s4243_s20, %s5748_s8 }
  0x4d   :  { %p4249_p6 = pnand %p4247_p5, %p4244_p4 }
  0x4f   :  { %4252 = shalt.err (!%p4249_p6)
}
  0x50   :  { %s4253_s4 = scalar_lea.vmem %s93_s5, 3072  ;;  %p4258_p8 = scmp.lt.s32.totalorder %s93_s5, %s93_s5 }
  0x51   :  { %p4254_p7 = scmp.ne.s32.totalorder %s93_s5, %s4253_s4  ;;  %p4259_p9 = scmp.lt.s32.totalorder %s4253_s4, %s4253_s4 }
  0x53   :  { %p4260_p10 = por %p4259_p9, %p4258_p8 }
  0x55   :  { %p4261_p11 = pnand %p4260_p10, %p4254_p7 }
  0x57   :  { %4264 = shalt.err (!%p4261_p11)
}
  0x58   :  { %98 = dma.hbm_to_vmem [thread:$0]  %s5748_s8, 3072, %s93_s5, [#allocation13], %s4367_s30, %s4367_s30, %s4368_s16  }
  0x59   :  { %s4265_s18 = scalar_lea.hbm %s5749_s9, 3072 }
  0x5a   :  { %p4266_p12 = scmp.ne.s32.totalorder %s5749_s9, %s4265_s18  ;;  %p4269_p13 = scmp.lt.u32.totalorder %s4265_s18, %s5749_s9 }
  0x5c   :  { %p4271_p0 = pnand %p4269_p13, %p4266_p12 }
  0x5e   :  { %4274 = shalt.err (!%p4271_p0)
}
  0x5f   :  { %s4275_s20 = scalar_lea.vmem %s4524_s19, 3072  ;;  %p4280_p2 = scmp.lt.s32.totalorder %s4524_s19, %s4524_s19 }
  0x60   :  { %p4276_p1 = scmp.ne.s32.totalorder %s4524_s19, %s4275_s20  ;;  %p4281_p3 = scmp.lt.s32.totalorder %s4275_s20, %s4275_s20 }
  0x62   :  { %p4282_p4 = por %p4281_p3, %p4280_p2 }
  0x64   :  { %p4283_p5 = pnand %p4282_p4, %p4276_p1 }
  0x66   :  { %4286 = shalt.err (!%p4283_p5)
}
  0x67   :  { %110 = dma.hbm_to_vmem [thread:$0]  %s5749_s9, 3072, %s4524_s19, [#allocation16], %s4367_s30, %s4367_s30, %s4368_s16  }
  0x68   :  { %4353 = dma.done.wait [#allocation7], 768  }
  0x69   :  { %4354 = vsyncadd [#allocation7], 4294966528 }
  0x6a   :  { %4355 = dma.done.wait [#allocation10], 816  }
  0x6b   :  { %4356 = vsyncadd [#allocation10], 4294966480 }
  0x6c   :  { %4357 = dma.done.wait [#allocation13], 3120  }
  0x6d   :  { %4358 = vsyncadd [#allocation13], 4294964176 }
  0x6e   :  { %4359 = dma.done.wait [#allocation16], 3072  }
  0x6f   :  { %4360 = vsyncadd [#allocation16], 4294964224  ;;  %v5756_v0 = vmov 0   ;;  %v3793_v1 = vld [vmem:[#allocation6 + $0x4] ss:$12 sps:$4 sm:$0xff]   ;;  %v3799_v6 = vld [vmem:[%s5740_s0 + $0x18] sm:$0xff]  }
  0x70   :  { %318 = vmatprep.mubr.bf16.mxu1 %v5756_v0  ;;  %288 = vmatprep.mubr.bf16.mxu0 %v5756_v0  ;;  %v3795_v2 = vld [vmem:[#allocation6] ss:$12 sps:$4 sm:$0xff]   ;;  %v3796_v3 = vld [vmem:[#allocation6 + $0x1c] ss:$12 sps:$4 sm:$0xff]   ;;  %v3798_v4 = vld [vmem:[#allocation6 + $0x18] ss:$12 sps:$4 sm:$0xff]  }
  0x71   :  { %3772 = vmatprep.subr.bf16.mxu1 %v3793_v1  ;;  %256 = vmatprep.subr.bf16.mxu0 %v3793_v1  ;;  %v3800_v5 = vld [vmem:[#allocation6 + $0x8] ss:$12 sps:$4 sm:$0xff]   ;;  %vm243_vm0 = vcmask 261120   ;;  %v3802_v7 = vld [vmem:[%s5740_s0] sm:$0xff]   ;;  %v3804_v12 = vld [vmem:[#allocation9] ss:$12 sps:$4 sm:$0xff]  }
  0x72   :  { %3774 = vmatpush1.bf16.msra.mxu1 %v3795_v2  ;;  %257 = vmatpush1.bf16.msra.mxu0 %v3795_v2  ;;  %v3801_v8 = vld [vmem:[#allocation6 + $0x20] ss:$12 sps:$4 sm:$0xff]   ;;  %v3815_v11 = vld [vmem:[#allocation9 + $0x8] ss:$12 sps:$4 sm:$0xff]   ;;  %v3807_v13 = vld [vmem:[%s5740_s0 + $0x10] sm:$0xff]   ;;  %v5758_v18 = vmov 0.0  }
  0x73   :  { %3773 = vmatprep.subr.bf16.mxu1 %v3796_v3  ;;  %258 = vmatprep.subr.bf16.mxu0 %v3796_v3  ;;  %v3806_v9 = vld [vmem:[#allocation9 + $0x4] ss:$12 sps:$4 sm:$0xff]   ;;  %v3803_v10 = vld [vmem:[%s5740_s0 + $0x8] sm:$0xff]   ;;  %v3826_v17 = vld [vmem:[#allocation9 + $0x20] ss:$12 sps:$4 sm:$0xff]   ;;  %vm4375_vm1 = vmmov 0  }
  0x74   :  { %v3810_v14 = vld [vmem:[#allocation9 + $0x1c] ss:$12 sps:$4 sm:$0xff]   ;;  %v3808_v15 = vld [vmem:[#allocation9 + $0x18] ss:$12 sps:$4 sm:$0xff]   ;;  %v3813_v19 = vld [vmem:[%s5741_s1] sm:$0xff]   ;;  %v4376_v50 = vmov 0.0|0.0  }
  0x75   :  { %v4582_v16 = vld [vmem:[#allocation14 + $0x4] ss:$12 sps:$4 sm:$0xff]   ;;  %v4594_v20 = vld [vmem:[#allocation14] ss:$12 sps:$4 sm:$0xff]   ;;  %v4596_v21 = vld [vmem:[#allocation14 + $0x1c] ss:$12 sps:$4 sm:$0xff]  }
  0x76   :  { %3775 = vmatpush1.bf16.msra.mxu1 %v3798_v4  ;;  %259 = vmatpush1.bf16.msra.mxu0 %v3798_v4  ;;  %v3821_v22 = vld [vmem:[%s5741_s1 + $0x8] sm:$0xff]   ;;  %v4601_v23 = vld [vmem:[#allocation14 + $0x8] ss:$12 sps:$4 sm:$0xff]   ;;  %v4618_v28 = vld [vmem:[#allocation14 + $0x30] ss:$12 sps:$4 sm:$0xff]   ;;  %s4378_s25 = smov [#allocation17]  }
  0x77   :  { %3388 = vmatprep.subr.bf16.mxu1 %v3800_v5  ;;  %3400 = vmatprep.subr.bf16.mxu0 %v3815_v11  ;;  %v4604_v24 = vld [vmem:[#allocation14 + $0x18] ss:$12 sps:$4 sm:$0xff]   ;;  %v3829_v25 = vld [vmem:[%s5741_s1 + $0x10] sm:$0xff]   ;;  %v4613_v26 = vld [vmem:[#allocation14 + $0x34] ss:$12 sps:$4 sm:$0xff]   ;;  %s3009_s26 = sshll.u32 %s4378_s25, 4  ;;  %s3010_s26 = int_to_ptr.vmem [resolvable:$true] %s3009_s26 }
  0x78   :  { %v4616_v27 = vld [vmem:[#allocation14 + $0x20] ss:$12 sps:$4 sm:$0xff]   ;;  %v3836_v30 = vld [vmem:[%s5741_s1 + $0x18] sm:$0xff]   ;;  %v4630_v31 = vld [vmem:[#allocation14 + $0x38] ss:$12 sps:$4 sm:$0xff]  }
  0x79   :  { %3092 = vmatmul.mubr.msk.bf16.vlgmr.msra.gmra.mrb[0].mxu1 %vm243_vm0, %v3799_v6  ;;  %3089 = vmatmul.mubr.msk.bf16.vlgmr.msra.gmra.mrb[0].mxu0 %vm243_vm0, %v3802_v7  ;;  %v4622_v29 = vld [vmem:[#allocation14 + $0x4c] ss:$12 sps:$4 sm:$0xff]   ;;  %v4636_v32 = vld [vmem:[#allocation14 + $0x48] ss:$12 sps:$4 sm:$0xff]   ;;  %v4639_v33 = vld [vmem:[#allocation14 + $0x64] ss:$12 sps:$4 sm:$0xff]  }
  0x7a   :  { %3389 = vmatpush3.bf16.msra.mxu1 %v3800_v5  ;;  %3392 = vmatprep.mubr.msk.bf16.mxu1 %vm243_vm0, %v3802_v7  ;;  %v4643_v34 = vld [vmem:[#allocation14 + $0x50] ss:$12 sps:$4 sm:$0xff]   ;;  %v4649_v35 = vld [vmem:[#allocation14 + $0x60] ss:$12 sps:$4 sm:$0xff]   ;;  %v4655_v37 = vld [vmem:[#allocation14 + $0x68] ss:$12 sps:$4 sm:$0xff]  }
  0x7b   :  { %3390 = vmatprep.subr.bf16.mxu1 %v3801_v8  ;;  %298 = vmatprep.mubr.bf16.mxu0 %v5756_v0  ;;  %5796 = vst [vmem:[#allocation27_spill] sm:$0xff] %v4649_v35  ;;  %v4651_v36 = vld [vmem:[#allocation14 + $0x7c] ss:$12 sps:$4 sm:$0xff]   ;;  %5798 = vst [vmem:[#allocation29_spill] sm:$0xff] %v4655_v37  ;;  %v4659_v38 = vld [vmem:[#allocation14 + $0x78] ss:$12 sps:$4 sm:$0xff]  }
  0x7c   :  { %3401 = vmatpush3.bf16.msra.mxu0 %v3815_v11  ;;  %5797 = vst [vmem:[#allocation28_spill] sm:$0xff] %v4651_v36  ;;  %5799 = vst [vmem:[#allocation30_spill] sm:$0xff] %v4659_v38  ;;  %v4663_v39 = vld [vmem:[#allocation14 + $0x94] ss:$12 sps:$4 sm:$0xff]   ;;  %v4669_v41 = vld [vmem:[#allocation14 + $0x90] ss:$12 sps:$4 sm:$0xff]  }
  0x7d   :  { %3402 = vmatprep.subr.bf16.mxu0 %v3826_v17  ;;  %5800 = vst [vmem:[#allocation31_spill] sm:$0xff] %v4663_v39  ;;  %v4667_v40 = vld [vmem:[#allocation14 + $0x80] ss:$12 sps:$4 sm:$0xff]   ;;  %5802 = vst [vmem:[#allocation33_spill] sm:$0xff] %v4669_v41  ;;  %v4674_v43 = vld [vmem:[#allocation14 + $0x98] ss:$12 sps:$4 sm:$0xff]  }
  0x7e   :  { %3391 = vmatpush3.bf16.msra.mxu1 %v3801_v8  ;;  %5801 = vst [vmem:[#allocation32_spill] sm:$0xff] %v4667_v40  ;;  %v4672_v42 = vld [vmem:[#allocation14 + $0xac] ss:$12 sps:$4 sm:$0xff]   ;;  %5804 = vst [vmem:[#allocation35_spill] sm:$0xff] %v4674_v43  ;;  %v4679_v44 = vld [vmem:[#allocation14 + $0xa8] ss:$12 sps:$4 sm:$0xff]   ;;  %v176_v8 = vlaneseq }
  0x7f   :  { %515 = vmatprep.subr.bf16.mxu1 %v3806_v9  ;;  %5803 = vst [vmem:[#allocation34_spill] sm:$0xff] %v4672_v42  ;;  %5805 = vst [vmem:[#allocation36_spill] sm:$0xff] %v4679_v44  ;;  %v4683_v45 = vld [vmem:[#allocation15 + $0x4] ss:$12 sps:$4 sm:$0xff]   ;;  %v4691_v47 = vld [vmem:[#allocation15] ss:$12 sps:$4 sm:$0xff]  }
  0x80   :  { %3403 = vmatpush3.bf16.msra.mxu0 %v3826_v17  ;;  %5806 = vst [vmem:[#allocation37_spill] sm:$0xff] %v4683_v45  ;;  %v4685_v46 = vld [vmem:[#allocation14 + $0xb0] ss:$12 sps:$4 sm:$0xff]   ;;  %v4696_v49 = vld [vmem:[#allocation15 + $0x8] ss:$12 sps:$4 sm:$0xff]   ;;  %v177_v9 = vshrl.u32 %v176_v8, 7 }
  0x81   :  { %3393 = vmatmul.mubr.msk.bf16.vlgmr.msra.gmra.mrb[4].mxu1 %vm243_vm0, %v3803_v10  ;;  %3090 = vmatmul.mubr.msk.bf16.gmra.mrb[4].mxu0 %vm243_vm0, %v3803_v10  ;;  %5807 = vst [vmem:[#allocation38_spill] sm:$0xff] %v4685_v46  ;;  %v4694_v48 = vld [vmem:[#allocation15 + $0x1c] ss:$12 sps:$4 sm:$0xff]   ;;  %v4703_v51 = vld [vmem:[#allocation15 + $0x18] ss:$12 sps:$4 sm:$0xff]  }
  0x82   :  { %516 = vmatpush1.bf16.msra.mxu1 %v3804_v12  ;;  %3396 = vmatprep.mubr.msk.bf16.mxu1 %vm243_vm0, %v3807_v13  ;;  %v4706_v52 = vld [vmem:[#allocation15 + $0x34] ss:$12 sps:$4 sm:$0xff]   ;;  %v4716_v54 = vld [vmem:[#allocation15 + $0x30] ss:$12 sps:$4 sm:$0xff]   ;;  %v4719_v55 = vld [vmem:[#allocation15 + $0x4c] ss:$12 sps:$4 sm:$0xff]  }
  0x83   :  { %517 = vmatprep.subr.bf16.mxu1 %v3810_v14  ;;  %308 = vmatprep.mubr.bf16.mxu0 %v5756_v0  ;;  %v4709_v53 = vld [vmem:[#allocation15 + $0x20] ss:$12 sps:$4 sm:$0xff]   ;;  %v4722_v56 = vld [vmem:[#allocation15 + $0x38] ss:$12 sps:$4 sm:$0xff]   ;;  %v4726_v57 = vld [vmem:[#allocation15 + $0x48] ss:$12 sps:$4 sm:$0xff]  }
  0x84   :  { %3412 = vmatprep.subr.bf16.mxu0 %v5758_v18  ;;  %v4729_v58 = vld [vmem:[#allocation15 + $0x64] ss:$12 sps:$4 sm:$0xff]   ;;  %v4736_v60 = vld [vmem:[#allocation15 + $0x60] ss:$12 sps:$4 sm:$0xff]   ;;  %v4739_v61 = vld [vmem:[#allocation15 + $0x7c] ss:$12 sps:$4 sm:$0xff]  }
  0x85   :  { %v4732_v59 = vld [vmem:[#allocation15 + $0x50] ss:$12 sps:$4 sm:$0xff]   ;;  %v4742_v62 = vld [vmem:[#allocation15 + $0x68] ss:$12 sps:$4 sm:$0xff]   ;;  %v4746_v63 = vld [vmem:[#allocation15 + $0x78] ss:$12 sps:$4 sm:$0xff]  }
  0x86   :  { %518 = vmatpush1.bf16.msra.mxu1 %v3808_v15  ;;  %v4749_v1 = vld [vmem:[#allocation15 + $0x94] ss:$12 sps:$4 sm:$0xff]   ;;  %v4756_v3 = vld [vmem:[#allocation15 + $0x90] ss:$12 sps:$4 sm:$0xff]   ;;  %v4759_v4 = vld [vmem:[#allocation15 + $0xac] ss:$12 sps:$4 sm:$0xff]  }
  0x87   :  { %886 = vmatprep.subr.bf16.mxu1 %v4582_v16  ;;  %v4752_v2 = vld [vmem:[#allocation15 + $0x80] ss:$12 sps:$4 sm:$0xff]   ;;  %v4762_v5 = vld [vmem:[#allocation15 + $0x98] ss:$12 sps:$4 sm:$0xff]   ;;  %v4770_v7 = vld [vmem:[#allocation15 + $0xb0] ss:$12 sps:$4 sm:$0xff]  }
  0x88   :  { %v178_v10 = vsub.s32 0, %v177_v9  ;;  %v174_v11 = vld [vmem:[#allocation11] sm:$0x7]  ;;  %v182_v12 = vsub.s32 1, %v177_v9 }
  0x89   :  { %3397 = vmatmul.mubr.msk.bf16.gmra.mrb[8].mxu1 %vm243_vm0, %v3799_v6  ;;  %3091 = vmatmul.mubr.msk.bf16.gmra.mrb[8].mxu0 %vm243_vm0, %v3807_v13  ;;  %v4766_v6 = vld [vmem:[#allocation15 + $0xa8] ss:$12 sps:$4 sm:$0xff]  }
  0x8a   :  { %547 = vmatprep.mubr.bf16.mxu1 %v5756_v0  ;;  %3404 = vmatprep.mubr.msk.bf16.mxu0 %vm243_vm0, %v3813_v19  ;;  %v4812_v13 = vrot.slane %v174_v11, %v178_v10  ;;  %v4814_v14 = vrot.slane %v174_v11, %v182_v12 }
  0x91   :  { %3107 = vmatmul.mubr.msk.bf16.vlgmr.msra.gmra.mrb[12].mxu1 %vm243_vm0, %v3813_v19  ;;  %3405 = vmatmul.mubr.msk.bf16.vlgmr.msra.gmra.mrb[12].mxu0 %vm243_vm0, %v3821_v22 }
  0x92   :  { %887 = vmatpush1.bf16.msra.mxu1 %v4594_v20  ;;  %557 = vmatprep.mubr.bf16.mxu1 %v5756_v0 }
  0x93   :  { %888 = vmatprep.subr.bf16.mxu1 %v4596_v21  ;;  %3413 = vmatpush3.bf16.msra.mxu0 %v4601_v23 }
  0x94   :  { %3414 = vmatprep.subr.bf16.mxu0 %v5758_v18  ;;  %3408 = vmatprep.mubr.msk.bf16.mxu0 %vm243_vm0, %v3829_v25 }
  0x96   :  { %889 = vmatpush1.bf16.msra.mxu1 %v4604_v24 }
  0x97   :  { %890 = vmatprep.subr.bf16.mxu1 %v4613_v26  ;;  %3415 = vmatpush3.bf16.msra.mxu0 %v4616_v27 }
  0x98   :  { %3416 = vmatprep.subr.bf16.mxu0 %v5758_v18 }
  0x99   :  { %3108 = vmatmul.mubr.msk.bf16.gmra.mrb[16].mxu1 %vm243_vm0, %v3821_v22  ;;  %3409 = vmatmul.mubr.msk.bf16.gmra.mrb[16].mxu0 %vm243_vm0, %v3836_v30 }
  0x9a   :  { %891 = vmatpush1.bf16.msra.mxu1 %v4618_v28  ;;  %567 = vmatprep.mubr.bf16.mxu1 %v5756_v0 }
  0x9b   :  { %892 = vmatprep.subr.bf16.mxu1 %v4622_v29  ;;  %3417 = vmatpush3.bf16.msra.mxu0 %v4630_v31 }
  0x9c   :  { %3418 = vmatprep.subr.bf16.mxu0 %v5758_v18  ;;  %3428 = vmatprep.mubr.msk.bf16.mxu0 %vm4375_vm1, %v5758_v18 }
  0x9e   :  { %893 = vmatpush1.bf16.msra.mxu1 %v4636_v32 }
  0x9f   :  { %894 = vmatprep.subr.bf16.mxu1 %v4639_v33  ;;  %3419 = vmatpush3.bf16.msra.mxu0 %v4643_v34 }
  0xa0   :  { %3420 = vmatprep.subr.bf16.mxu0 %v5758_v18 }
  0xa1   :  { %3109 = vmatmul.mubr.msk.bf16.gmra.mrb[20].mxu1 %vm243_vm0, %v3829_v25  ;;  %v186_v25 = vsub.s32 2, %v177_v9 }
  0xa2   :  { %895 = vmatpush1.bf16.msra.mxu1 %v4649_v35  ;;  %577 = vmatprep.mubr.bf16.mxu1 %v5756_v0 }
  0xa3   :  { %896 = vmatprep.subr.bf16.mxu1 %v4651_v36  ;;  %3421 = vmatpush3.bf16.msra.mxu0 %v4655_v37 }
  0xa4   :  { %3422 = vmatprep.subr.bf16.mxu0 %v5758_v18 }
  0xa6   :  { %897 = vmatpush1.bf16.msra.mxu1 %v4659_v38 }
  0xa7   :  { %898 = vmatprep.subr.bf16.mxu1 %v4663_v39  ;;  %3423 = vmatpush3.bf16.msra.mxu0 %v4667_v40 }
  0xa8   :  { %3424 = vmatprep.subr.bf16.mxu0 %v5758_v18 }
  0xa9   :  { %3110 = vmatmul.mubr.msk.bf16.gmra.mrb[24].mxu1 %vm243_vm0, %v3836_v30 }
  0xaa   :  { %899 = vmatpush1.bf16.msra.mxu1 %v4669_v41  ;;  %918 = vmatprep.mubr.bf16.mxu1 %v5756_v0 }
  0xab   :  { %900 = vmatprep.subr.bf16.mxu1 %v4672_v42  ;;  %3425 = vmatpush3.bf16.msra.mxu0 %v4674_v43 }
  0xac   :  { %3426 = vmatprep.subr.bf16.mxu0 %v5758_v18 }
  0xae   :  { %901 = vmatpush1.bf16.msra.mxu1 %v4679_v44 }
  0xaf   :  { %1096 = vmatprep.subr.bf16.mxu1 %v4683_v45  ;;  %3427 = vmatpush3.bf16.msra.mxu0 %v4685_v46 }
  0xb0   :  { %3432 = vmatprep.subr.bf16.mxu0 %v5758_v18 }
  0xb1   :  { %919 = vmatmul.mubr.bf16.vlgmr.msra.gmra.mrb[28].mxu1 %v4376_v50 }
  0xb2   :  { %1097 = vmatpush1.bf16.msra.mxu1 %v4691_v47  ;;  %3429 = vmatmul.mubr.bf16.vlgmr.msra.gmra.mrb[20].mxu0 %v4376_v50 }
  0xb3   :  { %1098 = vmatprep.subr.bf16.mxu1 %v4694_v48  ;;  %3433 = vmatpush3.bf16.msra.mxu0 %v4696_v49 }
  0xb4   :  { %3434 = vmatprep.subr.bf16.mxu0 %v5758_v18  ;;  %1128 = vmatprep.mubr.bf16.mxu1 %v5756_v0 }
  0xb5   :  { %3448 = vmatprep.mubr.msk.bf16.mxu0 %vm4375_vm1, %v5758_v18 }
  0xb6   :  { %1099 = vmatpush1.bf16.msra.mxu1 %v4703_v51 }
  0xb7   :  { %1100 = vmatprep.subr.bf16.mxu1 %v4706_v52  ;;  %3435 = vmatpush3.bf16.msra.mxu0 %v4709_v53 }
  0xb8   :  { %3436 = vmatprep.subr.bf16.mxu0 %v5758_v18 }
  0xba   :  { %1101 = vmatpush1.bf16.msra.mxu1 %v4716_v54 }
  0xbb   :  { %1102 = vmatprep.subr.bf16.mxu1 %v4719_v55  ;;  %3437 = vmatpush3.bf16.msra.mxu0 %v4722_v56 }
  0xbc   :  { %3438 = vmatprep.subr.bf16.mxu0 %v5758_v18 }
  0xbe   :  { %1103 = vmatpush1.bf16.msra.mxu1 %v4726_v57 }
  0xbf   :  { %1104 = vmatprep.subr.bf16.mxu1 %v4729_v58  ;;  %3439 = vmatpush3.bf16.msra.mxu0 %v4732_v59 }
  0xc0   :  { %3440 = vmatprep.subr.bf16.mxu0 %v5758_v18 }
  0xc2   :  { %1105 = vmatpush1.bf16.msra.mxu1 %v4736_v60 }
  0xc3   :  { %1106 = vmatprep.subr.bf16.mxu1 %v4739_v61  ;;  %3441 = vmatpush3.bf16.msra.mxu0 %v4742_v62 }
  0xc4   :  { %3442 = vmatprep.subr.bf16.mxu0 %v5758_v18 }
  0xc6   :  { %1107 = vmatpush1.bf16.msra.mxu1 %v4746_v63 }
  0xc7   :  { %1108 = vmatprep.subr.bf16.mxu1 %v4749_v1  ;;  %3443 = vmatpush3.bf16.msra.mxu0 %v4752_v2 }
  0xc8   :  { %3444 = vmatprep.subr.bf16.mxu0 %v5758_v18 }
  0xca   :  { %1109 = vmatpush1.bf16.msra.mxu1 %v4756_v3 }
  0xcb   :  { %1110 = vmatprep.subr.bf16.mxu1 %v4759_v4  ;;  %3445 = vmatpush3.bf16.msra.mxu0 %v4762_v5 }
  0xcc   :  { %3446 = vmatprep.subr.bf16.mxu0 %v5758_v18 }
  0xce   :  { %1111 = vmatpush1.bf16.msra.mxu1 %v4766_v6 }
  0xcf   :  { %3447 = vmatpush3.bf16.msra.mxu0 %v4770_v7  ;;  %1235 = vmatprep.subr.bf16.mxu1 %v4582_v16 }
  0xd0   :  { %3452 = vmatprep.subr.bf16.mxu0 %v5758_v18 }
  0xd1   :  { %1129 = vmatmul.mubr.bf16.vlgmr.msra.gmra.mrb[32].mxu1 %v4376_v50 }
  0xd2   :  { %3449 = vmatmul.mubr.bf16.vlgmr.msra.gmra.mrb[24].mxu0 %v4376_v50  ;;  %1236 = vmatpush1.bf16.msra.mxu1 %v4594_v20 }
  0xd3   :  { %3453 = vmatpush3.bf16.msra.mxu0 %v4601_v23  ;;  %1237 = vmatprep.subr.bf16.mxu1 %v4596_v21 }
  0xd4   :  { %3454 = vmatprep.subr.bf16.mxu0 %v5758_v18  ;;  %1267 = vmatprep.mubr.bf16.mxu1 %v5756_v0 }
  0xd5   :  { %3468 = vmatprep.mubr.msk.bf16.mxu0 %vm4375_vm1, %v5758_v18 }
  0xd6   :  { %1238 = vmatpush1.bf16.msra.mxu1 %v4604_v24 }
  0xd7   :  { %3455 = vmatpush3.bf16.msra.mxu0 %v4616_v27  ;;  %1239 = vmatprep.subr.bf16.mxu1 %v4613_v26 }
  0xd8   :  { %3456 = vmatprep.subr.bf16.mxu0 %v5758_v18 }
  0xda   :  { %1240 = vmatpush1.bf16.msra.mxu1 %v4618_v28 }
  0xdb   :  { %3457 = vmatpush3.bf16.msra.mxu0 %v4630_v31  ;;  %1241 = vmatprep.subr.bf16.mxu1 %v4622_v29 }
  0xdc   :  { %3458 = vmatprep.subr.bf16.mxu0 %v5758_v18 }
  0xde   :  { %1242 = vmatpush1.bf16.msra.mxu1 %v4636_v32 }
  0xdf   :  { %3459 = vmatpush3.bf16.msra.mxu0 %v4643_v34  ;;  %1243 = vmatprep.subr.bf16.mxu1 %v4639_v33 }
  0xe0   :  { %3460 = vmatprep.subr.bf16.mxu0 %v5758_v18 }
  0xe2   :  { %1244 = vmatpush1.bf16.msra.mxu1 %v4649_v35 }
  0xe3   :  { %3461 = vmatpush3.bf16.msra.mxu0 %v4655_v37  ;;  %1245 = vmatprep.subr.bf16.mxu1 %v4651_v36 }
  0xe4   :  { %3462 = vmatprep.subr.bf16.mxu0 %v5758_v18 }
  0xe6   :  { %1246 = vmatpush1.bf16.msra.mxu1 %v4659_v38 }
  0xe7   :  { %3463 = vmatpush3.bf16.msra.mxu0 %v4667_v40  ;;  %1247 = vmatprep.subr.bf16.mxu1 %v4663_v39 }
  0xe8   :  { %3464 = vmatprep.subr.bf16.mxu0 %v5758_v18 }
  0xea   :  { %1248 = vmatpush1.bf16.msra.mxu1 %v4669_v41  ;;  %v434_v41 = vld [vmem:[#allocation12] sm:$0x7] }
  0xeb   :  { %3465 = vmatpush3.bf16.msra.mxu0 %v4674_v43  ;;  %1249 = vmatprep.subr.bf16.mxu1 %v4672_v42 }
  0xec   :  { %3466 = vmatprep.subr.bf16.mxu0 %v5758_v18 }
  0xee   :  { %1250 = vmatpush1.bf16.msra.mxu1 %v4679_v44 }
  0xef   :  { %3467 = vmatpush3.bf16.msra.mxu0 %v4685_v46  ;;  %1317 = vmatprep.subr.bf16.mxu1 %v4683_v45 }
  0xf0   :  { %3472 = vmatprep.subr.bf16.mxu0 %v5758_v18 }
 0x14c   :  { %v320_v15 = vpop.f32.mrb[0].mxu1  ;;  %v4816_v17 = vpop.f32.mrb[0].mxu0 }
 0x14d   :  { %v4819_v19 = vadd.f32 %v320_v15, %v4812_v13  ;;  %v322_v22 = vpop.f32.mrb[1].mxu1  ;;  %v4821_v30 = vpop.f32.mrb[1].mxu0 }
 0x14e   :  { %v4824_v50 = vadd.f32 %v322_v22, %v4814_v14  ;;  %v324_v8 = vpop.f32.mrb[2].mxu1  ;;  %v294_v0 = vpop.f32.mrb[2].mxu0 }
 0x14f   :  { %5808 = vst [vmem:[#allocation39_spill] sm:$0xff] %v4819_v19  ;;  %v4827_v18 = vadd.f32 %v324_v8, %v4812_v13  ;;  %v326_v45 = vpop.f32.mrb[3].mxu1  ;;  %v4830_v46 = vadd.f32 %v294_v0, %v4812_v13  ;;  %v296_v44 = vpop.f32.mrb[3].mxu0  ;;  %v4838_v19 = vrot.slane %v174_v11, %v186_v25 }
 0x150   :  { %5809 = vst [vmem:[#allocation40_spill] sm:$0xff] %v4824_v50  ;;  %v4833_v15 = vadd.f32 %v326_v45, %v4814_v14  ;;  %v4836_v9 = vadd.f32 %v296_v44, %v4814_v14 }
 0x151   :  { %5810 = vst [vmem:[#allocation41_spill] sm:$0xff] %v4827_v18  ;;  %5811 = vst [vmem:[#allocation42_spill] sm:$0xff] %v4830_v46 }
 0x152   :  { %5812 = vst [vmem:[#allocation43_spill] sm:$0xff] %v4833_v15  ;;  %5813 = vst [vmem:[#allocation44_spill] sm:$0xff] %v4836_v9 }
 0x154   :  { %v3394_v22 = vpop.f32.mrb[4].mxu1  ;;  %v300_v50 = vpop.f32.mrb[4].mxu0 }
 0x155   :  { %v4841_v42 = vadd.f32 %v3394_v22, %v4838_v19  ;;  %v4843_v8 = vpop.f32.mrb[5].mxu1  ;;  %v4846_v18 = vadd.f32 %v300_v50, %v4812_v13  ;;  %v302_v0 = vpop.f32.mrb[5].mxu0 }
 0x156   :  { %v3395_v46 = vpop.f32.mrb[6].mxu1  ;;  %v4849_v45 = vadd.f32 %v302_v0, %v4814_v14  ;;  %v304_v15 = vpop.f32.mrb[6].mxu0 }
 0x157   :  { %5814 = vst [vmem:[#allocation45_spill] sm:$0xff] %v4841_v42  ;;  %5815 = vst [vmem:[#allocation46_spill] sm:$0xff] %v4846_v18  ;;  %v4852_v44 = vadd.f32 %v3395_v46, %v4838_v19  ;;  %v366_v11 = vpop.f32.mrb[7].mxu1  ;;  %v4855_v9 = vadd.f32 %v304_v15, %v4812_v13  ;;  %v306_v22 = vpop.f32.mrb[7].mxu0 }
 0x158   :  { %5816 = vst [vmem:[#allocation47_spill] sm:$0xff] %v4849_v45  ;;  %v4858_v42 = vadd.f32 %v366_v11, %v4838_v19  ;;  %v4861_v50 = vadd.f32 %v306_v22, %v4814_v14 }
 0x159   :  { %5817 = vst [vmem:[#allocation48_spill] sm:$0xff] %v4852_v44  ;;  %5818 = vst [vmem:[#allocation49_spill] sm:$0xff] %v4855_v9 }
 0x15a   :  { %5819 = vst [vmem:[#allocation50_spill] sm:$0xff] %v4858_v42  ;;  %5820 = vst [vmem:[#allocation51_spill] sm:$0xff] %v4861_v50 }
 0x15c   :  { %v3398_v18 = vpop.f32.mrb[8].mxu1  ;;  %v310_v43 = vpop.f32.mrb[8].mxu0 }
 0x15d   :  { %v4864_v0 = vadd.f32 %v3398_v18, %v4838_v19  ;;  %v379_v45 = vpop.f32.mrb[9].mxu1  ;;  %v4867_v46 = vadd.f32 %v310_v43, %v4812_v13  ;;  %v312_v44 = vpop.f32.mrb[9].mxu0 }
 0x15e   :  { %v4870_v15 = vadd.f32 %v379_v45, %v4838_v19  ;;  %v3399_v9 = vpop.f32.mrb[10].mxu1  ;;  %v4873_v11 = vadd.f32 %v312_v44, %v4814_v14  ;;  %v314_v22 = vpop.f32.mrb[10].mxu0  ;;  %v4891_v44 = vrot.slane %v434_v41, %v182_v12 }
 0x15f   :  { %5821 = vst [vmem:[#allocation52_spill] sm:$0xff] %v4864_v0  ;;  %5822 = vst [vmem:[#allocation53_spill] sm:$0xff] %v4867_v46  ;;  %v4876_v50 = vadd.f32 %v3399_v9, %v4838_v19  ;;  %v382_v42 = vpop.f32.mrb[11].mxu1  ;;  %v4879_v18 = vadd.f32 %v314_v22, %v4812_v13  ;;  %v316_v0 = vpop.f32.mrb[11].mxu0  ;;  %v4889_v46 = vrot.slane %v434_v41, %v186_v25 }
 0x160   :  { %5823 = vst [vmem:[#allocation54_spill] sm:$0xff] %v4870_v15  ;;  %5824 = vst [vmem:[#allocation55_spill] sm:$0xff] %v4873_v11  ;;  %v4882_v43 = vadd.f32 %v382_v42, %v4838_v19  ;;  %v4885_v45 = vadd.f32 %v316_v0, %v4814_v14  ;;  %v4887_v15 = vrot.slane %v434_v41, %v178_v10 }
 0x161   :  { %5825 = vst [vmem:[#allocation56_spill] sm:$0xff] %v4876_v50  ;;  %5826 = vst [vmem:[#allocation57_spill] sm:$0xff] %v4879_v18 }
 0x162   :  { %5827 = vst [vmem:[#allocation58_spill] sm:$0xff] %v4882_v43  ;;  %5828 = vst [vmem:[#allocation59_spill] sm:$0xff] %v4885_v45 }
 0x164   :  { %v549_v11 = vpop.f32.mrb[12].mxu1  ;;  %v3406_v9 = vpop.f32.mrb[12].mxu0 }
 0x165   :  { %v4894_v50 = vadd.f32 %v549_v11, %v4887_v15  ;;  %v551_v22 = vpop.f32.mrb[13].mxu1  ;;  %v4897_v18 = vadd.f32 %v3406_v9, %v4889_v46  ;;  %v622_v42 = vpop.f32.mrb[13].mxu0 }
 0x166   :  { %v4900_v43 = vadd.f32 %v551_v22, %v4891_v44  ;;  %v553_v0 = vpop.f32.mrb[14].mxu1  ;;  %v4903_v10 = vadd.f32 %v622_v42, %v4889_v46  ;;  %v3407_v25 = vpop.f32.mrb[14].mxu0 }
 0x167   :  { %5829 = vst [vmem:[#allocation60_spill] sm:$0xff] %v4894_v50  ;;  %5830 = vst [vmem:[#allocation61_spill] sm:$0xff] %v4897_v18  ;;  %v4906_v41 = vadd.f32 %v553_v0, %v4887_v15  ;;  %v555_v12 = vpop.f32.mrb[15].mxu1  ;;  %v4909_v11 = vadd.f32 %v3407_v25, %v4889_v46  ;;  %v625_v50 = vpop.f32.mrb[15].mxu0 }
 0x168   :  { %5831 = vst [vmem:[#allocation62_spill] sm:$0xff] %v4900_v43  ;;  %5832 = vst [vmem:[#allocation63_spill] sm:$0xff] %v4903_v10  ;;  %v4912_v9 = vadd.f32 %v555_v12, %v4891_v44  ;;  %v4915_v18 = vadd.f32 %v625_v50, %v4889_v46 }
 0x169   :  { %5833 = vst [vmem:[#allocation64_spill] sm:$0xff] %v4906_v41  ;;  %5834 = vst [vmem:[#allocation65_spill] sm:$0xff] %v4909_v11 }
 0x16a   :  { %5835 = vst [vmem:[#allocation66_spill] sm:$0xff] %v4912_v9  ;;  %5836 = vst [vmem:[#allocation67_spill] sm:$0xff] %v4915_v18 }
 0x16c   :  { %v559_v22 = vpop.f32.mrb[16].mxu1  ;;  %v3410_v43 = vpop.f32.mrb[16].mxu0 }
 0x16d   :  { %v4918_v42 = vadd.f32 %v559_v22, %v4887_v15  ;;  %v561_v10 = vpop.f32.mrb[17].mxu1  ;;  %v4921_v0 = vadd.f32 %v3410_v43, %v4889_v46  ;;  %v638_v41 = vpop.f32.mrb[17].mxu0 }
 0x16e   :  { %v4924_v25 = vadd.f32 %v561_v10, %v4891_v44  ;;  %v563_v45 = vpop.f32.mrb[18].mxu1  ;;  %v4927_v12 = vadd.f32 %v638_v41, %v4889_v46  ;;  %v4929_v9 = vpop.f32.mrb[18].mxu0 }
 0x16f   :  { %5837 = vst [vmem:[#allocation68_spill] sm:$0xff] %v4918_v42  ;;  %5838 = vst [vmem:[#allocation69_spill] sm:$0xff] %v4921_v0  ;;  %v4932_v50 = vadd.f32 %v563_v45, %v4887_v15  ;;  %v565_v18 = vpop.f32.mrb[19].mxu1  ;;  %v641_v22 = vpop.f32.mrb[19].mxu0 }
 0x170   :  { %5839 = vst [vmem:[#allocation70_spill] sm:$0xff] %v4924_v25  ;;  %5840 = vst [vmem:[#allocation71_spill] sm:$0xff] %v4927_v12  ;;  %v4935_v42 = vadd.f32 %v565_v18, %v4891_v44  ;;  %v4938_v43 = vadd.f32 %v641_v22, %v4889_v46 }
 0x171   :  { %5841 = vst [vmem:[#allocation72_spill] sm:$0xff] %v4932_v50 }
 0x172   :  { %5842 = vst [vmem:[#allocation73_spill] sm:$0xff] %v4935_v42  ;;  %5843 = vst [vmem:[#allocation74_spill] sm:$0xff] %v4938_v43 }
 0x174   :  { %v569_v11 = vpop.f32.mrb[20].mxu1 }
 0x175   :  { %v4941_v10 = vadd.f32 %v569_v11, %v4887_v15  ;;  %v571_v25 = vpop.f32.mrb[21].mxu1 }
 0x176   :  { %v4944_v41 = vadd.f32 %v571_v25, %v4891_v44  ;;  %v573_v12 = vpop.f32.mrb[22].mxu1  ;;  %v291_v25 = vadd.f32 %v4816_v17, %v4812_v13  ;;  %v4965_v13 = vld [vmem:[%s5746_s6] ss:$0 sm:$0xff] }
 0x177   :  { %5844 = vst [vmem:[#allocation75_spill] sm:$0xff] %v4941_v10  ;;  %v4947_v45 = vadd.f32 %v573_v12, %v4887_v15  ;;  %v575_v50 = vpop.f32.mrb[23].mxu1  ;;  %v293_v12 = vadd.f32 %v4821_v30, %v4814_v14 }
 0x178   :  { %5845 = vst [vmem:[#allocation76_spill] sm:$0xff] %v4944_v41  ;;  %v4950_v0 = vadd.f32 %v575_v50, %v4891_v44 }
 0x179   :  { %5846 = vst [vmem:[#allocation77_spill] sm:$0xff] %v4947_v45 }
 0x17a   :  { %5847 = vst [vmem:[#allocation78_spill] sm:$0xff] %v4950_v0 }
 0x17c   :  { %v579_v18 = vpop.f32.mrb[24].mxu1 }
 0x17d   :  { %v4953_v22 = vadd.f32 %v579_v18, %v4887_v15  ;;  %v581_v42 = vpop.f32.mrb[25].mxu1 }
 0x17e   :  { %v4956_v11 = vadd.f32 %v581_v42, %v4891_v44  ;;  %v583_v10 = vpop.f32.mrb[26].mxu1 }
 0x17f   :  { %5848 = vst [vmem:[#allocation79_spill] sm:$0xff] %v4953_v22  ;;  %v585_v43 = vpop.f32.mrb[27].mxu1  ;;  %v584_v30 = vadd.f32 %v583_v10, %v4887_v15 }
 0x180   :  { %5849 = vst [vmem:[#allocation80_spill] sm:$0xff] %v4956_v11 }
 0x184   :  { %v920_v41 = vpop.f32.mrb[28].mxu1 }
 0x185   :  { %v1189_v45 = vadd.f32 %v920_v41, %v291_v25  ;;  %v922_v50 = vpop.f32.mrb[29].mxu1  ;;  %v961_v0 = vpop.f32.mrb[20].mxu0 }
 0x186   :  { %v1196_v39 = vadd.f32 %v922_v50, %v293_v12  ;;  %v924_v40 = vpop.f32.mrb[30].mxu1  ;;  %v3430_v18 = vpop.f32.mrb[21].mxu0  ;;  %v1203_v14 = vadd.f32 %v4965_v13, %v961_v0 }
 0x187   :  { %v3165_v22 = vmul.f32 -1.442695, %v1189_v45  ;;  %v925_v38 = vpop.f32.mrb[31].mxu1  ;;  %v964_v36 = vpop.f32.mrb[22].mxu0 }
 0x188   :  { %v3431_v42 = vpop.f32.mrb[23].mxu0  ;;  %v3166_v11 = vmul.f32 -1.442695, %v1196_v39  ;;  %v364_v38 = vadd.f32 %v4843_v8, %v4838_v19 }
 0x189   :  { %3897 = vpow2.f32 %v3165_v22 }
 0x18a   :  { %3899 = vpow2.f32 %v3166_v11 }
 0x193   :  { %v3898_v37 = vpop.eup %3897 }
 0x194   :  { %v1193_v35 = vadd.f32 1.0, %v3898_v37  ;;  %v3900_v17 = vpop.eup %3899  ;;  %v586_v37 = vadd.f32 %v585_v43, %v4891_v44 }
 0x195   :  { %v1200_v39 = vadd.f32 1.0, %v3900_v17 }
 0x196   :  { %3901 = vrcp.f32 %v1193_v35 }
 0x1a0   :  { %v3902_v40 = vpop.eup %3901 }
 0x1a1   :  { %v1204_v36 = vmul.f32 %v3902_v40, %v1203_v14 }
 0x1a3   :  { %v1205_v41 = vadd.f32 %v1204_v36, %v364_v38  ;;  %v4982_v36 = vld [vmem:[%s5747_s7] ss:$0 sm:$0xff] }
 0x1a4   :  { %v1130_v35 = vpop.f32.mrb[32].mxu1 }
 0x1a5   :  { %3903 = vtanh.f32 %v1205_v41  ;;  %v1210_v45 = vadd.f32 %v1130_v35, %v584_v30  ;;  %v1132_v22 = vpop.f32.mrb[33].mxu1  ;;  %v1171_v11 = vpop.f32.mrb[24].mxu0  ;;  %v5850_v30 = vmov 0.0  }
 0x1a6   :  { %v1217_v25 = vadd.f32 %v1132_v22, %v586_v37  ;;  %v1134_v12 = vpop.f32.mrb[34].mxu1  ;;  %v3450_v0 = vpop.f32.mrb[25].mxu0  ;;  %3905 = vrcp.f32 %v1200_v39  ;;  %v5851_v39 = vmov 0   ;;  %v1224_v41 = vadd.f32 %v4982_v36, %v1171_v11 }
 0x1a7   :  { %v3167_v50 = vmul.f32 -1.442695, %v1210_v45  ;;  %v1135_v18 = vpop.f32.mrb[35].mxu1  ;;  %v1174_v42 = vpop.f32.mrb[26].mxu0  ;;  %v650_v45 = vadd.f32 %v4929_v9, %v4889_v46 }
 0x1a8   :  { %v3451_v19 = vpop.f32.mrb[27].mxu0  ;;  %v3168_v14 = vmul.f32 -1.442695, %v1217_v25 }
 0x1a9   :  { %3907 = vpow2.f32 %v3167_v50  ;;  %v5864_v19 = vld [vmem:[#allocation42_spill] sm:$0xff] }
 0x1aa   :  { %3909 = vpow2.f32 %v3168_v14  ;;  %v5865_v14 = vld [vmem:[#allocation44_spill] sm:$0xff] }
 0x1af   :  { %v3904_v8 = vpop.eup %3903 }
 0x1b0   :  { %v1207_v15 = vsub.f32 0.0, %v3904_v8  ;;  %v3906_v10 = vpop.eup %3905 }
 0x1b2   :  { %v1208_v17 = vmul.f32 %v3906_v10, %v1207_v15 }
 0x1b3   :  { %v3908_v44 = vpop.eup %3907 }
 0x1b4   :  { %v1214_v43 = vadd.f32 1.0, %v3908_v44  ;;  %v4972_v40 = vadd.f32 %v3904_v8, %v1208_v17  ;;  %v3910_v37 = vpop.eup %3909 }
 0x1b5   :  { %v1221_v11 = vadd.f32 1.0, %v3910_v37 }
 0x1b6   :  { %3911 = vrcp.f32 %v1214_v43  ;;  %1231 = vst [vmem:[#allocation17] sm:$0xff] %v4972_v40  ;;  %v1234_v38 = vpack.c.bf16 %v4972_v40, %v4972_v40 }
 0x1b8   :  { %1268 = vmatmul.mubr.bf16.vlgmr.msra.gmra.mrb[36].mxu1 %v1234_v38  ;;  %3469 = vmatmul.mubr.bf16.vlgmr.msra.gmra.mrb[28].mxu0 %v1234_v38 }
 0x1b9   :  { %1318 = vmatpush1.bf16.msra.mxu1 %v4691_v47  ;;  %3473 = vmatpush3.bf16.msra.mxu0 %v4696_v49 }
 0x1ba   :  { %1319 = vmatprep.subr.bf16.mxu1 %v4694_v48  ;;  %3474 = vmatprep.subr.bf16.mxu0 %v5850_v30 }
 0x1bb   :  { %1349 = vmatprep.mubr.bf16.mxu1 %v5851_v39  ;;  %3488 = vmatprep.mubr.msk.bf16.mxu0 %vm4375_vm1, %v5850_v30 }
 0x1bd   :  { %1320 = vmatpush1.bf16.msra.mxu1 %v4703_v51  ;;  %3475 = vmatpush3.bf16.msra.mxu0 %v4709_v53 }
 0x1be   :  { %1321 = vmatprep.subr.bf16.mxu1 %v4706_v52  ;;  %3476 = vmatprep.subr.bf16.mxu0 %v5850_v30 }
 0x1c0   :  { %v3912_v35 = vpop.eup %3911 }
 0x1c1   :  { %v1225_v22 = vmul.f32 %v3912_v35, %v1224_v41  ;;  %1322 = vmatpush1.bf16.msra.mxu1 %v4716_v54  ;;  %3477 = vmatpush3.bf16.msra.mxu0 %v4722_v56 }
 0x1c2   :  { %1323 = vmatprep.subr.bf16.mxu1 %v4719_v55  ;;  %3478 = vmatprep.subr.bf16.mxu0 %v5850_v30 }
 0x1c3   :  { %v1226_v25 = vadd.f32 %v1225_v22, %v650_v45 }
 0x1c5   :  { %3913 = vtanh.f32 %v1226_v25  ;;  %1324 = vmatpush1.bf16.msra.mxu1 %v4726_v57  ;;  %3479 = vmatpush3.bf16.msra.mxu0 %v4732_v59 }
 0x1c6   :  { %1325 = vmatprep.subr.bf16.mxu1 %v4729_v58  ;;  %3480 = vmatprep.subr.bf16.mxu0 %v5850_v30  ;;  %3915 = vrcp.f32 %v1221_v11 }
 0x1c9   :  { %1326 = vmatpush1.bf16.msra.mxu1 %v4736_v60  ;;  %3481 = vmatpush3.bf16.msra.mxu0 %v4742_v62 }
 0x1ca   :  { %1327 = vmatprep.subr.bf16.mxu1 %v4739_v61  ;;  %3482 = vmatprep.subr.bf16.mxu0 %v5850_v30 }
 0x1cd   :  { %1328 = vmatpush1.bf16.msra.mxu1 %v4746_v63  ;;  %3483 = vmatpush3.bf16.msra.mxu0 %v4752_v2 }
 0x1ce   :  { %1329 = vmatprep.subr.bf16.mxu1 %v4749_v1  ;;  %3484 = vmatprep.subr.bf16.mxu0 %v5850_v30 }
 0x1cf   :  { %v3914_v46 = vpop.eup %3913 }
 0x1d0   :  { %v1228_v9 = vsub.f32 0.0, %v3914_v46  ;;  %v3916_v12 = vpop.eup %3915 }
 0x1d1   :  { %1330 = vmatpush1.bf16.msra.mxu1 %v4756_v3  ;;  %3485 = vmatpush3.bf16.msra.mxu0 %v4762_v5 }
 0x1d2   :  { %1331 = vmatprep.subr.bf16.mxu1 %v4759_v4  ;;  %3486 = vmatprep.subr.bf16.mxu0 %v5850_v30  ;;  %v1229_v0 = vmul.f32 %v3916_v12, %v1228_v9  ;;  %v5866_v12 = vld [vmem:[#allocation50_spill] sm:$0xff] }
 0x1d4   :  { %v5016_v50 = vadd.f32 %v3914_v46, %v1229_v0 }
 0x1d5   :  { %1332 = vmatpush1.bf16.msra.mxu1 %v4766_v6  ;;  %3487 = vmatpush3.bf16.msra.mxu0 %v4770_v7 }
 0x1d6   :  { %1233 = vst [vmem:[#allocation18 + $0x38] sm:$0xff] %v5016_v50  ;;  %v1316_v18 = vpack.c.bf16 %v5016_v50, %v5016_v50  ;;  %1457 = vmatprep.subr.bf16.mxu1 %v4582_v16  ;;  %3492 = vmatprep.subr.bf16.mxu0 %v5850_v30  ;;  %v5852_v16 = vld [vmem:[#allocation27_spill] sm:$0xff] }
 0x1d8   :  { %1350 = vmatmul.mubr.bf16.vlgmr.msra.gmra.mrb[40].mxu1 %v1316_v18  ;;  %3489 = vmatmul.mubr.bf16.vlgmr.msra.gmra.mrb[32].mxu0 %v1316_v18 }
 0x1d9   :  { %1458 = vmatpush1.bf16.msra.mxu1 %v4594_v20  ;;  %3493 = vmatpush3.bf16.msra.mxu0 %v4601_v23  ;;  %v5853_v20 = vld [vmem:[#allocation29_spill] sm:$0xff]  ;;  %v5855_v23 = vld [vmem:[#allocation30_spill] sm:$0xff] }
 0x1da   :  { %1459 = vmatprep.subr.bf16.mxu1 %v4596_v21  ;;  %3494 = vmatprep.subr.bf16.mxu0 %v5850_v30  ;;  %v5854_v21 = vld [vmem:[#allocation28_spill] sm:$0xff] }
 0x1db   :  { %1489 = vmatprep.mubr.bf16.mxu1 %v5851_v39  ;;  %3508 = vmatprep.mubr.msk.bf16.mxu0 %vm4375_vm1, %v5850_v30 }
 0x1dd   :  { %1460 = vmatpush1.bf16.msra.mxu1 %v4604_v24  ;;  %3495 = vmatpush3.bf16.msra.mxu0 %v4616_v27  ;;  %v5856_v24 = vld [vmem:[#allocation32_spill] sm:$0xff]  ;;  %v5858_v27 = vld [vmem:[#allocation33_spill] sm:$0xff] }
 0x1de   :  { %1461 = vmatprep.subr.bf16.mxu1 %v4613_v26  ;;  %3496 = vmatprep.subr.bf16.mxu0 %v5850_v30  ;;  %v5857_v26 = vld [vmem:[#allocation31_spill] sm:$0xff] }
 0x1e1   :  { %1462 = vmatpush1.bf16.msra.mxu1 %v4618_v28  ;;  %3497 = vmatpush3.bf16.msra.mxu0 %v4630_v31  ;;  %v5859_v28 = vld [vmem:[#allocation35_spill] sm:$0xff]  ;;  %v5861_v31 = vld [vmem:[#allocation36_spill] sm:$0xff] }
 0x1e2   :  { %1463 = vmatprep.subr.bf16.mxu1 %v4622_v29  ;;  %3498 = vmatprep.subr.bf16.mxu0 %v5850_v30  ;;  %v5860_v29 = vld [vmem:[#allocation34_spill] sm:$0xff] }
 0x1e5   :  { %1464 = vmatpush1.bf16.msra.mxu1 %v4636_v32  ;;  %3499 = vmatpush3.bf16.msra.mxu0 %v4643_v34  ;;  %v5862_v32 = vld [vmem:[#allocation38_spill] sm:$0xff] }
 0x1e6   :  { %1465 = vmatprep.subr.bf16.mxu1 %v4639_v33  ;;  %3500 = vmatprep.subr.bf16.mxu0 %v5850_v30  ;;  %v5863_v33 = vld [vmem:[#allocation37_spill] sm:$0xff] }
 0x1e9   :  { %1466 = vmatpush1.bf16.msra.mxu1 %v5852_v16  ;;  %3501 = vmatpush3.bf16.msra.mxu0 %v5853_v20 }
 0x1ea   :  { %1467 = vmatprep.subr.bf16.mxu1 %v5854_v21  ;;  %3502 = vmatprep.subr.bf16.mxu0 %v5850_v30  ;;  %v5867_v21 = vld [vmem:[#allocation79_spill] sm:$0xff] }
 0x1ed   :  { %1468 = vmatpush1.bf16.msra.mxu1 %v5855_v23  ;;  %3503 = vmatpush3.bf16.msra.mxu0 %v5856_v24 }
 0x1ee   :  { %1469 = vmatprep.subr.bf16.mxu1 %v5857_v26  ;;  %3504 = vmatprep.subr.bf16.mxu0 %v5850_v30 }
 0x1f1   :  { %1470 = vmatpush1.bf16.msra.mxu1 %v5858_v27  ;;  %3505 = vmatpush3.bf16.msra.mxu0 %v5859_v28  ;;  %v5868_v27 = vld [vmem:[#allocation80_spill] sm:$0xff] }
 0x1f2   :  { %1471 = vmatprep.subr.bf16.mxu1 %v5860_v29  ;;  %3506 = vmatprep.subr.bf16.mxu0 %v5850_v30 }
 0x1f5   :  { %1472 = vmatpush1.bf16.msra.mxu1 %v5861_v31  ;;  %3507 = vmatpush3.bf16.msra.mxu0 %v5862_v32 }
 0x1f6   :  { %1539 = vmatprep.subr.bf16.mxu1 %v5863_v33  ;;  %3512 = vmatprep.subr.bf16.mxu0 %v5850_v30 }
 0x28b   :  { %v1269_v34 = vpop.f32.mrb[36].mxu1  ;;  %v1310_v42 = vpop.f32.mrb[28].mxu0 }
 0x28c   :  { %v1410_v8 = vadd.f32 %v1269_v34, %v5864_v19  ;;  %v1271_v15 = vpop.f32.mrb[37].mxu1  ;;  %v3470_v10 = vpop.f32.mrb[29].mxu0  ;;  %v1424_v25 = vadd.f32 %v4965_v13, %v1310_v42 }
 0x28d   :  { %v1417_v17 = vadd.f32 %v1271_v15, %v5865_v14  ;;  %v1273_v44 = vpop.f32.mrb[38].mxu1  ;;  %v1313_v43 = vpop.f32.mrb[30].mxu0 }
 0x28e   :  { %v3169_v38 = vmul.f32 -1.442695, %v1410_v8  ;;  %v1274_v41 = vpop.f32.mrb[39].mxu1  ;;  %v3471_v37 = vpop.f32.mrb[31].mxu0 }
 0x28f   :  { %v3170_v35 = vmul.f32 -1.442695, %v1417_v17 }
 0x290   :  { %3917 = vpow2.f32 %v3169_v38 }
 0x291   :  { %3919 = vpow2.f32 %v3170_v35  ;;  %v5160_v35 = vld [vmem:[#allocation14 + $0x60] ss:$12 sps:$4 sm:$0xff]  }
 0x29a   :  { %v3918_v45 = vpop.eup %3917 }
 0x29b   :  { %v1414_v22 = vadd.f32 1.0, %v3918_v45  ;;  %v3920_v11 = vpop.eup %3919  ;;  %v5163_v45 = vld [vmem:[#allocation14 + $0x68] ss:$12 sps:$4 sm:$0xff]  }
 0x29c   :  { %v1421_v18 = vadd.f32 1.0, %v3920_v11  ;;  %v5170_v11 = vld [vmem:[#allocation14 + $0x78] ss:$12 sps:$4 sm:$0xff]  }
 0x29d   :  { %3921 = vrcp.f32 %v1414_v22  ;;  %v5166_v22 = vld [vmem:[#allocation14 + $0x7c] ss:$12 sps:$4 sm:$0xff]   ;;  %5871 = vst [vmem:[#allocation29_spill] sm:$0xff] %v5170_v11 }
 0x29e   :  { %5870 = vst [vmem:[#allocation27_spill] sm:$0xff] %v5166_v22 }
 0x2a7   :  { %v3922_v46 = vpop.eup %3921 }
 0x2a8   :  { %v1425_v9 = vmul.f32 %v3922_v46, %v1424_v25  ;;  %v5173_v25 = vld [vmem:[#allocation14 + $0x80] ss:$12 sps:$4 sm:$0xff]  }
 0x2a9   :  { %5872 = vst [vmem:[#allocation28_spill] sm:$0xff] %v5173_v25  ;;  %v5176_v46 = vld [vmem:[#allocation14 + $0x94] ss:$12 sps:$4 sm:$0xff]  }
 0x2aa   :  { %v1426_v0 = vadd.f32 %v1425_v9, %v5866_v12  ;;  %5873 = vst [vmem:[#allocation30_spill] sm:$0xff] %v5176_v46  ;;  %v5180_v9 = vld [vmem:[#allocation14 + $0x90] ss:$12 sps:$4 sm:$0xff]   ;;  %v5183_v12 = vld [vmem:[#allocation14 + $0x98] ss:$12 sps:$4 sm:$0xff]  }
 0x2ab   :  { %v1351_v16 = vpop.f32.mrb[40].mxu1  ;;  %v1392_v20 = vpop.f32.mrb[32].mxu0  ;;  %5874 = vst [vmem:[#allocation32_spill] sm:$0xff] %v5180_v9  ;;  %5875 = vst [vmem:[#allocation31_spill] sm:$0xff] %v5183_v12 }
 0x2ac   :  { %3923 = vtanh.f32 %v1426_v0  ;;  %v1431_v23 = vadd.f32 %v1351_v16, %v5867_v21  ;;  %v1353_v24 = vpop.f32.mrb[41].mxu1  ;;  %v3490_v26 = vpop.f32.mrb[33].mxu0  ;;  %v5186_v0 = vld [vmem:[#allocation14 + $0xac] ss:$12 sps:$4 sm:$0xff]   ;;  %v5878_v21 = vld [vmem:[#allocation46_spill] sm:$0xff] }
 0x2ad   :  { %v1438_v28 = vadd.f32 %v1353_v24, %v5868_v27  ;;  %v1355_v29 = vpop.f32.mrb[42].mxu1  ;;  %v1395_v31 = vpop.f32.mrb[34].mxu0  ;;  %3925 = vrcp.f32 %v1421_v18  ;;  %5876 = vst [vmem:[#allocation33_spill] sm:$0xff] %v5186_v0  ;;  %v5190_v18 = vld [vmem:[#allocation14 + $0xa8] ss:$12 sps:$4 sm:$0xff]  }
 0x2ae   :  { %v3171_v34 = vmul.f32 -1.442695, %v1431_v23  ;;  %v1356_v19 = vpop.f32.mrb[43].mxu1  ;;  %v3491_v42 = vpop.f32.mrb[35].mxu0  ;;  %5877 = vst [vmem:[#allocation35_spill] sm:$0xff] %v5190_v18  ;;  %v5879_v27 = vld [vmem:[#allocation47_spill] sm:$0xff] }
 0x2af   :  { %v3172_v14 = vmul.f32 -1.442695, %v1438_v28 }
 0x2b0   :  { %3927 = vpow2.f32 %v3171_v34 }
 0x2b1   :  { %3929 = vpow2.f32 %v3172_v14 }
 0x2b6   :  { %v3924_v8 = vpop.eup %3923 }
 0x2b7   :  { %v1428_v15 = vsub.f32 %v4972_v40, %v3924_v8  ;;  %v3926_v10 = vpop.eup %3925 }
 0x2b9   :  { %v1429_v17 = vmul.f32 %v3926_v10, %v1428_v15 }
 0x2ba   :  { %v3928_v44 = vpop.eup %3927 }
 0x2bb   :  { %v1435_v43 = vadd.f32 1.0, %v3928_v44  ;;  %v5067_v38 = vadd.f32 %v3924_v8, %v1429_v17  ;;  %v5880_v44 = vld [vmem:[#allocation45_spill] sm:$0xff] }
 0x2bd   :  { %3931 = vrcp.f32 %v1435_v43  ;;  %1453 = vst [vmem:[#allocation17 + $0x8] sm:$0xff] %v5067_v38  ;;  %v1456_v41 = vpack.c.bf16 %v5067_v38, %v5067_v38 }
 0x2bf   :  { %1490 = vmatmul.mubr.bf16.vlgmr.msra.gmra.mrb[44].mxu1 %v1456_v41  ;;  %3509 = vmatmul.mubr.bf16.vlgmr.msra.gmra.mrb[36].mxu0 %v1456_v41 }
 0x2c0   :  { %1540 = vmatpush1.bf16.msra.mxu1 %v4691_v47  ;;  %3513 = vmatpush3.bf16.msra.mxu0 %v4696_v49  ;;  %v3930_v47 = vpop.eup %3929  ;;  %v1445_v49 = vadd.f32 %v4982_v36, %v1392_v20 }
 0x2c1   :  { %1541 = vmatprep.subr.bf16.mxu1 %v4694_v48  ;;  %3514 = vmatprep.subr.bf16.mxu0 %v5850_v30 }
 0x2c2   :  { %1571 = vmatprep.mubr.bf16.mxu1 %v5851_v39  ;;  %3528 = vmatprep.mubr.msk.bf16.mxu0 %vm4375_vm1, %v5850_v30 }
 0x2c4   :  { %1542 = vmatpush1.bf16.msra.mxu1 %v4703_v51  ;;  %3515 = vmatpush3.bf16.msra.mxu0 %v4709_v53  ;;  %v5869_v51 = vld [vmem:[#allocation69_spill] sm:$0xff]  ;;  %v1442_v53 = vadd.f32 1.0, %v3930_v47 }
 0x2c5   :  { %1543 = vmatprep.subr.bf16.mxu1 %v4706_v52  ;;  %3516 = vmatprep.subr.bf16.mxu0 %v5850_v30 }
 0x2c7   :  { %v3932_v40 = vpop.eup %3931 }
 0x2c8   :  { %v1446_v48 = vmul.f32 %v3932_v40, %v1445_v49  ;;  %1544 = vmatpush1.bf16.msra.mxu1 %v4716_v54  ;;  %3517 = vmatpush3.bf16.msra.mxu0 %v4722_v56  ;;  %v5881_v40 = vld [vmem:[#allocation77_spill] sm:$0xff] }
 0x2c9   :  { %1545 = vmatprep.subr.bf16.mxu1 %v4719_v55  ;;  %3518 = vmatprep.subr.bf16.mxu0 %v5850_v30 }
 0x2ca   :  { %v1447_v37 = vadd.f32 %v1446_v48, %v5869_v51 }
 0x2cc   :  { %3933 = vtanh.f32 %v1447_v37  ;;  %1546 = vmatpush1.bf16.msra.mxu1 %v4726_v57  ;;  %3519 = vmatpush3.bf16.msra.mxu0 %v4732_v59  ;;  %v5113_v59 = vld [vmem:[#allocation14 + $0x4] ss:$12 sps:$4 sm:$0xff]  }
 0x2cd   :  { %1547 = vmatprep.subr.bf16.mxu1 %v4729_v58  ;;  %3520 = vmatprep.subr.bf16.mxu0 %v5850_v30  ;;  %3935 = vrcp.f32 %v1442_v53  ;;  %v5882_v53 = vld [vmem:[#allocation78_spill] sm:$0xff] }
 0x2d0   :  { %1548 = vmatpush1.bf16.msra.mxu1 %v4736_v60  ;;  %3521 = vmatpush3.bf16.msra.mxu0 %v4742_v62  ;;  %v5117_v60 = vld [vmem:[#allocation14] ss:$12 sps:$4 sm:$0xff]   ;;  %v5123_v62 = vld [vmem:[#allocation14 + $0x1c] ss:$12 sps:$4 sm:$0xff]  }
 0x2d1   :  { %1549 = vmatprep.subr.bf16.mxu1 %v4739_v61  ;;  %3522 = vmatprep.subr.bf16.mxu0 %v5850_v30  ;;  %v5120_v61 = vld [vmem:[#allocation14 + $0x8] ss:$12 sps:$4 sm:$0xff]  }
 0x2d4   :  { %1550 = vmatpush1.bf16.msra.mxu1 %v4746_v63  ;;  %3523 = vmatpush3.bf16.msra.mxu0 %v4752_v2  ;;  %v5130_v63 = vld [vmem:[#allocation14 + $0x18] ss:$12 sps:$4 sm:$0xff]   ;;  %v5136_v2 = vld [vmem:[#allocation14 + $0x34] ss:$12 sps:$4 sm:$0xff]  }
 0x2d5   :  { %1551 = vmatprep.subr.bf16.mxu1 %v4749_v1  ;;  %3524 = vmatprep.subr.bf16.mxu0 %v5850_v30  ;;  %v5133_v1 = vld [vmem:[#allocation14 + $0x20] ss:$12 sps:$4 sm:$0xff]  }
 0x2d6   :  { %v3934_v52 = vpop.eup %3933 }
 0x2d7   :  { %v1449_v54 = vsub.f32 %v5016_v50, %v3934_v52  ;;  %v3936_v55 = vpop.eup %3935  ;;  %v5156_v50 = vld [vmem:[#allocation14 + $0x64] ss:$12 sps:$4 sm:$0xff]  }
 0x2d8   :  { %1552 = vmatpush1.bf16.msra.mxu1 %v4756_v3  ;;  %3525 = vmatpush3.bf16.msra.mxu0 %v4762_v5  ;;  %v5140_v3 = vld [vmem:[#allocation14 + $0x30] ss:$12 sps:$4 sm:$0xff]   ;;  %v5146_v5 = vld [vmem:[#allocation14 + $0x4c] ss:$12 sps:$4 sm:$0xff]  }
 0x2d9   :  { %1553 = vmatprep.subr.bf16.mxu1 %v4759_v4  ;;  %3526 = vmatprep.subr.bf16.mxu0 %v5850_v30  ;;  %v1450_v56 = vmul.f32 %v3936_v55, %v1449_v54  ;;  %v5143_v4 = vld [vmem:[#allocation14 + $0x38] ss:$12 sps:$4 sm:$0xff]  }
 0x2db   :  { %v5106_v57 = vadd.f32 %v3934_v52, %v1450_v56 }
 0x2dc   :  { %1554 = vmatpush1.bf16.msra.mxu1 %v4766_v6  ;;  %3527 = vmatpush3.bf16.msra.mxu0 %v4770_v7  ;;  %v5150_v6 = vld [vmem:[#allocation14 + $0x48] ss:$12 sps:$4 sm:$0xff]   ;;  %v5153_v7 = vld [vmem:[#allocation14 + $0x50] ss:$12 sps:$4 sm:$0xff]  }
 0x2dd   :  { %1455 = vst [vmem:[#allocation18 + $0x30] sm:$0xff] %v5106_v57  ;;  %v1538_v58 = vpack.c.bf16 %v5106_v57, %v5106_v57  ;;  %1679 = vmatprep.subr.bf16.mxu1 %v5113_v59  ;;  %3532 = vmatprep.subr.bf16.mxu0 %v5850_v30 }
 0x2df   :  { %1572 = vmatmul.mubr.bf16.vlgmr.msra.gmra.mrb[48].mxu1 %v1538_v58  ;;  %3529 = vmatmul.mubr.bf16.vlgmr.msra.gmra.mrb[40].mxu0 %v1538_v58 }
 0x2e0   :  { %1680 = vmatpush1.bf16.msra.mxu1 %v5117_v60  ;;  %3533 = vmatpush3.bf16.msra.mxu0 %v5120_v61 }
 0x2e1   :  { %1681 = vmatprep.subr.bf16.mxu1 %v5123_v62  ;;  %3534 = vmatprep.subr.bf16.mxu0 %v5850_v30 }
 0x2e2   :  { %1711 = vmatprep.mubr.bf16.mxu1 %v5851_v39  ;;  %3548 = vmatprep.mubr.msk.bf16.mxu0 %vm4375_vm1, %v5850_v30 }
 0x2e4   :  { %1682 = vmatpush1.bf16.msra.mxu1 %v5130_v63  ;;  %3535 = vmatpush3.bf16.msra.mxu0 %v5133_v1 }
 0x2e5   :  { %1683 = vmatprep.subr.bf16.mxu1 %v5136_v2  ;;  %3536 = vmatprep.subr.bf16.mxu0 %v5850_v30 }
 0x2e8   :  { %1684 = vmatpush1.bf16.msra.mxu1 %v5140_v3  ;;  %3537 = vmatpush3.bf16.msra.mxu0 %v5143_v4 }
 0x2e9   :  { %1685 = vmatprep.subr.bf16.mxu1 %v5146_v5  ;;  %3538 = vmatprep.subr.bf16.mxu0 %v5850_v30 }
 0x2ec   :  { %1686 = vmatpush1.bf16.msra.mxu1 %v5150_v6  ;;  %3539 = vmatpush3.bf16.msra.mxu0 %v5153_v7 }
 0x2ed   :  { %1687 = vmatprep.subr.bf16.mxu1 %v5156_v50  ;;  %3540 = vmatprep.subr.bf16.mxu0 %v5850_v30 }
 0x2f0   :  { %1688 = vmatpush1.bf16.msra.mxu1 %v5160_v35  ;;  %3541 = vmatpush3.bf16.msra.mxu0 %v5163_v45 }
 0x2f1   :  { %1689 = vmatprep.subr.bf16.mxu1 %v5166_v22  ;;  %3542 = vmatprep.subr.bf16.mxu0 %v5850_v30 }
 0x2f4   :  { %1690 = vmatpush1.bf16.msra.mxu1 %v5170_v11  ;;  %3543 = vmatpush3.bf16.msra.mxu0 %v5173_v25 }
 0x2f5   :  { %1691 = vmatprep.subr.bf16.mxu1 %v5176_v46  ;;  %3544 = vmatprep.subr.bf16.mxu0 %v5850_v30 }
 0x2f8   :  { %1692 = vmatpush1.bf16.msra.mxu1 %v5180_v9  ;;  %3545 = vmatpush3.bf16.msra.mxu0 %v5183_v12 }
 0x2f9   :  { %1693 = vmatprep.subr.bf16.mxu1 %v5186_v0  ;;  %3546 = vmatprep.subr.bf16.mxu0 %v5850_v30 }
 0x2fc   :  { %1694 = vmatpush1.bf16.msra.mxu1 %v5190_v18  ;;  %3547 = vmatpush3.bf16.msra.mxu0 %v5862_v32 }
 0x2fd   :  { %1761 = vmatprep.subr.bf16.mxu1 %v5863_v33  ;;  %3552 = vmatprep.subr.bf16.mxu0 %v5850_v30 }
 0x392   :  { %v1491_v16 = vpop.f32.mrb[44].mxu1  ;;  %v1532_v20 = vpop.f32.mrb[36].mxu0 }
 0x393   :  { %v1632_v23 = vadd.f32 %v1491_v16, %v5878_v21  ;;  %v1493_v24 = vpop.f32.mrb[45].mxu1  ;;  %v3510_v26 = vpop.f32.mrb[37].mxu0  ;;  %v1646_v10 = vadd.f32 %v4965_v13, %v1532_v20 }
 0x394   :  { %v1639_v28 = vadd.f32 %v1493_v24, %v5879_v27  ;;  %v1495_v29 = vpop.f32.mrb[46].mxu1  ;;  %v1535_v31 = vpop.f32.mrb[38].mxu0 }
 0x395   :  { %v3173_v34 = vmul.f32 -1.442695, %v1632_v23  ;;  %v1496_v19 = vpop.f32.mrb[47].mxu1  ;;  %v3511_v42 = vpop.f32.mrb[39].mxu0 }
 0x396   :  { %v3174_v8 = vmul.f32 -1.442695, %v1639_v28  ;;  %v5214_v19 = vld [vmem:[#allocation15 + $0x1c] ss:$12 sps:$4 sm:$0xff]   ;;  %v5221_v42 = vld [vmem:[#allocation15 + $0x18] ss:$12 sps:$4 sm:$0xff]  }
 0x397   :  { %3937 = vpow2.f32 %v3173_v34  ;;  %v5208_v34 = vld [vmem:[#allocation15] ss:$12 sps:$4 sm:$0xff]  }
 0x398   :  { %3939 = vpow2.f32 %v3174_v8  ;;  %v5224_v8 = vld [vmem:[#allocation15 + $0x20] ss:$12 sps:$4 sm:$0xff]  }
 0x3a1   :  { %v3938_v32 = vpop.eup %3937 }
 0x3a2   :  { %v1636_v15 = vadd.f32 1.0, %v3938_v32  ;;  %v3940_v33 = vpop.eup %3939  ;;  %v5227_v32 = vld [vmem:[#allocation15 + $0x34] ss:$12 sps:$4 sm:$0xff]  }
 0x3a3   :  { %v1643_v41 = vadd.f32 1.0, %v3940_v33 }
 0x3a4   :  { %3941 = vrcp.f32 %v1636_v15 }
 0x3ae   :  { %v3942_v14 = vpop.eup %3941 }
 0x3af   :  { %v1647_v17 = vmul.f32 %v3942_v14, %v1646_v10 }
 0x3b1   :  { %v1648_v43 = vadd.f32 %v1647_v17, %v5880_v44  ;;  %v5232_v17 = vld [vmem:[#allocation15 + $0x30] ss:$12 sps:$4 sm:$0xff]   ;;  %v5235_v44 = vld [vmem:[#allocation15 + $0x38] ss:$12 sps:$4 sm:$0xff]  }
 0x3b2   :  { %v1573_v47 = vpop.f32.mrb[48].mxu1  ;;  %v1614_v49 = vpop.f32.mrb[40].mxu0 }
 0x3b3   :  { %3943 = vtanh.f32 %v1648_v43  ;;  %v1653_v48 = vadd.f32 %v1573_v47, %v5881_v40  ;;  %v1575_v51 = vpop.f32.mrb[49].mxu1  ;;  %v3530_v37 = vpop.f32.mrb[41].mxu0  ;;  %v1667_v33 = vadd.f32 %v4982_v36, %v1614_v49  ;;  %v5238_v43 = vld [vmem:[#allocation15 + $0x4c] ss:$12 sps:$4 sm:$0xff]   ;;  %v5243_v49 = vld [vmem:[#allocation15 + $0x48] ss:$12 sps:$4 sm:$0xff]  }
 0x3b4   :  { %v1660_v52 = vadd.f32 %v1575_v51, %v5882_v53  ;;  %v1577_v54 = vpop.f32.mrb[50].mxu1  ;;  %v1617_v55 = vpop.f32.mrb[42].mxu0  ;;  %3945 = vrcp.f32 %v1643_v41  ;;  %v5883_v41 = vld [vmem:[#allocation74_spill] sm:$0xff]  ;;  %v5256_v53 = vld [vmem:[#allocation15 + $0x68] ss:$12 sps:$4 sm:$0xff]  }
 0x3b5   :  { %v3175_v56 = vmul.f32 -1.442695, %v1653_v48  ;;  %v1578_v58 = vpop.f32.mrb[51].mxu1  ;;  %v3531_v16 = vpop.f32.mrb[43].mxu0  ;;  %v5246_v48 = vld [vmem:[#allocation15 + $0x50] ss:$12 sps:$4 sm:$0xff]  }
 0x3b6   :  { %v3176_v24 = vmul.f32 -1.442695, %v1660_v52  ;;  %v5249_v51 = vld [vmem:[#allocation15 + $0x64] ss:$12 sps:$4 sm:$0xff]   ;;  %v5253_v37 = vld [vmem:[#allocation15 + $0x60] ss:$12 sps:$4 sm:$0xff]  }
 0x3b7   :  { %3947 = vpow2.f32 %v3175_v56  ;;  %v5259_v52 = vld [vmem:[#allocation15 + $0x7c] ss:$12 sps:$4 sm:$0xff]   ;;  %v5263_v54 = vld [vmem:[#allocation15 + $0x78] ss:$12 sps:$4 sm:$0xff]   ;;  %v5266_v55 = vld [vmem:[#allocation15 + $0x80] ss:$12 sps:$4 sm:$0xff]  }
 0x3b8   :  { %3949 = vpow2.f32 %v3176_v24  ;;  %v5269_v56 = vld [vmem:[#allocation15 + $0x94] ss:$12 sps:$4 sm:$0xff]   ;;  %v5280_v24 = vld [vmem:[#allocation15 + $0xac] ss:$12 sps:$4 sm:$0xff]  }
 0x3bd   :  { %v3944_v20 = vpop.eup %3943 }
 0x3be   :  { %v1650_v21 = vsub.f32 %v5067_v38, %v3944_v20  ;;  %v3946_v23 = vpop.eup %3945  ;;  %v5211_v38 = vld [vmem:[#allocation15 + $0x8] ss:$12 sps:$4 sm:$0xff]  }
 0x3c0   :  { %v1651_v26 = vmul.f32 %v3946_v23, %v1650_v21  ;;  %v5274_v21 = vld [vmem:[#allocation15 + $0x90] ss:$12 sps:$4 sm:$0xff]   ;;  %v5277_v23 = vld [vmem:[#allocation15 + $0x98] ss:$12 sps:$4 sm:$0xff]  }
 0x3c1   :  { %v3948_v27 = vpop.eup %3947 }
 0x3c2   :  { %v1657_v28 = vadd.f32 1.0, %v3948_v27  ;;  %v5203_v29 = vadd.f32 %v3944_v20, %v1651_v26  ;;  %v3950_v15 = vpop.eup %3949 }
 0x3c3   :  { %v1664_v40 = vadd.f32 1.0, %v3950_v15  ;;  %v5329_v15 = vld [vmem:[#allocation14 + $0xb0] ss:$12 sps:$4 sm:$0xff]  }
 0x3c4   :  { %3951 = vrcp.f32 %v1657_v28  ;;  %1675 = vst [vmem:[#allocation17 + $0x10] sm:$0xff] %v5203_v29  ;;  %v1678_v31 = vpack.c.bf16 %v5203_v29, %v5203_v29  ;;  %v5286_v28 = vld [vmem:[#allocation15 + $0xa8] ss:$12 sps:$4 sm:$0xff]   ;;  %5884 = vst [vmem:[#allocation34_spill] sm:$0xff] %v5329_v15 }
 0x3c6   :  { %1712 = vmatmul.mubr.bf16.vlgmr.msra.gmra.mrb[52].mxu1 %v1678_v31  ;;  %3549 = vmatmul.mubr.bf16.vlgmr.msra.gmra.mrb[44].mxu0 %v1678_v31 }
 0x3c7   :  { %1762 = vmatpush1.bf16.msra.mxu1 %v5208_v34  ;;  %3553 = vmatpush3.bf16.msra.mxu0 %v5211_v38 }
 0x3c8   :  { %1763 = vmatprep.subr.bf16.mxu1 %v5214_v19  ;;  %3554 = vmatprep.subr.bf16.mxu0 %v5850_v30 }
 0x3c9   :  { %1793 = vmatprep.mubr.bf16.mxu1 %v5851_v39  ;;  %3568 = vmatprep.mubr.msk.bf16.mxu0 %vm4375_vm1, %v5850_v30 }
 0x3cb   :  { %1764 = vmatpush1.bf16.msra.mxu1 %v5221_v42  ;;  %3555 = vmatpush3.bf16.msra.mxu0 %v5224_v8 }
 0x3cc   :  { %1765 = vmatprep.subr.bf16.mxu1 %v5227_v32  ;;  %3556 = vmatprep.subr.bf16.mxu0 %v5850_v30 }
 0x3ce   :  { %v3952_v10 = vpop.eup %3951 }
 0x3cf   :  { %v1668_v14 = vmul.f32 %v3952_v10, %v1667_v33  ;;  %1766 = vmatpush1.bf16.msra.mxu1 %v5232_v17  ;;  %3557 = vmatpush3.bf16.msra.mxu0 %v5235_v44  ;;  %v5332_v33 = vld [vmem:[#allocation15 + $0x4] ss:$12 sps:$4 sm:$0xff]  }
 0x3d0   :  { %1767 = vmatprep.subr.bf16.mxu1 %v5238_v43  ;;  %3558 = vmatprep.subr.bf16.mxu0 %v5850_v30  ;;  %5885 = vst [vmem:[#allocation36_spill] sm:$0xff] %v5332_v33 }
 0x3d1   :  { %v1669_v47 = vadd.f32 %v1668_v14, %v5883_v41  ;;  %v5886_v41 = vld [vmem:[#allocation49_spill] sm:$0xff] }
 0x3d3   :  { %3953 = vtanh.f32 %v1669_v47  ;;  %1768 = vmatpush1.bf16.msra.mxu1 %v5243_v49  ;;  %3559 = vmatpush3.bf16.msra.mxu0 %v5246_v48 }
 0x3d4   :  { %1769 = vmatprep.subr.bf16.mxu1 %v5249_v51  ;;  %3560 = vmatprep.subr.bf16.mxu0 %v5850_v30  ;;  %3955 = vrcp.f32 %v1664_v40 }
 0x3d7   :  { %1770 = vmatpush1.bf16.msra.mxu1 %v5253_v37  ;;  %3561 = vmatpush3.bf16.msra.mxu0 %v5256_v53 }
 0x3d8   :  { %1771 = vmatprep.subr.bf16.mxu1 %v5259_v52  ;;  %3562 = vmatprep.subr.bf16.mxu0 %v5850_v30 }
 0x3db   :  { %1772 = vmatpush1.bf16.msra.mxu1 %v5263_v54  ;;  %3563 = vmatpush3.bf16.msra.mxu0 %v5266_v55 }
 0x3dc   :  { %1773 = vmatprep.subr.bf16.mxu1 %v5269_v56  ;;  %3564 = vmatprep.subr.bf16.mxu0 %v5850_v30 }
 0x3dd   :  { %v3954_v58 = vpop.eup %3953 }
 0x3de   :  { %v1671_v16 = vsub.f32 %v5106_v57, %v3954_v58  ;;  %v3956_v20 = vpop.eup %3955  ;;  %v5289_v57 = vld [vmem:[#allocation15 + $0xb0] ss:$12 sps:$4 sm:$0xff]  }
 0x3df   :  { %1774 = vmatpush1.bf16.msra.mxu1 %v5274_v21  ;;  %3565 = vmatpush3.bf16.msra.mxu0 %v5277_v23 }
 0x3e0   :  { %1775 = vmatprep.subr.bf16.mxu1 %v5280_v24  ;;  %3566 = vmatprep.subr.bf16.mxu0 %v5850_v30  ;;  %v1672_v26 = vmul.f32 %v3956_v20, %v1671_v16  ;;  %v5887_v16 = vld [vmem:[#allocation51_spill] sm:$0xff] }
 0x3e2   :  { %v5284_v27 = vadd.f32 %v3954_v58, %v1672_v26 }
 0x3e3   :  { %1776 = vmatpush1.bf16.msra.mxu1 %v5286_v28  ;;  %3567 = vmatpush3.bf16.msra.mxu0 %v5289_v57 }
 0x3e4   :  { %1677 = vst [vmem:[#allocation18 + $0x28] sm:$0xff] %v5284_v27  ;;  %v1760_v31 = vpack.c.bf16 %v5284_v27, %v5284_v27  ;;  %1901 = vmatprep.subr.bf16.mxu1 %v5113_v59  ;;  %3572 = vmatprep.subr.bf16.mxu0 %v5850_v30 }
 0x3e6   :  { %1794 = vmatmul.mubr.bf16.vlgmr.msra.gmra.mrb[56].mxu1 %v1760_v31  ;;  %3569 = vmatmul.mubr.bf16.vlgmr.msra.gmra.mrb[48].mxu0 %v1760_v31 }
 0x3e7   :  { %1902 = vmatpush1.bf16.msra.mxu1 %v5117_v60  ;;  %3573 = vmatpush3.bf16.msra.mxu0 %v5120_v61 }
 0x3e8   :  { %1903 = vmatprep.subr.bf16.mxu1 %v5123_v62  ;;  %3574 = vmatprep.subr.bf16.mxu0 %v5850_v30 }
 0x3e9   :  { %1933 = vmatprep.mubr.bf16.mxu1 %v5851_v39  ;;  %3588 = vmatprep.mubr.msk.bf16.mxu0 %vm4375_vm1, %v5850_v30 }
 0x3eb   :  { %1904 = vmatpush1.bf16.msra.mxu1 %v5130_v63  ;;  %3575 = vmatpush3.bf16.msra.mxu0 %v5133_v1 }
 0x3ec   :  { %1905 = vmatprep.subr.bf16.mxu1 %v5136_v2  ;;  %3576 = vmatprep.subr.bf16.mxu0 %v5850_v30 }
 0x3ef   :  { %1906 = vmatpush1.bf16.msra.mxu1 %v5140_v3  ;;  %3577 = vmatpush3.bf16.msra.mxu0 %v5143_v4 }
 0x3f0   :  { %1907 = vmatprep.subr.bf16.mxu1 %v5146_v5  ;;  %3578 = vmatprep.subr.bf16.mxu0 %v5850_v30 }
 0x3f3   :  { %1908 = vmatpush1.bf16.msra.mxu1 %v5150_v6  ;;  %3579 = vmatpush3.bf16.msra.mxu0 %v5153_v7 }
 0x3f4   :  { %1909 = vmatprep.subr.bf16.mxu1 %v5156_v50  ;;  %3580 = vmatprep.subr.bf16.mxu0 %v5850_v30 }
 0x3f7   :  { %1910 = vmatpush1.bf16.msra.mxu1 %v5160_v35  ;;  %3581 = vmatpush3.bf16.msra.mxu0 %v5163_v45 }
 0x3f8   :  { %1911 = vmatprep.subr.bf16.mxu1 %v5166_v22  ;;  %3582 = vmatprep.subr.bf16.mxu0 %v5850_v30 }
 0x3fb   :  { %1912 = vmatpush1.bf16.msra.mxu1 %v5170_v11  ;;  %3583 = vmatpush3.bf16.msra.mxu0 %v5173_v25 }
 0x3fc   :  { %1913 = vmatprep.subr.bf16.mxu1 %v5176_v46  ;;  %3584 = vmatprep.subr.bf16.mxu0 %v5850_v30 }
 0x3ff   :  { %1914 = vmatpush1.bf16.msra.mxu1 %v5180_v9  ;;  %3585 = vmatpush3.bf16.msra.mxu0 %v5183_v12 }
 0x400   :  { %1915 = vmatprep.subr.bf16.mxu1 %v5186_v0  ;;  %3586 = vmatprep.subr.bf16.mxu0 %v5850_v30 }
 0x403   :  { %1916 = vmatpush1.bf16.msra.mxu1 %v5190_v18  ;;  %3587 = vmatpush3.bf16.msra.mxu0 %v5329_v15 }
 0x404   :  { %1983 = vmatprep.subr.bf16.mxu1 %v5332_v33  ;;  %3592 = vmatprep.subr.bf16.mxu0 %v5850_v30 }
 0x499   :  { %v1713_v10 = vpop.f32.mrb[52].mxu1  ;;  %v1754_v14 = vpop.f32.mrb[44].mxu0 }
 0x49a   :  { %v1854_v47 = vadd.f32 %v1713_v10, %v5886_v41  ;;  %v1715_v40 = vpop.f32.mrb[53].mxu1  ;;  %v3550_v58 = vpop.f32.mrb[45].mxu0  ;;  %v1868_v25 = vadd.f32 %v4965_v13, %v1754_v14  ;;  %v5888_v41 = vld [vmem:[#allocation48_spill] sm:$0xff] }
 0x49b   :  { %v1861_v20 = vadd.f32 %v1715_v40, %v5887_v16  ;;  %v1717_v26 = vpop.f32.mrb[54].mxu1  ;;  %v1757_v31 = vpop.f32.mrb[46].mxu0 }
 0x49c   :  { %v3177_v18 = vmul.f32 -1.442695, %v1854_v47  ;;  %v1718_v0 = vpop.f32.mrb[55].mxu1  ;;  %v3551_v12 = vpop.f32.mrb[47].mxu0  ;;  %v5889_v47 = vld [vmem:[#allocation75_spill] sm:$0xff] }
 0x49d   :  { %v3178_v15 = vmul.f32 -1.442695, %v1861_v20  ;;  %v5890_v20 = vld [vmem:[#allocation76_spill] sm:$0xff] }
 0x49e   :  { %3957 = vpow2.f32 %v3177_v18 }
 0x49f   :  { %3959 = vpow2.f32 %v3178_v15 }
 0x4a8   :  { %v3958_v9 = vpop.eup %3957 }
 0x4a9   :  { %v1858_v46 = vadd.f32 1.0, %v3958_v9  ;;  %v3960_v33 = vpop.eup %3959 }
 0x4aa   :  { %v1865_v22 = vadd.f32 1.0, %v3960_v33 }
 0x4ab   :  { %3961 = vrcp.f32 %v1858_v46 }
 0x4b5   :  { %v3962_v11 = vpop.eup %3961 }
 0x4b6   :  { %v1869_v10 = vmul.f32 %v3962_v11, %v1868_v25 }
 0x4b8   :  { %v1870_v58 = vadd.f32 %v1869_v10, %v5888_v41 }
 0x4b9   :  { %v1795_v40 = vpop.f32.mrb[56].mxu1  ;;  %v1836_v16 = vpop.f32.mrb[48].mxu0 }
 0x4ba   :  { %3963 = vtanh.f32 %v1870_v58  ;;  %v1875_v0 = vadd.f32 %v1795_v40, %v5889_v47  ;;  %v1797_v12 = vpop.f32.mrb[57].mxu1  ;;  %v3570_v18 = vpop.f32.mrb[49].mxu0  ;;  %v1889_v47 = vadd.f32 %v4982_v36, %v1836_v16 }
 0x4bb   :  { %v1882_v26 = vadd.f32 %v1797_v12, %v5890_v20  ;;  %v1799_v9 = vpop.f32.mrb[58].mxu1  ;;  %v1839_v15 = vpop.f32.mrb[50].mxu0  ;;  %3965 = vrcp.f32 %v1865_v22  ;;  %v5891_v18 = vld [vmem:[#allocation71_spill] sm:$0xff] }
 0x4bc   :  { %v3179_v46 = vmul.f32 -1.442695, %v1875_v0  ;;  %v1800_v31 = vpop.f32.mrb[59].mxu1  ;;  %v3571_v13 = vpop.f32.mrb[51].mxu0 }
 0x4bd   :  { %v3180_v14 = vmul.f32 -1.442695, %v1882_v26  ;;  %v5892_v31 = vld [vmem:[#allocation27_spill] sm:$0xff]  ;;  %v5893_v13 = vld [vmem:[#allocation29_spill] sm:$0xff] }
 0x4be   :  { %3967 = vpow2.f32 %v3179_v46 }
 0x4bf   :  { %3969 = vpow2.f32 %v3180_v14  ;;  %v5897_v14 = vld [vmem:[#allocation31_spill] sm:$0xff] }
 0x4c4   :  { %v3964_v11 = vpop.eup %3963 }
 0x4c5   :  { %v1872_v25 = vsub.f32 %v5203_v29, %v3964_v11  ;;  %v3966_v33 = vpop.eup %3965 }
 0x4c7   :  { %v1873_v10 = vmul.f32 %v3966_v33, %v1872_v25  ;;  %v5895_v25 = vld [vmem:[#allocation30_spill] sm:$0xff]  ;;  %v5896_v33 = vld [vmem:[#allocation32_spill] sm:$0xff] }
 0x4c8   :  { %v3968_v41 = vpop.eup %3967 }
 0x4c9   :  { %v1879_v58 = vadd.f32 1.0, %v3968_v41  ;;  %v5343_v40 = vadd.f32 %v3964_v11, %v1873_v10  ;;  %v3970_v29 = vpop.eup %3969  ;;  %v5894_v11 = vld [vmem:[#allocation28_spill] sm:$0xff]  ;;  %v5898_v10 = vld [vmem:[#allocation33_spill] sm:$0xff]  ;;  %v5899_v41 = vld [vmem:[#allocation35_spill] sm:$0xff] }
 0x4ca   :  { %v1886_v26 = vadd.f32 1.0, %v3970_v29 }
 0x4cb   :  { %3971 = vrcp.f32 %v1879_v58  ;;  %1897 = vst [vmem:[#allocation17 + $0x18] sm:$0xff] %v5343_v40  ;;  %v1900_v22 = vpack.c.bf16 %v5343_v40, %v5343_v40  ;;  %v5900_v58 = vld [vmem:[#allocation34_spill] sm:$0xff] }
 0x4cd   :  { %1934 = vmatmul.mubr.bf16.vlgmr.msra.gmra.mrb[60].mxu1 %v1900_v22  ;;  %3589 = vmatmul.mubr.bf16.vlgmr.msra.gmra.mrb[52].mxu0 %v1900_v22  ;;  %v5901_v22 = vld [vmem:[#allocation36_spill] sm:$0xff] }
 0x4ce   :  { %1984 = vmatpush1.bf16.msra.mxu1 %v5208_v34  ;;  %3593 = vmatpush3.bf16.msra.mxu0 %v5211_v38 }
 0x4cf   :  { %1985 = vmatprep.subr.bf16.mxu1 %v5214_v19  ;;  %3594 = vmatprep.subr.bf16.mxu0 %v5850_v30 }
 0x4d0   :  { %2015 = vmatprep.mubr.bf16.mxu1 %v5851_v39  ;;  %3608 = vmatprep.mubr.msk.bf16.mxu0 %vm4375_vm1, %v5850_v30 }
 0x4d2   :  { %1986 = vmatpush1.bf16.msra.mxu1 %v5221_v42  ;;  %3595 = vmatpush3.bf16.msra.mxu0 %v5224_v8 }
 0x4d3   :  { %1987 = vmatprep.subr.bf16.mxu1 %v5227_v32  ;;  %3596 = vmatprep.subr.bf16.mxu0 %v5850_v30 }
 0x4d5   :  { %v3972_v0 = vpop.eup %3971 }
 0x4d6   :  { %v1890_v12 = vmul.f32 %v3972_v0, %v1889_v47  ;;  %1988 = vmatpush1.bf16.msra.mxu1 %v5232_v17  ;;  %3597 = vmatpush3.bf16.msra.mxu0 %v5235_v44  ;;  %v5902_v0 = vld [vmem:[#allocation53_spill] sm:$0xff] }
 0x4d7   :  { %1989 = vmatprep.subr.bf16.mxu1 %v5238_v43  ;;  %3598 = vmatprep.subr.bf16.mxu0 %v5850_v30 }
 0x4d8   :  { %v1891_v20 = vadd.f32 %v1890_v12, %v5891_v18 }
 0x4da   :  { %3973 = vtanh.f32 %v1891_v20  ;;  %1990 = vmatpush1.bf16.msra.mxu1 %v5243_v49  ;;  %3599 = vmatpush3.bf16.msra.mxu0 %v5246_v48 }
 0x4db   :  { %1991 = vmatprep.subr.bf16.mxu1 %v5249_v51  ;;  %3600 = vmatprep.subr.bf16.mxu0 %v5850_v30  ;;  %3975 = vrcp.f32 %v1886_v26  ;;  %v5903_v26 = vld [vmem:[#allocation55_spill] sm:$0xff] }
 0x4de   :  { %1992 = vmatpush1.bf16.msra.mxu1 %v5253_v37  ;;  %3601 = vmatpush3.bf16.msra.mxu0 %v5256_v53 }
 0x4df   :  { %1993 = vmatprep.subr.bf16.mxu1 %v5259_v52  ;;  %3602 = vmatprep.subr.bf16.mxu0 %v5850_v30 }
 0x4e2   :  { %1994 = vmatpush1.bf16.msra.mxu1 %v5263_v54  ;;  %3603 = vmatpush3.bf16.msra.mxu0 %v5266_v55 }
 0x4e3   :  { %1995 = vmatprep.subr.bf16.mxu1 %v5269_v56  ;;  %3604 = vmatprep.subr.bf16.mxu0 %v5850_v30 }
 0x4e4   :  { %v3974_v36 = vpop.eup %3973 }
 0x4e5   :  { %v1893_v16 = vsub.f32 %v5284_v27, %v3974_v36  ;;  %v3976_v9 = vpop.eup %3975 }
 0x4e6   :  { %1996 = vmatpush1.bf16.msra.mxu1 %v5274_v21  ;;  %3605 = vmatpush3.bf16.msra.mxu0 %v5277_v23 }
 0x4e7   :  { %1997 = vmatprep.subr.bf16.mxu1 %v5280_v24  ;;  %3606 = vmatprep.subr.bf16.mxu0 %v5850_v30  ;;  %v1894_v15 = vmul.f32 %v3976_v9, %v1893_v16 }
 0x4e9   :  { %v5382_v46 = vadd.f32 %v3974_v36, %v1894_v15 }
 0x4ea   :  { %1998 = vmatpush1.bf16.msra.mxu1 %v5286_v28  ;;  %3607 = vmatpush3.bf16.msra.mxu0 %v5289_v57 }
 0x4eb   :  { %1899 = vst [vmem:[#allocation18 + $0x20] sm:$0xff] %v5382_v46  ;;  %v1982_v27 = vpack.c.bf16 %v5382_v46, %v5382_v46  ;;  %2121 = vmatprep.subr.bf16.mxu1 %v5113_v59  ;;  %3612 = vmatprep.subr.bf16.mxu0 %v5850_v30 }
 0x4ed   :  { %2016 = vmatmul.mubr.bf16.vlgmr.msra.gmra.mrb[64].mxu1 %v1982_v27  ;;  %3609 = vmatmul.mubr.bf16.vlgmr.msra.gmra.mrb[56].mxu0 %v1982_v27 }
 0x4ee   :  { %2122 = vmatpush1.bf16.msra.mxu1 %v5117_v60  ;;  %3613 = vmatpush3.bf16.msra.mxu0 %v5120_v61 }
 0x4ef   :  { %2123 = vmatprep.subr.bf16.mxu1 %v5123_v62  ;;  %3614 = vmatprep.subr.bf16.mxu0 %v5850_v30 }
 0x4f0   :  { %2153 = vmatprep.mubr.bf16.mxu1 %v5851_v39  ;;  %3628 = vmatprep.mubr.msk.bf16.mxu0 %vm4375_vm1, %v5850_v30 }
 0x4f2   :  { %2124 = vmatpush1.bf16.msra.mxu1 %v5130_v63  ;;  %3615 = vmatpush3.bf16.msra.mxu0 %v5133_v1 }
 0x4f3   :  { %2125 = vmatprep.subr.bf16.mxu1 %v5136_v2  ;;  %3616 = vmatprep.subr.bf16.mxu0 %v5850_v30 }
 0x4f6   :  { %2126 = vmatpush1.bf16.msra.mxu1 %v5140_v3  ;;  %3617 = vmatpush3.bf16.msra.mxu0 %v5143_v4 }
 0x4f7   :  { %2127 = vmatprep.subr.bf16.mxu1 %v5146_v5  ;;  %3618 = vmatprep.subr.bf16.mxu0 %v5850_v30 }
 0x4fa   :  { %2128 = vmatpush1.bf16.msra.mxu1 %v5150_v6  ;;  %3619 = vmatpush3.bf16.msra.mxu0 %v5153_v7 }
 0x4fb   :  { %2129 = vmatprep.subr.bf16.mxu1 %v5156_v50  ;;  %3620 = vmatprep.subr.bf16.mxu0 %v5850_v30 }
 0x4fe   :  { %2130 = vmatpush1.bf16.msra.mxu1 %v5160_v35  ;;  %3621 = vmatpush3.bf16.msra.mxu0 %v5163_v45 }
 0x4ff   :  { %2131 = vmatprep.subr.bf16.mxu1 %v5892_v31  ;;  %3622 = vmatprep.subr.bf16.mxu0 %v5850_v30 }
 0x502   :  { %2132 = vmatpush1.bf16.msra.mxu1 %v5893_v13  ;;  %3623 = vmatpush3.bf16.msra.mxu0 %v5894_v11 }
 0x503   :  { %2133 = vmatprep.subr.bf16.mxu1 %v5895_v25  ;;  %3624 = vmatprep.subr.bf16.mxu0 %v5850_v30 }
 0x506   :  { %2134 = vmatpush1.bf16.msra.mxu1 %v5896_v33  ;;  %3625 = vmatpush3.bf16.msra.mxu0 %v5897_v14 }
 0x507   :  { %2135 = vmatprep.subr.bf16.mxu1 %v5898_v10  ;;  %3626 = vmatprep.subr.bf16.mxu0 %v5850_v30 }
 0x50a   :  { %2136 = vmatpush1.bf16.msra.mxu1 %v5899_v41  ;;  %3627 = vmatpush3.bf16.msra.mxu0 %v5900_v58 }
 0x50b   :  { %2203 = vmatprep.subr.bf16.mxu1 %v5901_v22  ;;  %3632 = vmatprep.subr.bf16.mxu0 %v5850_v30 }
 0x5a0   :  { %v1935_v29 = vpop.f32.mrb[60].mxu1  ;;  %v1976_v47 = vpop.f32.mrb[52].mxu0 }
 0x5a1   :  { %v2074_v12 = vadd.f32 %v1935_v29, %v5902_v0  ;;  %v1937_v18 = vpop.f32.mrb[61].mxu1  ;;  %v3590_v20 = vpop.f32.mrb[53].mxu0  ;;  %v5431_v29 = vld [vmem:[%s5746_s6] ss:$0 sm:$0xff] }
 0x5a2   :  { %v2081_v36 = vadd.f32 %v1937_v18, %v5903_v26  ;;  %v1939_v16 = vpop.f32.mrb[62].mxu1  ;;  %v1979_v9 = vpop.f32.mrb[54].mxu0  ;;  %5904 = vst [vmem:[#allocation38_spill] sm:$0xff] %v5431_v29  ;;  %v2088_v0 = vadd.f32 %v5431_v29, %v1976_v47  ;;  %v5905_v26 = vld [vmem:[#allocation54_spill] sm:$0xff] }
 0x5a3   :  { %v3181_v15 = vmul.f32 -1.442695, %v2074_v12  ;;  %v1940_v27 = vpop.f32.mrb[63].mxu1  ;;  %v3591_v10 = vpop.f32.mrb[55].mxu0 }
 0x5a4   :  { %v3182_v41 = vmul.f32 -1.442695, %v2081_v36  ;;  %v5906_v36 = vld [vmem:[#allocation72_spill] sm:$0xff] }
 0x5a5   :  { %3977 = vpow2.f32 %v3181_v15  ;;  %v5907_v15 = vld [vmem:[#allocation73_spill] sm:$0xff] }
 0x5a6   :  { %3979 = vpow2.f32 %v3182_v41 }
 0x5af   :  { %v3978_v58 = vpop.eup %3977 }
 0x5b0   :  { %v2078_v14 = vadd.f32 1.0, %v3978_v58  ;;  %v3980_v22 = vpop.eup %3979 }
 0x5b1   :  { %v2085_v16 = vadd.f32 1.0, %v3980_v22 }
 0x5b2   :  { %3981 = vrcp.f32 %v2078_v14 }
 0x5bc   :  { %v3982_v18 = vpop.eup %3981 }
 0x5bd   :  { %v2089_v20 = vmul.f32 %v3982_v18, %v2088_v0 }
 0x5bf   :  { %v2090_v12 = vadd.f32 %v2089_v20, %v5905_v26 }
 0x5c0   :  { %v2017_v10 = vpop.f32.mrb[64].mxu1  ;;  %v2058_v9 = vpop.f32.mrb[56].mxu0 }
 0x5c1   :  { %3983 = vtanh.f32 %v2090_v12  ;;  %v2095_v58 = vadd.f32 %v2017_v10, %v5906_v36  ;;  %v2019_v41 = vpop.f32.mrb[65].mxu1  ;;  %v3610_v14 = vpop.f32.mrb[57].mxu0 }
 0x5c2   :  { %v2102_v27 = vadd.f32 %v2019_v41, %v5907_v15  ;;  %v2021_v33 = vpop.f32.mrb[66].mxu1  ;;  %v2061_v25 = vpop.f32.mrb[58].mxu0  ;;  %3985 = vrcp.f32 %v2085_v16  ;;  %v5908_v16 = vld [vmem:[#allocation65_spill] sm:$0xff] }
 0x5c3   :  { %v3183_v11 = vmul.f32 -1.442695, %v2095_v58  ;;  %v2022_v13 = vpop.f32.mrb[67].mxu1  ;;  %v3611_v47 = vpop.f32.mrb[59].mxu0 }
 0x5c4   :  { %v3184_v20 = vmul.f32 -1.442695, %v2102_v27  ;;  %v5457_v13 = vld [vmem:[%s5747_s7] ss:$0 sm:$0xff] }
 0x5c5   :  { %3987 = vpow2.f32 %v3183_v11  ;;  %v2109_v11 = vadd.f32 %v5457_v13, %v2058_v9 }
 0x5c6   :  { %3989 = vpow2.f32 %v3184_v20 }
 0x5cb   :  { %v3984_v0 = vpop.eup %3983 }
 0x5cc   :  { %v2092_v18 = vsub.f32 %v5343_v40, %v3984_v0  ;;  %v3986_v22 = vpop.eup %3985 }
 0x5ce   :  { %v2093_v26 = vmul.f32 %v3986_v22, %v2092_v18 }
 0x5cf   :  { %v3988_v12 = vpop.eup %3987 }
 0x5d0   :  { %v2099_v29 = vadd.f32 1.0, %v3988_v12  ;;  %v5438_v10 = vadd.f32 %v3984_v0, %v2093_v26  ;;  %v3990_v40 = vpop.eup %3989 }
 0x5d1   :  { %v2106_v58 = vadd.f32 1.0, %v3990_v40 }
 0x5d2   :  { %3991 = vrcp.f32 %v2099_v29  ;;  %2117 = vst [vmem:[#allocation17 + $0x20] sm:$0xff] %v5438_v10  ;;  %v2120_v25 = vpack.c.bf16 %v5438_v10, %v5438_v10 }
 0x5d4   :  { %2154 = vmatmul.mubr.bf16.vlgmr.msra.gmra.mrb[68].mxu1 %v2120_v25  ;;  %3629 = vmatmul.mubr.bf16.vlgmr.msra.gmra.mrb[60].mxu0 %v2120_v25 }
 0x5d5   :  { %2204 = vmatpush1.bf16.msra.mxu1 %v5208_v34  ;;  %3633 = vmatpush3.bf16.msra.mxu0 %v5211_v38 }
 0x5d6   :  { %2205 = vmatprep.subr.bf16.mxu1 %v5214_v19  ;;  %3634 = vmatprep.subr.bf16.mxu0 %v5850_v30 }
 0x5d7   :  { %2235 = vmatprep.mubr.bf16.mxu1 %v5851_v39  ;;  %3648 = vmatprep.mubr.msk.bf16.mxu0 %vm4375_vm1, %v5850_v30 }
 0x5d9   :  { %2206 = vmatpush1.bf16.msra.mxu1 %v5221_v42  ;;  %3635 = vmatpush3.bf16.msra.mxu0 %v5224_v8 }
 0x5da   :  { %2207 = vmatprep.subr.bf16.mxu1 %v5227_v32  ;;  %3636 = vmatprep.subr.bf16.mxu0 %v5850_v30 }
 0x5dc   :  { %v3992_v33 = vpop.eup %3991 }
 0x5dd   :  { %v2110_v29 = vmul.f32 %v3992_v33, %v2109_v11  ;;  %2208 = vmatpush1.bf16.msra.mxu1 %v5232_v17  ;;  %3637 = vmatpush3.bf16.msra.mxu0 %v5235_v44  ;;  %v5920_v33 = vld [vmem:[#allocation38_spill] sm:$0xff] }
 0x5de   :  { %2209 = vmatprep.subr.bf16.mxu1 %v5238_v43  ;;  %3638 = vmatprep.subr.bf16.mxu0 %v5850_v30 }
 0x5df   :  { %v2111_v36 = vadd.f32 %v2110_v29, %v5908_v16 }
 0x5e1   :  { %3993 = vtanh.f32 %v2111_v36  ;;  %2210 = vmatpush1.bf16.msra.mxu1 %v5243_v49  ;;  %3639 = vmatpush3.bf16.msra.mxu0 %v5246_v48 }
 0x5e2   :  { %2211 = vmatprep.subr.bf16.mxu1 %v5249_v51  ;;  %3640 = vmatprep.subr.bf16.mxu0 %v5850_v30  ;;  %3995 = vrcp.f32 %v2106_v58  ;;  %v5921_v58 = vld [vmem:[#allocation58_spill] sm:$0xff] }
 0x5e5   :  { %2212 = vmatpush1.bf16.msra.mxu1 %v5253_v37  ;;  %3641 = vmatpush3.bf16.msra.mxu0 %v5256_v53 }
 0x5e6   :  { %2213 = vmatprep.subr.bf16.mxu1 %v5259_v52  ;;  %3642 = vmatprep.subr.bf16.mxu0 %v5850_v30 }
 0x5e9   :  { %2214 = vmatpush1.bf16.msra.mxu1 %v5263_v54  ;;  %3643 = vmatpush3.bf16.msra.mxu0 %v5266_v55 }
 0x5ea   :  { %2215 = vmatprep.subr.bf16.mxu1 %v5269_v56  ;;  %3644 = vmatprep.subr.bf16.mxu0 %v5850_v30 }
 0x5eb   :  { %v3994_v9 = vpop.eup %3993 }
 0x5ec   :  { %v2113_v41 = vsub.f32 %v5382_v46, %v3994_v9  ;;  %v3996_v14 = vpop.eup %3995 }
 0x5ed   :  { %2216 = vmatpush1.bf16.msra.mxu1 %v5274_v21  ;;  %3645 = vmatpush3.bf16.msra.mxu0 %v5277_v23 }
 0x5ee   :  { %2217 = vmatprep.subr.bf16.mxu1 %v5280_v24  ;;  %3646 = vmatprep.subr.bf16.mxu0 %v5850_v30  ;;  %v2114_v15 = vmul.f32 %v3996_v14, %v2113_v41 }
 0x5f0   :  { %v5482_v27 = vadd.f32 %v3994_v9, %v2114_v15 }
 0x5f1   :  { %2218 = vmatpush1.bf16.msra.mxu1 %v5286_v28  ;;  %3647 = vmatpush3.bf16.msra.mxu0 %v5289_v57 }
 0x5f2   :  { %2119 = vst [vmem:[#allocation18 + $0x18] sm:$0xff] %v5482_v27  ;;  %v2202_v46 = vpack.c.bf16 %v5482_v27, %v5482_v27  ;;  %2341 = vmatprep.subr.bf16.mxu1 %v5113_v59  ;;  %3652 = vmatprep.subr.bf16.mxu0 %v5850_v30  ;;  %v5909_v59 = vld [vmem:[#allocation29_spill] sm:$0xff] }
 0x5f4   :  { %2236 = vmatmul.mubr.bf16.vlgmr.msra.gmra.mrb[72].mxu1 %v2202_v46  ;;  %3649 = vmatmul.mubr.bf16.vlgmr.msra.gmra.mrb[64].mxu0 %v2202_v46  ;;  %v5922_v46 = vld [vmem:[#allocation68_spill] sm:$0xff] }
 0x5f5   :  { %2342 = vmatpush1.bf16.msra.mxu1 %v5117_v60  ;;  %3653 = vmatpush3.bf16.msra.mxu0 %v5120_v61  ;;  %v5910_v60 = vld [vmem:[#allocation28_spill] sm:$0xff]  ;;  %v5911_v61 = vld [vmem:[#allocation30_spill] sm:$0xff] }
 0x5f6   :  { %2343 = vmatprep.subr.bf16.mxu1 %v5123_v62  ;;  %3654 = vmatprep.subr.bf16.mxu0 %v5850_v30  ;;  %v5912_v62 = vld [vmem:[#allocation32_spill] sm:$0xff] }
 0x5f7   :  { %2373 = vmatprep.mubr.bf16.mxu1 %v5851_v39  ;;  %3668 = vmatprep.mubr.msk.bf16.mxu0 %vm4375_vm1, %v5850_v30 }
 0x5f9   :  { %2344 = vmatpush1.bf16.msra.mxu1 %v5130_v63  ;;  %3655 = vmatpush3.bf16.msra.mxu0 %v5133_v1  ;;  %v5913_v63 = vld [vmem:[#allocation31_spill] sm:$0xff]  ;;  %v5914_v1 = vld [vmem:[#allocation33_spill] sm:$0xff] }
 0x5fa   :  { %2345 = vmatprep.subr.bf16.mxu1 %v5136_v2  ;;  %3656 = vmatprep.subr.bf16.mxu0 %v5850_v30  ;;  %v5915_v2 = vld [vmem:[#allocation35_spill] sm:$0xff] }
 0x5fd   :  { %2346 = vmatpush1.bf16.msra.mxu1 %v5140_v3  ;;  %3657 = vmatpush3.bf16.msra.mxu0 %v5143_v4  ;;  %v5916_v3 = vld [vmem:[#allocation34_spill] sm:$0xff]  ;;  %v5917_v4 = vld [vmem:[#allocation36_spill] sm:$0xff] }
 0x5fe   :  { %2347 = vmatprep.subr.bf16.mxu1 %v5146_v5  ;;  %3658 = vmatprep.subr.bf16.mxu0 %v5850_v30 }
 0x601   :  { %2348 = vmatpush1.bf16.msra.mxu1 %v5150_v6  ;;  %3659 = vmatpush3.bf16.msra.mxu0 %v5153_v7  ;;  %v5918_v7 = vld [vmem:[#allocation57_spill] sm:$0xff] }
 0x602   :  { %2349 = vmatprep.subr.bf16.mxu1 %v5156_v50  ;;  %3660 = vmatprep.subr.bf16.mxu0 %v5850_v30 }
 0x605   :  { %2350 = vmatpush1.bf16.msra.mxu1 %v5160_v35  ;;  %3661 = vmatpush3.bf16.msra.mxu0 %v5163_v45 }
 0x606   :  { %2351 = vmatprep.subr.bf16.mxu1 %v5892_v31  ;;  %3662 = vmatprep.subr.bf16.mxu0 %v5850_v30  ;;  %v5919_v31 = vld [vmem:[#allocation59_spill] sm:$0xff] }
 0x609   :  { %2352 = vmatpush1.bf16.msra.mxu1 %v5909_v59  ;;  %3663 = vmatpush3.bf16.msra.mxu0 %v5910_v60 }
 0x60a   :  { %2353 = vmatprep.subr.bf16.mxu1 %v5911_v61  ;;  %3664 = vmatprep.subr.bf16.mxu0 %v5850_v30 }
 0x60d   :  { %2354 = vmatpush1.bf16.msra.mxu1 %v5912_v62  ;;  %3665 = vmatpush3.bf16.msra.mxu0 %v5913_v63  ;;  %v5923_v62 = vld [vmem:[#allocation70_spill] sm:$0xff] }
 0x60e   :  { %2355 = vmatprep.subr.bf16.mxu1 %v5914_v1  ;;  %3666 = vmatprep.subr.bf16.mxu0 %v5850_v30 }
 0x611   :  { %2356 = vmatpush1.bf16.msra.mxu1 %v5915_v2  ;;  %3667 = vmatpush3.bf16.msra.mxu0 %v5916_v3 }
 0x612   :  { %2423 = vmatprep.subr.bf16.mxu1 %v5917_v4  ;;  %3672 = vmatprep.subr.bf16.mxu0 %v5850_v30 }
 0x6a7   :  { %v2155_v5 = vpop.f32.mrb[68].mxu1  ;;  %v2196_v6 = vpop.f32.mrb[60].mxu0 }
 0x6a8   :  { %v2294_v50 = vadd.f32 %v2155_v5, %v5918_v7  ;;  %v2157_v35 = vpop.f32.mrb[69].mxu1  ;;  %v3630_v45 = vpop.f32.mrb[61].mxu0  ;;  %v2308_v29 = vadd.f32 %v5920_v33, %v2196_v6 }
 0x6a9   :  { %v2301_v47 = vadd.f32 %v2157_v35, %v5919_v31  ;;  %v2159_v0 = vpop.f32.mrb[70].mxu1  ;;  %v2199_v18 = vpop.f32.mrb[62].mxu0 }
 0x6aa   :  { %v3185_v22 = vmul.f32 -1.442695, %v2294_v50  ;;  %v2160_v20 = vpop.f32.mrb[71].mxu1  ;;  %v3631_v26 = vpop.f32.mrb[63].mxu0 }
 0x6ab   :  { %v3186_v12 = vmul.f32 -1.442695, %v2301_v47 }
 0x6ac   :  { %3997 = vpow2.f32 %v3185_v22 }
 0x6ad   :  { %3999 = vpow2.f32 %v3186_v12  ;;  %v4122_v12 = vld [vmem:[#allocation14 + $0x60] ss:$12 sps:$4 sm:$0xff]  }
 0x6b6   :  { %v3998_v25 = vpop.eup %3997 }
 0x6b7   :  { %v2298_v40 = vadd.f32 1.0, %v3998_v25  ;;  %v4000_v11 = vpop.eup %3999  ;;  %v4123_v25 = vld [vmem:[#allocation14 + $0x68] ss:$12 sps:$4 sm:$0xff]  }
 0x6b8   :  { %v2305_v41 = vadd.f32 1.0, %v4000_v11  ;;  %v4125_v11 = vld [vmem:[#allocation14 + $0x78] ss:$12 sps:$4 sm:$0xff]  }
 0x6b9   :  { %4001 = vrcp.f32 %v2298_v40  ;;  %v4124_v40 = vld [vmem:[#allocation14 + $0x7c] ss:$12 sps:$4 sm:$0xff]  }
 0x6c3   :  { %v4002_v16 = vpop.eup %4001 }
 0x6c4   :  { %v2309_v36 = vmul.f32 %v4002_v16, %v2308_v29  ;;  %v4126_v29 = vld [vmem:[#allocation14 + $0x80] ss:$12 sps:$4 sm:$0xff]  }
 0x6c5   :  { %v4127_v16 = vld [vmem:[#allocation14 + $0x94] ss:$12 sps:$4 sm:$0xff]  }
 0x6c6   :  { %v2310_v9 = vadd.f32 %v2309_v36, %v5921_v58  ;;  %v4128_v36 = vld [vmem:[#allocation14 + $0x90] ss:$12 sps:$4 sm:$0xff]   ;;  %v4129_v58 = vld [vmem:[#allocation14 + $0x98] ss:$12 sps:$4 sm:$0xff]  }
 0x6c7   :  { %v2237_v14 = vpop.f32.mrb[72].mxu1  ;;  %v2278_v15 = vpop.f32.mrb[64].mxu0 }
 0x6c8   :  { %4003 = vtanh.f32 %v2310_v9  ;;  %v2315_v59 = vadd.f32 %v2237_v14, %v5922_v46  ;;  %v2239_v60 = vpop.f32.mrb[73].mxu1  ;;  %v3650_v61 = vpop.f32.mrb[65].mxu0  ;;  %v4130_v9 = vld [vmem:[#allocation14 + $0xac] ss:$12 sps:$4 sm:$0xff]  }
 0x6c9   :  { %v2322_v63 = vadd.f32 %v2239_v60, %v5923_v62  ;;  %v2241_v1 = vpop.f32.mrb[74].mxu1  ;;  %v2281_v2 = vpop.f32.mrb[66].mxu0  ;;  %4005 = vrcp.f32 %v2305_v41  ;;  %v4131_v41 = vld [vmem:[#allocation14 + $0xa8] ss:$12 sps:$4 sm:$0xff]  }
 0x6ca   :  { %v3187_v5 = vmul.f32 -1.442695, %v2315_v59  ;;  %v2242_v7 = vpop.f32.mrb[75].mxu1  ;;  %v3651_v6 = vpop.f32.mrb[67].mxu0  ;;  %v5925_v46 = vld [vmem:[#allocation39_spill] sm:$0xff]  ;;  %v5926_v62 = vld [vmem:[#allocation40_spill] sm:$0xff] }
 0x6cb   :  { %v3188_v31 = vmul.f32 -1.442695, %v2322_v63 }
 0x6cc   :  { %4007 = vpow2.f32 %v3187_v5 }
 0x6cd   :  { %4009 = vpow2.f32 %v3188_v31 }
 0x6d2   :  { %v4004_v50 = vpop.eup %4003 }
 0x6d3   :  { %v2312_v35 = vsub.f32 %v5438_v10, %v4004_v50  ;;  %v4006_v45 = vpop.eup %4005 }
 0x6d5   :  { %v2313_v47 = vmul.f32 %v4006_v45, %v2312_v35 }
 0x6d6   :  { %v4008_v0 = vpop.eup %4007 }
 0x6d7   :  { %v2319_v18 = vadd.f32 1.0, %v4008_v0  ;;  %v5533_v22 = vadd.f32 %v4004_v50, %v2313_v47  ;;  %v5927_v0 = vld [vmem:[#allocation52_spill] sm:$0xff] }
 0x6d9   :  { %4011 = vrcp.f32 %v2319_v18  ;;  %2337 = vst [vmem:[#allocation17 + $0x28] sm:$0xff] %v5533_v22  ;;  %v2340_v20 = vpack.c.bf16 %v5533_v22, %v5533_v22 }
 0x6db   :  { %2374 = vmatmul.mubr.bf16.vlgmr.msra.gmra.mrb[76].mxu1 %v2340_v20  ;;  %3669 = vmatmul.mubr.bf16.vlgmr.msra.gmra.mrb[68].mxu0 %v2340_v20 }
 0x6dc   :  { %2424 = vmatpush1.bf16.msra.mxu1 %v5208_v34  ;;  %3673 = vmatpush3.bf16.msra.mxu0 %v5211_v38  ;;  %v4010_v34 = vpop.eup %4009  ;;  %v2329_v38 = vadd.f32 %v5457_v13, %v2278_v15 }
 0x6dd   :  { %2425 = vmatprep.subr.bf16.mxu1 %v5214_v19  ;;  %3674 = vmatprep.subr.bf16.mxu0 %v5850_v30 }
 0x6de   :  { %2455 = vmatprep.mubr.bf16.mxu1 %v5851_v39  ;;  %3688 = vmatprep.mubr.msk.bf16.mxu0 %vm4375_vm1, %v5850_v30 }
 0x6e0   :  { %2426 = vmatpush1.bf16.msra.mxu1 %v5221_v42  ;;  %3675 = vmatpush3.bf16.msra.mxu0 %v5224_v8  ;;  %v5924_v42 = vld [vmem:[#allocation61_spill] sm:$0xff]  ;;  %v2326_v8 = vadd.f32 1.0, %v4010_v34 }
 0x6e1   :  { %2427 = vmatprep.subr.bf16.mxu1 %v5227_v32  ;;  %3676 = vmatprep.subr.bf16.mxu0 %v5850_v30 }
 0x6e3   :  { %v4012_v10 = vpop.eup %4011 }
 0x6e4   :  { %v2330_v19 = vmul.f32 %v4012_v10, %v2329_v38  ;;  %2428 = vmatpush1.bf16.msra.mxu1 %v5232_v17  ;;  %3677 = vmatpush3.bf16.msra.mxu0 %v5235_v44  ;;  %v5928_v10 = vld [vmem:[#allocation64_spill] sm:$0xff] }
 0x6e5   :  { %2429 = vmatprep.subr.bf16.mxu1 %v5238_v43  ;;  %3678 = vmatprep.subr.bf16.mxu0 %v5850_v30 }
 0x6e6   :  { %v2331_v26 = vadd.f32 %v2330_v19, %v5924_v42 }
 0x6e8   :  { %4013 = vtanh.f32 %v2331_v26  ;;  %2430 = vmatpush1.bf16.msra.mxu1 %v5243_v49  ;;  %3679 = vmatpush3.bf16.msra.mxu0 %v5246_v48 }
 0x6e9   :  { %2431 = vmatprep.subr.bf16.mxu1 %v5249_v51  ;;  %3680 = vmatprep.subr.bf16.mxu0 %v5850_v30  ;;  %4015 = vrcp.f32 %v2326_v8  ;;  %v4109_v51 = vld [vmem:[#allocation14 + $0x4] ss:$12 sps:$4 sm:$0xff]  }
 0x6ea   :  { %v5929_v8 = vld [vmem:[#allocation66_spill] sm:$0xff] }
 0x6ec   :  { %2432 = vmatpush1.bf16.msra.mxu1 %v5253_v37  ;;  %3681 = vmatpush3.bf16.msra.mxu0 %v5256_v53  ;;  %v4110_v37 = vld [vmem:[#allocation14] ss:$12 sps:$4 sm:$0xff]   ;;  %v4111_v53 = vld [vmem:[#allocation14 + $0x8] ss:$12 sps:$4 sm:$0xff]  }
 0x6ed   :  { %2433 = vmatprep.subr.bf16.mxu1 %v5259_v52  ;;  %3682 = vmatprep.subr.bf16.mxu0 %v5850_v30  ;;  %v4112_v52 = vld [vmem:[#allocation14 + $0x1c] ss:$12 sps:$4 sm:$0xff]  }
 0x6f0   :  { %2434 = vmatpush1.bf16.msra.mxu1 %v5263_v54  ;;  %3683 = vmatpush3.bf16.msra.mxu0 %v5266_v55  ;;  %v4113_v54 = vld [vmem:[#allocation14 + $0x18] ss:$12 sps:$4 sm:$0xff]   ;;  %v4114_v55 = vld [vmem:[#allocation14 + $0x20] ss:$12 sps:$4 sm:$0xff]  }
 0x6f1   :  { %2435 = vmatprep.subr.bf16.mxu1 %v5269_v56  ;;  %3684 = vmatprep.subr.bf16.mxu0 %v5850_v30  ;;  %v4115_v56 = vld [vmem:[#allocation14 + $0x34] ss:$12 sps:$4 sm:$0xff]  }
 0x6f2   :  { %v4014_v32 = vpop.eup %4013 }
 0x6f3   :  { %v2333_v17 = vsub.f32 %v5482_v27, %v4014_v32  ;;  %v4016_v44 = vpop.eup %4015  ;;  %v4121_v27 = vld [vmem:[#allocation14 + $0x64] ss:$12 sps:$4 sm:$0xff]  }
 0x6f4   :  { %2436 = vmatpush1.bf16.msra.mxu1 %v5274_v21  ;;  %3685 = vmatpush3.bf16.msra.mxu0 %v5277_v23  ;;  %v4116_v21 = vld [vmem:[#allocation14 + $0x30] ss:$12 sps:$4 sm:$0xff]   ;;  %v4117_v23 = vld [vmem:[#allocation14 + $0x38] ss:$12 sps:$4 sm:$0xff]  }
 0x6f5   :  { %2437 = vmatprep.subr.bf16.mxu1 %v5280_v24  ;;  %3686 = vmatprep.subr.bf16.mxu0 %v5850_v30  ;;  %v2334_v43 = vmul.f32 %v4016_v44, %v2333_v17  ;;  %v4118_v24 = vld [vmem:[#allocation14 + $0x4c] ss:$12 sps:$4 sm:$0xff]  }
 0x6f7   :  { %v5572_v49 = vadd.f32 %v4014_v32, %v2334_v43 }
 0x6f8   :  { %2438 = vmatpush1.bf16.msra.mxu1 %v5286_v28  ;;  %3687 = vmatpush3.bf16.msra.mxu0 %v5289_v57  ;;  %v4119_v28 = vld [vmem:[#allocation14 + $0x48] ss:$12 sps:$4 sm:$0xff]   ;;  %v4120_v57 = vld [vmem:[#allocation14 + $0x50] ss:$12 sps:$4 sm:$0xff]  }
 0x6f9   :  { %2339 = vst [vmem:[#allocation18 + $0x10] sm:$0xff] %v5572_v49  ;;  %v2422_v48 = vpack.c.bf16 %v5572_v49, %v5572_v49  ;;  %2561 = vmatprep.subr.bf16.mxu1 %v4109_v51  ;;  %3692 = vmatprep.subr.bf16.mxu0 %v5850_v30 }
 0x6fb   :  { %2456 = vmatmul.mubr.bf16.vlgmr.msra.gmra.mrb[80].mxu1 %v2422_v48  ;;  %3689 = vmatmul.mubr.bf16.vlgmr.msra.gmra.mrb[72].mxu0 %v2422_v48 }
 0x6fc   :  { %2562 = vmatpush1.bf16.msra.mxu1 %v4110_v37  ;;  %3693 = vmatpush3.bf16.msra.mxu0 %v4111_v53 }
 0x6fd   :  { %2563 = vmatprep.subr.bf16.mxu1 %v4112_v52  ;;  %3694 = vmatprep.subr.bf16.mxu0 %v5850_v30 }
 0x6fe   :  { %2593 = vmatprep.mubr.bf16.mxu1 %v5851_v39  ;;  %3708 = vmatprep.mubr.msk.bf16.mxu0 %vm4375_vm1, %v5850_v30 }
 0x700   :  { %2564 = vmatpush1.bf16.msra.mxu1 %v4113_v54  ;;  %3695 = vmatpush3.bf16.msra.mxu0 %v4114_v55 }
 0x701   :  { %2565 = vmatprep.subr.bf16.mxu1 %v4115_v56  ;;  %3696 = vmatprep.subr.bf16.mxu0 %v5850_v30 }
 0x704   :  { %2566 = vmatpush1.bf16.msra.mxu1 %v4116_v21  ;;  %3697 = vmatpush3.bf16.msra.mxu0 %v4117_v23 }
 0x705   :  { %2567 = vmatprep.subr.bf16.mxu1 %v4118_v24  ;;  %3698 = vmatprep.subr.bf16.mxu0 %v5850_v30 }
 0x708   :  { %2568 = vmatpush1.bf16.msra.mxu1 %v4119_v28  ;;  %3699 = vmatpush3.bf16.msra.mxu0 %v4120_v57  ;;  %v4132_v28 = vld [vmem:[#allocation15] ss:$12 sps:$4 sm:$0xff]   ;;  %v4133_v57 = vld [vmem:[#allocation15 + $0x8] ss:$12 sps:$4 sm:$0xff]  }
 0x709   :  { %2569 = vmatprep.subr.bf16.mxu1 %v4121_v27  ;;  %3700 = vmatprep.subr.bf16.mxu0 %v5850_v30  ;;  %v4135_v27 = vld [vmem:[#allocation15 + $0x18] ss:$12 sps:$4 sm:$0xff]  }
 0x70c   :  { %2570 = vmatpush1.bf16.msra.mxu1 %v4122_v12  ;;  %3701 = vmatpush3.bf16.msra.mxu0 %v4123_v25  ;;  %v4136_v12 = vld [vmem:[#allocation15 + $0x20] ss:$12 sps:$4 sm:$0xff]  }
 0x70d   :  { %2571 = vmatprep.subr.bf16.mxu1 %v4124_v40  ;;  %3702 = vmatprep.subr.bf16.mxu0 %v5850_v30  ;;  %v4137_v25 = vld [vmem:[#allocation15 + $0x34] ss:$12 sps:$4 sm:$0xff]  }
 0x710   :  { %2572 = vmatpush1.bf16.msra.mxu1 %v4125_v11  ;;  %3703 = vmatpush3.bf16.msra.mxu0 %v4126_v29 }
 0x711   :  { %2573 = vmatprep.subr.bf16.mxu1 %v4127_v16  ;;  %3704 = vmatprep.subr.bf16.mxu0 %v5850_v30 }
 0x714   :  { %2574 = vmatpush1.bf16.msra.mxu1 %v4128_v36  ;;  %3705 = vmatpush3.bf16.msra.mxu0 %v4129_v58  ;;  %v4138_v36 = vld [vmem:[#allocation15 + $0x30] ss:$12 sps:$4 sm:$0xff]   ;;  %v4139_v58 = vld [vmem:[#allocation15 + $0x38] ss:$12 sps:$4 sm:$0xff]  }
 0x715   :  { %2575 = vmatprep.subr.bf16.mxu1 %v4130_v9  ;;  %3706 = vmatprep.subr.bf16.mxu0 %v5850_v30  ;;  %v5930_v9 = vld [vmem:[#allocation67_spill] sm:$0xff] }
 0x718   :  { %2576 = vmatpush1.bf16.msra.mxu1 %v4131_v41  ;;  %3707 = vmatpush3.bf16.msra.mxu0 %v5916_v3 }
 0x719   :  { %2643 = vmatprep.subr.bf16.mxu1 %v5917_v4  ;;  %3712 = vmatprep.subr.bf16.mxu0 %v5850_v30 }
 0x7ae   :  { %v2375_v14 = vpop.f32.mrb[76].mxu1  ;;  %v2416_v15 = vpop.f32.mrb[68].mxu0 }
 0x7af   :  { %v2514_v59 = vadd.f32 %v2375_v14, %v5925_v46  ;;  %v2377_v60 = vpop.f32.mrb[77].mxu1  ;;  %v3670_v61 = vpop.f32.mrb[69].mxu0  ;;  %v2528_v45 = vadd.f32 %v5920_v33, %v2416_v15  ;;  %v4141_v15 = vld [vmem:[#allocation15 + $0x48] ss:$12 sps:$4 sm:$0xff]   ;;  %v4142_v46 = vld [vmem:[#allocation15 + $0x50] ss:$12 sps:$4 sm:$0xff]  }
 0x7b0   :  { %v2521_v63 = vadd.f32 %v2377_v60, %v5926_v62  ;;  %v2379_v1 = vpop.f32.mrb[78].mxu1  ;;  %v2419_v2 = vpop.f32.mrb[70].mxu0  ;;  %v4144_v60 = vld [vmem:[#allocation15 + $0x60] ss:$12 sps:$4 sm:$0xff]   ;;  %v4145_v61 = vld [vmem:[#allocation15 + $0x68] ss:$12 sps:$4 sm:$0xff]  }
 0x7b1   :  { %v3189_v5 = vmul.f32 -1.442695, %v2514_v59  ;;  %v2380_v7 = vpop.f32.mrb[79].mxu1  ;;  %v3671_v6 = vpop.f32.mrb[71].mxu0  ;;  %v4143_v59 = vld [vmem:[#allocation15 + $0x64] ss:$12 sps:$4 sm:$0xff]  }
 0x7b2   :  { %v3190_v50 = vmul.f32 -1.442695, %v2521_v63  ;;  %v4146_v62 = vld [vmem:[#allocation15 + $0x7c] ss:$12 sps:$4 sm:$0xff]   ;;  %v4147_v63 = vld [vmem:[#allocation15 + $0x78] ss:$12 sps:$4 sm:$0xff]  }
 0x7b3   :  { %4017 = vpow2.f32 %v3189_v5  ;;  %v4148_v1 = vld [vmem:[#allocation15 + $0x80] ss:$12 sps:$4 sm:$0xff]  }
 0x7b4   :  { %4019 = vpow2.f32 %v3190_v50  ;;  %v4149_v2 = vld [vmem:[#allocation15 + $0x94] ss:$12 sps:$4 sm:$0xff]   ;;  %v4150_v50 = vld [vmem:[#allocation15 + $0x90] ss:$12 sps:$4 sm:$0xff]  }
 0x7bd   :  { %v4018_v3 = vpop.eup %4017 }
 0x7be   :  { %v2518_v35 = vadd.f32 1.0, %v4018_v3  ;;  %v4020_v4 = vpop.eup %4019  ;;  %v4151_v3 = vld [vmem:[#allocation15 + $0x98] ss:$12 sps:$4 sm:$0xff]  }
 0x7bf   :  { %v2525_v20 = vadd.f32 1.0, %v4020_v4 }
 0x7c0   :  { %4021 = vrcp.f32 %v2518_v35  ;;  %v4152_v35 = vld [vmem:[#allocation15 + $0xac] ss:$12 sps:$4 sm:$0xff]  }
 0x7ca   :  { %v4022_v31 = vpop.eup %4021 }
 0x7cb   :  { %v2529_v47 = vmul.f32 %v4022_v31, %v2528_v45  ;;  %v4153_v31 = vld [vmem:[#allocation15 + $0xa8] ss:$12 sps:$4 sm:$0xff]  }
 0x7cd   :  { %v2530_v18 = vadd.f32 %v2529_v47, %v5927_v0  ;;  %v4154_v47 = vld [vmem:[#allocation15 + $0xb0] ss:$12 sps:$4 sm:$0xff]  }
 0x7ce   :  { %v2457_v34 = vpop.f32.mrb[80].mxu1  ;;  %v2498_v38 = vpop.f32.mrb[72].mxu0  ;;  %v3881_v0 = vld [vmem:[%s5750_s10] sm:$0xff]  }
 0x7cf   :  { %4023 = vtanh.f32 %v2530_v18  ;;  %v2535_v19 = vadd.f32 %v2457_v34, %v5928_v10  ;;  %v2459_v42 = vpop.f32.mrb[81].mxu1  ;;  %v3690_v26 = vpop.f32.mrb[73].mxu0  ;;  %v2549_v11 = vadd.f32 %v5457_v13, %v2498_v38  ;;  %v3882_v18 = vld [vmem:[%s5750_s10 + $0x8] sm:$0xff]   ;;  %v3884_v34 = vld [vmem:[%s5750_s10 + $0x18] sm:$0xff]   ;;  %v3885_v38 = vld [vmem:[%s5750_s10 + $0x20] sm:$0xff]  }
 0x7d0   :  { %v2542_v32 = vadd.f32 %v2459_v42, %v5929_v8  ;;  %v2461_v17 = vpop.f32.mrb[82].mxu1  ;;  %v2501_v44 = vpop.f32.mrb[74].mxu0  ;;  %4025 = vrcp.f32 %v2525_v20  ;;  %v3883_v20 = vld [vmem:[%s5750_s10 + $0x10] sm:$0xff]   ;;  %v3886_v10 = vld [vmem:[%s5750_s10 + $0x28] sm:$0xff]   ;;  %v3888_v42 = vld [vmem:[%s5750_s10 + $0x38] sm:$0xff]  }
 0x7d1   :  { %v3191_v43 = vmul.f32 -1.442695, %v2535_v19  ;;  %v2462_v48 = vpop.f32.mrb[83].mxu1  ;;  %v3691_v51 = vpop.f32.mrb[75].mxu0  ;;  %v3887_v19 = vld [vmem:[%s5750_s10 + $0x30] sm:$0xff]   ;;  %v3889_v26 = vld [vmem:[%s5751_s11] sm:$0xff]  }
 0x7d2   :  { %v3192_v54 = vmul.f32 -1.442695, %v2542_v32  ;;  %v3890_v8 = vld [vmem:[%s5751_s11 + $0x8] sm:$0xff]   ;;  %v3891_v32 = vld [vmem:[%s5751_s11 + $0x10] sm:$0xff]   ;;  %v3892_v17 = vld [vmem:[%s5751_s11 + $0x18] sm:$0xff]  }
 0x7d3   :  { %4027 = vpow2.f32 %v3191_v43  ;;  %v3893_v44 = vld [vmem:[%s5751_s11 + $0x20] sm:$0xff]   ;;  %v3894_v43 = vld [vmem:[%s5751_s11 + $0x28] sm:$0xff]   ;;  %v3895_v48 = vld [vmem:[%s5751_s11 + $0x30] sm:$0xff]  }
 0x7d4   :  { %4029 = vpow2.f32 %v3192_v54  ;;  %v3896_v51 = vld [vmem:[%s5751_s11 + $0x38] sm:$0xff]   ;;  %s4377_s11 = smov [#allocation18]  }
 0x7d5   :  { %s3025_s24 = sshll.u32 %s4377_s11, 4  ;;  %s3026_s24 = int_to_ptr.vmem [resolvable:$true] %s3025_s24 }
 0x7d6   :  { %s4287_s0 = scalar_lea.vmem %s3026_s24, 1024  ;;  %p4292_p7 = scmp.lt.s32.totalorder %s3026_s24, %s3026_s24 }
 0x7d7   :  { %p4288_p6 = scmp.ne.s32.totalorder %s3026_s24, %s4287_s0  ;;  %p4293_p8 = scmp.lt.s32.totalorder %s4287_s0, %s4287_s0 }
 0x7d9   :  { %v4024_v37 = vpop.eup %4023  ;;  %p4294_p9 = por %p4293_p8, %p4292_p7 }
 0x7da   :  { %v2532_v53 = vsub.f32 %v5533_v22, %v4024_v37  ;;  %v4026_v52 = vpop.eup %4025  ;;  %v4134_v22 = vld [vmem:[#allocation15 + $0x1c] ss:$12 sps:$4 sm:$0xff]  }
 0x7db   :  { %p4295_p10 = pnand %p4294_p9, %p4288_p6 }
 0x7dc   :  { %v2533_v55 = vmul.f32 %v4026_v52, %v2532_v53  ;;  %v5931_v52 = vld [vmem:[#allocation41_spill] sm:$0xff] }
 0x7dd   :  { %v4028_v56 = vpop.eup %4027 }
 0x7de   :  { %v2539_v21 = vadd.f32 1.0, %v4028_v56  ;;  %v5600_v23 = vadd.f32 %v4024_v37, %v2533_v55  ;;  %v4030_v40 = vpop.eup %4029 }
 0x7df   :  { %v2546_v14 = vadd.f32 1.0, %v4030_v40 }
 0x7e0   :  { %4031 = vrcp.f32 %v2539_v21  ;;  %2557 = vst [vmem:[#allocation17 + $0x30] sm:$0xff] %v5600_v23  ;;  %v2560_v24 = vpack.c.bf16 %v5600_v23, %v5600_v23  ;;  %v5932_v21 = vld [vmem:[#allocation43_spill] sm:$0xff] }
 0x7e2   :  { %2594 = vmatmul.mubr.bf16.vlgmr.msra.gmra.mrb[84].mxu1 %v2560_v24  ;;  %3709 = vmatmul.mubr.bf16.vlgmr.msra.gmra.mrb[76].mxu0 %v2560_v24 }
 0x7e3   :  { %2644 = vmatpush1.bf16.msra.mxu1 %v4132_v28  ;;  %3713 = vmatpush3.bf16.msra.mxu0 %v4133_v57 }
 0x7e4   :  { %2645 = vmatprep.subr.bf16.mxu1 %v4134_v22  ;;  %3714 = vmatprep.subr.bf16.mxu0 %v5850_v30 }
 0x7e5   :  { %2675 = vmatprep.mubr.bf16.mxu1 %v5851_v39  ;;  %3728 = vmatprep.mubr.msk.bf16.mxu0 %vm4375_vm1, %v5850_v30  ;;  %v4140_v39 = vld [vmem:[#allocation15 + $0x4c] ss:$12 sps:$4 sm:$0xff]  }
 0x7e7   :  { %2646 = vmatpush1.bf16.msra.mxu1 %v4135_v27  ;;  %3715 = vmatpush3.bf16.msra.mxu0 %v4136_v12 }
 0x7e8   :  { %2647 = vmatprep.subr.bf16.mxu1 %v4137_v25  ;;  %3716 = vmatprep.subr.bf16.mxu0 %v5850_v30 }
 0x7ea   :  { %v4032_v29 = vpop.eup %4031 }
 0x7eb   :  { %v2550_v16 = vmul.f32 %v4032_v29, %v2549_v11  ;;  %2648 = vmatpush1.bf16.msra.mxu1 %v4138_v36  ;;  %3717 = vmatpush3.bf16.msra.mxu0 %v4139_v58  ;;  %v5933_v58 = vld [vmem:[#allocation56_spill] sm:$0xff] }
 0x7ec   :  { %2649 = vmatprep.subr.bf16.mxu1 %v4140_v39  ;;  %3718 = vmatprep.subr.bf16.mxu0 %v5850_v30 }
 0x7ed   :  { %v2551_v41 = vadd.f32 %v2550_v16, %v5930_v9 }
 0x7ef   :  { %4033 = vtanh.f32 %v2551_v41  ;;  %2650 = vmatpush1.bf16.msra.mxu1 %v4141_v15  ;;  %3719 = vmatpush3.bf16.msra.mxu0 %v4142_v46  ;;  %v5934_v15 = vld [vmem:[#allocation60_spill] sm:$0xff] }
 0x7f0   :  { %2651 = vmatprep.subr.bf16.mxu1 %v4143_v59  ;;  %3720 = vmatprep.subr.bf16.mxu0 %v5850_v30  ;;  %4035 = vrcp.f32 %v2546_v14 }
 0x7f3   :  { %2652 = vmatpush1.bf16.msra.mxu1 %v4144_v60  ;;  %3721 = vmatpush3.bf16.msra.mxu0 %v4145_v61  ;;  %v5935_v61 = vld [vmem:[#allocation62_spill] sm:$0xff] }
 0x7f4   :  { %2653 = vmatprep.subr.bf16.mxu1 %v4146_v62  ;;  %3722 = vmatprep.subr.bf16.mxu0 %v5850_v30 }
 0x7f7   :  { %2654 = vmatpush1.bf16.msra.mxu1 %v4147_v63  ;;  %3723 = vmatpush3.bf16.msra.mxu0 %v4148_v1 }
 0x7f8   :  { %2655 = vmatprep.subr.bf16.mxu1 %v4149_v2  ;;  %3724 = vmatprep.subr.bf16.mxu0 %v5850_v30 }
 0x7f9   :  { %v4034_v5 = vpop.eup %4033 }
 0x7fa   :  { %v2553_v7 = vsub.f32 %v5572_v49, %v4034_v5  ;;  %v4036_v6 = vpop.eup %4035 }
 0x7fb   :  { %2656 = vmatpush1.bf16.msra.mxu1 %v4150_v50  ;;  %3725 = vmatpush3.bf16.msra.mxu0 %v4151_v3 }
 0x7fc   :  { %2657 = vmatprep.subr.bf16.mxu1 %v4152_v35  ;;  %3726 = vmatprep.subr.bf16.mxu0 %v5850_v30  ;;  %v2554_v4 = vmul.f32 %v4036_v6, %v2553_v7 }
 0x7fe   :  { %v5618_v45 = vadd.f32 %v4034_v5, %v2554_v4 }
 0x7ff   :  { %2658 = vmatpush1.bf16.msra.mxu1 %v4153_v31  ;;  %3727 = vmatpush3.bf16.msra.mxu0 %v4154_v47 }
 0x800   :  { %2559 = vst [vmem:[#allocation18 + $0x8] sm:$0xff] %v5618_v45  ;;  %v2642_v49 = vpack.c.bf16 %v5618_v45, %v5618_v45  ;;  %3752 = vmatprep.subr.bf16.mxu0 %v5850_v30  ;;  %3732 = vmatprep.subr.bf16.mxu1 %v5850_v30 }
 0x802   :  { %2676 = vmatmul.mubr.bf16.vlgmr.msra.gmra.mrb[88].mxu1 %v2642_v49  ;;  %3729 = vmatmul.mubr.bf16.vlgmr.msra.gmra.mrb[80].mxu0 %v2642_v49 }
 0x803   :  { %3768 = vmatprep.mubr.msk.bf16.mxu0 %vm4375_vm1, %v5850_v30  ;;  %3748 = vmatprep.mubr.msk.bf16.mxu1 %vm4375_vm1, %v5850_v30 }
 0x804   :  { %3753 = vmatpush3.bf16.msra.mxu0 %v3881_v0  ;;  %3733 = vmatpush3.bf16.msra.mxu1 %v3889_v26 }
 0x805   :  { %3754 = vmatprep.subr.bf16.mxu0 %v5850_v30  ;;  %3734 = vmatprep.subr.bf16.mxu1 %v5850_v30 }
 0x808   :  { %3755 = vmatpush3.bf16.msra.mxu0 %v3882_v18  ;;  %3735 = vmatpush3.bf16.msra.mxu1 %v3890_v8 }
 0x809   :  { %3756 = vmatprep.subr.bf16.mxu0 %v5850_v30  ;;  %3736 = vmatprep.subr.bf16.mxu1 %v5850_v30 }
 0x80c   :  { %3757 = vmatpush3.bf16.msra.mxu0 %v3883_v20  ;;  %3737 = vmatpush3.bf16.msra.mxu1 %v3891_v32 }
 0x80d   :  { %3758 = vmatprep.subr.bf16.mxu0 %v5850_v30  ;;  %3738 = vmatprep.subr.bf16.mxu1 %v5850_v30 }
 0x810   :  { %3759 = vmatpush3.bf16.msra.mxu0 %v3884_v34  ;;  %3739 = vmatpush3.bf16.msra.mxu1 %v3892_v17 }
 0x811   :  { %3760 = vmatprep.subr.bf16.mxu0 %v5850_v30  ;;  %3740 = vmatprep.subr.bf16.mxu1 %v5850_v30 }
 0x814   :  { %3761 = vmatpush3.bf16.msra.mxu0 %v3885_v38  ;;  %3741 = vmatpush3.bf16.msra.mxu1 %v3893_v44  ;;  %v5936_v38 = vld [vmem:[#allocation63_spill] sm:$0xff] }
 0x815   :  { %3762 = vmatprep.subr.bf16.mxu0 %v5850_v30  ;;  %3742 = vmatprep.subr.bf16.mxu1 %v5850_v30 }
 0x818   :  { %3763 = vmatpush3.bf16.msra.mxu0 %v3886_v10  ;;  %3743 = vmatpush3.bf16.msra.mxu1 %v3894_v43 }
 0x819   :  { %3764 = vmatprep.subr.bf16.mxu0 %v5850_v30  ;;  %3744 = vmatprep.subr.bf16.mxu1 %v5850_v30 }
 0x81c   :  { %3765 = vmatpush3.bf16.msra.mxu0 %v3887_v19  ;;  %3745 = vmatpush3.bf16.msra.mxu1 %v3895_v48 }
 0x81d   :  { %3766 = vmatprep.subr.bf16.mxu0 %v5850_v30  ;;  %3746 = vmatprep.subr.bf16.mxu1 %v5850_v30 }
 0x820   :  { %3767 = vmatpush3.bf16.msra.mxu0 %v3888_v42  ;;  %3747 = vmatpush3.bf16.msra.mxu1 %v3896_v51 }
 0x8b5   :  { %v2595_v37 = vpop.f32.mrb[84].mxu1  ;;  %v2636_v53 = vpop.f32.mrb[76].mxu0 }
 0x8b6   :  { %v2734_v54 = vadd.f32 %v2595_v37, %v5931_v52  ;;  %v2597_v55 = vpop.f32.mrb[85].mxu1  ;;  %v3710_v56 = vpop.f32.mrb[77].mxu0  ;;  %v2748_v29 = vadd.f32 %v5920_v33, %v2636_v53 }
 0x8b7   :  { %v2741_v24 = vadd.f32 %v2597_v55, %v5932_v21  ;;  %v2599_v28 = vpop.f32.mrb[86].mxu1  ;;  %v2639_v57 = vpop.f32.mrb[78].mxu0 }
 0x8b8   :  { %v3193_v22 = vmul.f32 -1.442695, %v2734_v54  ;;  %v2600_v27 = vpop.f32.mrb[87].mxu1  ;;  %v3711_v12 = vpop.f32.mrb[79].mxu0 }
 0x8b9   :  { %v3194_v25 = vmul.f32 -1.442695, %v2741_v24 }
 0x8ba   :  { %4037 = vpow2.f32 %v3193_v22 }
 0x8bb   :  { %4039 = vpow2.f32 %v3194_v25 }
 0x8c4   :  { %v4038_v40 = vpop.eup %4037 }
 0x8c5   :  { %v2738_v11 = vadd.f32 1.0, %v4038_v40  ;;  %v4040_v30 = vpop.eup %4039 }
 0x8c6   :  { %v2745_v9 = vadd.f32 1.0, %v4040_v30 }
 0x8c7   :  { %4041 = vrcp.f32 %v2738_v11 }
 0x8d1   :  { %v4042_v16 = vpop.eup %4041 }
 0x8d2   :  { %v2749_v36 = vmul.f32 %v4042_v16, %v2748_v29 }
 0x8d4   :  { %v2750_v39 = vadd.f32 %v2749_v36, %v5933_v58 }
 0x8d5   :  { %v2677_v41 = vpop.f32.mrb[88].mxu1  ;;  %v2718_v14 = vpop.f32.mrb[80].mxu0 }
 0x8d6   :  { %4043 = vtanh.f32 %v2750_v39  ;;  %v2755_v46 = vadd.f32 %v2677_v41, %v5934_v15  ;;  %v2679_v59 = vpop.f32.mrb[89].mxu1  ;;  %v3730_v60 = vpop.f32.mrb[81].mxu0  ;;  %v2769_v18 = vadd.f32 %v5457_v13, %v2718_v14 }
 0x8d7   :  { %v2762_v62 = vadd.f32 %v2679_v59, %v5935_v61  ;;  %v2681_v63 = vpop.f32.mrb[90].mxu1  ;;  %v2721_v1 = vpop.f32.mrb[82].mxu0  ;;  %4045 = vrcp.f32 %v2745_v9 }
 0x8d8   :  { %v3195_v2 = vmul.f32 -1.442695, %v2755_v46  ;;  %v2682_v5 = vpop.f32.mrb[91].mxu1  ;;  %v3731_v33 = vpop.f32.mrb[83].mxu0 }
 0x8d9   :  { %v3196_v3 = vmul.f32 -1.442695, %v2762_v62 }
 0x8da   :  { %4047 = vpow2.f32 %v3195_v2 }
 0x8db   :  { %4049 = vpow2.f32 %v3196_v3 }
 0x8e0   :  { %v4044_v7 = vpop.eup %4043 }
 0x8e1   :  { %v2752_v6 = vsub.f32 %v5600_v23, %v4044_v7  ;;  %v4046_v50 = vpop.eup %4045 }
 0x8e3   :  { %v2753_v35 = vmul.f32 %v4046_v50, %v2752_v6 }
 0x8e4   :  { %v4048_v4 = vpop.eup %4047 }
 0x8e5   :  { %v2759_v31 = vadd.f32 1.0, %v4048_v4  ;;  %v2754_v47 = vadd.f32 %v4044_v7, %v2753_v35  ;;  %v4050_v0 = vpop.eup %4049 }
 0x8e6   :  { %v2766_v19 = vadd.f32 1.0, %v4050_v0 }
 0x8e7   :  { %4051 = vrcp.f32 %v2759_v31  ;;  %2777 = vst [vmem:[#allocation17 + $0x38] sm:$0xff] %v2754_v47  ;;  %v2784_v49 = vpack.c.bf16 %v2754_v47, %v2754_v47 }
 0x8e9   :  { %3769 = vmatmul.mubr.bf16.vlgmr.msra.gmra.mrb[84].mxu0 %v2784_v49 }
 0x8f1   :  { %v4052_v20 = vpop.eup %4051 }
 0x8f2   :  { %v2770_v34 = vmul.f32 %v4052_v20, %v2769_v18 }
 0x8f4   :  { %v2771_v10 = vadd.f32 %v2770_v34, %v5936_v38 }
 0x8f6   :  { %4053 = vtanh.f32 %v2771_v10 }
 0x8f7   :  { %4055 = vrcp.f32 %v2766_v19 }
 0x900   :  { %v4054_v23 = vpop.eup %4053 }
 0x901   :  { %v2773_v42 = vsub.f32 %v5618_v45, %v4054_v23  ;;  %v4056_v26 = vpop.eup %4055 }
 0x903   :  { %v2774_v8 = vmul.f32 %v4056_v26, %v2773_v42 }
 0x905   :  { %v2775_v32 = vadd.f32 %v4054_v23, %v2774_v8 }
 0x907   :  { %2778 = vst [vmem:[#allocation18] sm:$0xff] %v2775_v32  ;;  %v2801_v17 = vpack.c.bf16 %v2775_v32, %v2775_v32 }
 0x909   :  { %3749 = vmatmul.mubr.bf16.vlgmr.msra.gmra.mrb[92].mxu1 %v2801_v17 }
 0x90a   :  { %4298 = shalt.err (!%p4295_p10)
}
 0x90b   :  { %s4299_s27 = scalar_lea.hbm %s5754_s14, 1024 }
 0x90c   :  { %p4300_p11 = scmp.ne.s32.totalorder %s5754_s14, %s4299_s27  ;;  %p4303_p12 = scmp.lt.u32.totalorder %s4299_s27, %s5754_s14 }
 0x90e   :  { %p4305_p13 = pnand %p4303_p12, %p4300_p11 }
 0x910   :  { %4308 = shalt.err (!%p4305_p13)
}
 0x911   :  { %s4379_s1 = smov 128   ;;  %s4380_s21 = smov 8  }
 0x912   :  { %3031 = dma.vmem_to_hbm [thread:$0]  %s3026_s24, 1024, %s5754_s14, [#allocation19], %s4379_s1, %s4379_s1, %s4380_s21  }
 0x913   :  { %s4309_s20 = scalar_lea.vmem %s3010_s26, 1024  ;;  %p4314_p1 = scmp.lt.s32.totalorder %s3010_s26, %s3010_s26 }
 0x914   :  { %p4310_p0 = scmp.ne.s32.totalorder %s3010_s26, %s4309_s20  ;;  %p4315_p2 = scmp.lt.s32.totalorder %s4309_s20, %s4309_s20 }
 0x916   :  { %p4316_p3 = por %p4315_p2, %p4314_p1 }
 0x918   :  { %p4317_p4 = pnand %p4316_p3, %p4310_p0 }
 0x91a   :  { %4320 = shalt.err (!%p4317_p4)
}
 0x91b   :  { %s4321_s6 = scalar_lea.hbm %s5753_s13, 1024 }
 0x91c   :  { %p4322_p5 = scmp.ne.s32.totalorder %s5753_s13, %s4321_s6  ;;  %p4325_p6 = scmp.lt.u32.totalorder %s4321_s6, %s5753_s13 }
 0x91e   :  { %p4327_p7 = pnand %p4325_p6, %p4322_p5 }
 0x920   :  { %4330 = shalt.err (!%p4327_p7)
}
 0x921   :  { %3015 = dma.vmem_to_hbm [thread:$0]  %s3010_s26, 1024, %s5753_s13, [#allocation8], %s4379_s1, %s4379_s1, %s4380_s21  }
 0x922   :  { %v3213_v51 = vld [vmem:[%s5752_s12] ss:$0 sm:$0xff]  ;;  %s4381_s11 = smov [#allocation20]  }
 0x923   :  { %s3038_s24 = sshll.u32 %s4381_s11, 4  ;;  %s3039_s24 = int_to_ptr.vmem [resolvable:$true] %s3038_s24 }
 0x924   :  { %s4331_s13 = scalar_lea.vmem %s3039_s24, 128  ;;  %p4336_p9 = scmp.lt.s32.totalorder %s3039_s24, %s3039_s24 }
 0x925   :  { %p4332_p8 = scmp.ne.s32.totalorder %s3039_s24, %s4331_s13  ;;  %p4337_p10 = scmp.lt.s32.totalorder %s4331_s13, %s4331_s13 }
 0x927   :  { %p4338_p11 = por %p4337_p10, %p4336_p9 }
 0x929   :  { %p4339_p12 = pnand %p4338_p11, %p4332_p8 }
 0x9bc   :  { %v2988_v13 = vpop.f32.mrb[84].mxu0 }
 0x9bd   :  { %v3770_v45 = vpop.f32.mrb[85].mxu0 }
 0x9be   :  { %v2991_v44 = vpop.f32.mrb[86].mxu0 }
 0x9bf   :  { %v3771_v43 = vpop.f32.mrb[87].mxu0 }
 0x9dc   :  { %v2900_v48 = vpop.f32.mrb[92].mxu1 }
 0x9dd   :  { %v2989_v37 = vadd.f32 %v2988_v13, %v2900_v48  ;;  %v3750_v53 = vpop.f32.mrb[93].mxu1 }
 0x9de   :  { %v2903_v52 = vpop.f32.mrb[94].mxu1 }
 0x9df   :  { %v3001_v54 = vadd.f32 %v3213_v51, %v2989_v37  ;;  %v3751_v55 = vpop.f32.mrb[95].mxu1 }
 0x9e1   :  { %4057 = vtanh.f32 %v3001_v54 }
 0x9eb   :  { %v4058_v56 = vpop.eup %4057 }
 0x9ec   :  { %3003 = vst [vmem:[#allocation20] sm:$0xff] %v4058_v56 }
 0x9ed   :  { %4342 = shalt.err (!%p4339_p12)
}
 0x9ee   :  { %s4343_s26 = scalar_lea.hbm %s5755_s15, 128 }
 0x9ef   :  { %p4344_p13 = scmp.ne.s32.totalorder %s5755_s15, %s4343_s26  ;;  %p4347_p0 = scmp.lt.u32.totalorder %s4343_s26, %s5755_s15 }
 0x9f1   :  { %p4349_p1 = pnand %p4347_p0, %p4344_p13 }
 0x9f3   :  { %4352 = shalt.err (!%p4349_p1)
}
 0x9f4   :  { %3041 = dma.vmem_to_hbm [thread:$0]  %s3039_s24, 128, %s5755_s15, [#allocation19]  }
 0x9f5   :  { %4361 = dma.done.wait [#allocation8], 1024  }
 0x9f6   :  { %4362 = vsyncadd [#allocation8], 4294966272 }
 0x9f7   :  { %4363 = dma.done.wait [#allocation19], 1152  }
 0x9f8   :  { %4364 = vsyncadd [#allocation19], 4294966144 }
 0x9f9   :  { %3051 = vsyncpa [#allocation7], 1 }
 0x9fa   :  { %3052 = vsyncpa [#allocation10], 1 }
 0x9fb   :  { %3053 = vsyncpa [#allocation13], 1 }
 0x9fc   :  { %3054 = vsyncpa [#allocation16], 1 }
 0x9fd   :  { %3055 = vsyncpa [#allocation8], 1 }
 0x9fe   :  { %3056 = vsyncpa [#allocation19], 1 }

</bundles_post_ra>
